<compile_context>
chip_gen: v6e
topology: v6e:2x2x1
jax: 0.10.0
libtpu: 0.0.40
codegen_flags: <defaults>
</compile_context>

<pallas_src>
import jax
import jax.numpy as jnp
from jax.experimental import pallas as pl
from jax.experimental.pallas import tpu as pltpu

# Module hyper-parameters (defaults from the PyTorch __init__).
INPUT_SIZE = 100
HIDDEN1 = 80
HIDDEN2 = 100
NUM_CLASSES = 10

PAD = 128          # all feature dims are zero-padded to one lane-width
NUM_LAYERS = 6     # mlp1..mlp5 + classify


def _round_up(n, m):
    return ((n + m - 1) // m) * m


def mlp_kernel(x_ref, w_ref, b_ref, out_ref, xpad_ref):
    """Fused 6-layer MLP on one (bt, ...) batch tile.

    x_ref   : (bt, 100)       raw input rows (any float dtype, usually f32)
    w_ref   : (6, 128, 128)   stacked, zero-padded weights (compute dtype)
    b_ref   : (6, 1, 128)     stacked, zero-padded biases (f32)
    out_ref : (bt, 128)       logits (cols >= 10 are zero, sliced outside)
    xpad_ref: (bt, 128)       VMEM scratch: lane-dense, zero-padded input

    All matmuls run on the MXU with f32 accumulation; bias add + ReLU on the
    VPU in f32, then the activation is cast back to the matmul operand dtype.
    Zero padding is exact: padded input lanes are zeroed here, padded weight
    rows/cols and biases are zero, and ReLU(0)=0 keeps padded lanes zero.
    """
    cdt = w_ref.dtype

    # On-chip pad 100 -> 128 lanes + cast to the MXU operand dtype. The tail
    # lanes MUST be exactly zero (garbage * 0 is fine, but NaN/Inf are not).
    xpad_ref[...] = jnp.zeros_like(xpad_ref)
    xpad_ref[:, :INPUT_SIZE] = x_ref[...].astype(cdt)

    h = xpad_ref[...]
    for layer in range(NUM_LAYERS):
        z = jnp.dot(h, w_ref[layer],
                    preferred_element_type=jnp.float32) + b_ref[layer]
        if layer < NUM_LAYERS - 1:
            h = jnp.maximum(z, 0.0).astype(cdt)
        else:
            h = z
    out_ref[...] = h.astype(out_ref.dtype)


def _pad2d(a, rows=PAD, cols=PAD):
    return jnp.pad(a, ((0, rows - a.shape[0]), (0, cols - a.shape[1])))


def mlp_forward(x, params, *, batch_tile=4096,
                compute_dtype=jnp.bfloat16, out_dtype=jnp.bfloat16):
    """Run the fused MLP kernel, tiling over the batch dimension.

    The batch is NOT padded in HBM: the last tile may be ragged (Pallas masks
    the out-of-bounds rows on read/write).  The grid is forced to an even
    length >= 2 whenever B permits, so v7x's two TensorCores both get work.
    """
    (w1, b1, w2, b2, w3, b3, w4, b4, w5, b5, wc, bc) = params
    B, F = x.shape
    assert F == INPUT_SIZE

    # --- batch-tile selection -----------------------------------------------
    target_tiles = max(2, pl.cdiv(B, batch_tile))
    if target_tiles % 2:
        target_tiles += 1                       # even #steps for v7x megacore
    bt = max(16, _round_up(pl.cdiv(B, target_tiles), 16))   # 16: bf16 sublane
    num_tiles = pl.cdiv(B, bt)                  # last tile may be ragged

    # --- stack zero-padded weights / biases into single constant slabs ------
    w_stack = jnp.stack(
        [_pad2d(w) for w in (w1, w2, w3, w4, w5, wc)]
    ).astype(compute_dtype)                                  # (6, 128, 128)
    b_stack = jnp.stack(
        [_pad2d(b, rows=1, cols=PAD) for b in (b1, b2, b3, b4, b5, bc)]
    ).astype(jnp.float32)                                    # (6, 1, 128)

    def make_call(single_buffer_consts):
        const_kw = (
            {"pipeline_mode": pl.Buffered(1)} if single_buffer_consts else {}
        )
        in_specs = [
            pl.BlockSpec((bt, INPUT_SIZE), lambda i: (i, 0)),            # x
            pl.BlockSpec((NUM_LAYERS, PAD, PAD),
                         lambda i: (0, 0, 0), **const_kw),               # W
            pl.BlockSpec((NUM_LAYERS, 1, PAD),
                         lambda i: (0, 0, 0), **const_kw),               # b
        ]
        out_spec = pl.BlockSpec((bt, PAD), lambda i: (i, 0))

        grid_spec = pltpu.PrefetchScalarGridSpec(
            num_scalar_prefetch=0,
            grid=(num_tiles,),
            in_specs=in_specs,
            out_specs=out_spec,
            scratch_shapes=[pltpu.VMEM((bt, PAD), compute_dtype)],
        )

        cost = pl.CostEstimate(
            flops=2 * num_tiles * bt * NUM_LAYERS * PAD * PAD,
            transcendentals=0,
            bytes_accessed=(B * INPUT_SIZE * x.dtype.itemsize
                            + B * PAD * jnp.dtype(out_dtype).itemsize
                            + w_stack.size * w_stack.dtype.itemsize
                            + b_stack.size * 4),
        )

        return pl.pallas_call(
            mlp_kernel,
            out_shape=jax.ShapeDtypeStruct((B, PAD), out_dtype),
            grid_spec=grid_spec,
            compiler_params=pltpu.CompilerParams(
                # Single independent batch axis -> shards across both
                # TensorCores on v7x when the grid length is >= 2.
                dimension_semantics=("parallel",),
                # Explicit scope: bt=4096 (bf16 in/out) uses well under
                # 16 MiB; 32 MiB leaves headroom on v7x (64 MiB physical)
                # and is safely above v5e's 16 MiB default scope.
                vmem_limit_bytes=32 * 1024 * 1024,
            ),
            cost_estimate=cost,
        )

    try:
        out = make_call(True)(x, w_stack, b_stack)
    except Exception:
        # Older jax without BlockSpec pipeline_mode support: constant-index
        # blocks are still only DMA'd once by the pipeline's revisit logic.
        out = make_call(False)(x, w_stack, b_stack)

    # Drop the 118 zero logit columns outside the kernel (lane-dense store
    # inside, cheap slice outside).
    return out[:, :NUM_CLASSES]


def _xavier_uniform(key, fan_in, fan_out, gain):
    limit = gain * jnp.sqrt(6.0 / (fan_in + fan_out))
    # Shape is (in_features, out_features): already transposed for x @ W.
    return jax.random.uniform(
        key, (fan_in, fan_out), dtype=jnp.float32, minval=-limit, maxval=limit)


def init_params(key):
    """Deterministic xavier-uniform init matching init_params('xavier').

    Xavier limits use the ORIGINAL fan_in/fan_out (100/80/10), not the padded
    128 dims — padding happens later in the wrapper.
    """
    relu_gain = jnp.sqrt(2.0)   # torch calculate_gain('relu')
    lin_gain = 1.0              # torch calculate_gain('linear')
    keys = jax.random.split(key, 6)

    dims = [
        (INPUT_SIZE, HIDDEN1, relu_gain),   # mlp1
        (HIDDEN1, HIDDEN2, relu_gain),      # mlp2
        (HIDDEN2, HIDDEN1, relu_gain),      # mlp3
        (HIDDEN1, HIDDEN2, relu_gain),      # mlp4
        (HIDDEN2, HIDDEN1, relu_gain),      # mlp5
        (HIDDEN1, NUM_CLASSES, lin_gain),   # classify
    ]
    params = []
    for k, (fin, fout, gain) in zip(keys, dims):
        w = _xavier_uniform(k, fin, fout, gain)
        b = jnp.zeros((1, fout), dtype=jnp.float32)  # biases filled with 0
        params.extend([w, b])
    return tuple(params)


def mlp_reference(x, params):
    """Pure-JAX f32 reference of the same forward pass."""
    (w1, b1, w2, b2, w3, b3, w4, b4, w5, b5, wc, bc) = params
    h = jnp.maximum(x @ w1 + b1, 0.0)
    h = jnp.maximum(h @ w2 + b2, 0.0)
    h = jnp.maximum(h @ w3 + b3, 0.0)
    h = jnp.maximum(h @ w4 + b4, 0.0)
    h = jnp.maximum(h @ w5 + b5, 0.0)
    return h @ wc + bc


if __name__ == "__main__":
    key = jax.random.PRNGKey(0)
    k_params, k_x = jax.random.split(key)

    params = init_params(k_params)

    # Small test shape: batch=300 is not a tile multiple, so it exercises the
    # ragged last tile, and the derived tile (160) gives a 2-step grid so v7x
    # uses both TensorCores.
    batch = 300
    x = jax.random.normal(k_x, (batch, INPUT_SIZE), dtype=jnp.float32)

    y_ref = mlp_reference(x, params)

    # Default fast path: bf16 MXU operands + bf16 logit store.
    y = mlp_forward(x, params)
    y = jax.block_until_ready(y)
    assert y.shape == (batch, NUM_CLASSES)
    assert jnp.allclose(y.astype(jnp.float32), y_ref, atol=2.5e-1, rtol=5e-2), \
        "bf16 path mismatch vs reference"

    # Full-precision path: tight structural check of the same kernel.
    y32 = mlp_forward(x, params, compute_dtype=jnp.float32,
                      out_dtype=jnp.float32)
    y32 = jax.block_until_ready(y32)
    assert jnp.allclose(y32, y_ref, atol=2e-2, rtol=2e-2), \
        "f32 path mismatch vs reference"

    print("KERNEL_OK")
</pallas_src>

<mosaic_0001>
module attributes {stable_mosaic.version = 11 : i64} {
  func.func @mlp_kernel(%arg0: i32, %arg1: memref<160x100xf32, #tpu.memory_space<vmem>>, %arg2: memref<6x128x128xbf16, #tpu.memory_space<vmem>>, %arg3: memref<6x1x128xf32, #tpu.memory_space<vmem>>, %arg4: memref<160x128xbf16, #tpu.memory_space<vmem>>, %arg5: memref<160x128xbf16, #tpu.memory_space<vmem>>) attributes {dimension_semantics = [#tpu.dimension_semantics<parallel>], iteration_bounds = array<i64: 2>, scalar_prefetch = 0 : i64, scratch_operands = 1 : i64, tpu.core_type = #tpu.core_type<tc>, window_params = [{transform_indices = @transform_0, window_bounds = array<i64: 160, 100>}, {pipeline_mode = #tpu.pipeline_mode<synchronous>, transform_indices = @transform_1, window_bounds = array<i64: 6, 128, 128>}, {pipeline_mode = #tpu.pipeline_mode<synchronous>, transform_indices = @transform_2, window_bounds = array<i64: 6, 1, 128>}, {transform_indices = @transform_3, window_bounds = array<i64: 160, 128>}]} {
    %cst = arith.constant 0.000000e+00 : bf16
    %0 = vector.broadcast %cst : bf16 to vector<160x128xbf16>
    %c0 = arith.constant 0 : index
    %c0_0 = arith.constant 0 : index
    %1 = vector.load %arg5[%c0, %c0_0] : memref<160x128xbf16, #tpu.memory_space<vmem>>, vector<160x128xbf16>
    tpu.vector_store %arg5[%c0, %c0_0], %0 {strides = array<i32>} : memref<160x128xbf16, #tpu.memory_space<vmem>>, vector<160x128xbf16>,
    %c0_1 = arith.constant 0 : index
    %c0_2 = arith.constant 0 : index
    %2 = vector.load %arg1[%c0_1, %c0_2] : memref<160x100xf32, #tpu.memory_space<vmem>>, vector<160x100xf32>
    %3 = arith.truncf %2 : vector<160x100xf32> to vector<160x100xbf16>
    %c0_3 = arith.constant 0 : index
    %c0_4 = arith.constant 0 : index
    %4 = vector.load %arg5[%c0_3, %c0_4] : memref<160x128xbf16, #tpu.memory_space<vmem>>, vector<160x100xbf16>
    tpu.vector_store %arg5[%c0_3, %c0_4], %3 {strides = array<i32>} : memref<160x128xbf16, #tpu.memory_space<vmem>>, vector<160x100xbf16>,
    %c0_5 = arith.constant 0 : index
    %c0_6 = arith.constant 0 : index
    %5 = vector.load %arg5[%c0_5, %c0_6] : memref<160x128xbf16, #tpu.memory_space<vmem>>, vector<160x128xbf16>
    %c0_7 = arith.constant 0 : index
    %c0_8 = arith.constant 0 : index
    %c0_9 = arith.constant 0 : index
    %6 = vector.load %arg2[%c0_7, %c0_8, %c0_9] : memref<6x128x128xbf16, #tpu.memory_space<vmem>>, vector<1x128x128xbf16>
    %7 = vector.shape_cast %6 : vector<1x128x128xbf16> to vector<128x128xbf16>
    %cst_10 = arith.constant dense<0.000000e+00> : vector<160x128xf32>
    %8 = tpu.matmul %5, %7, %cst_10 {dimension_numbers = #tpu.dot_dimension_numbers<[1], [0], [0], [1], [0, 0, 1, 1], [], []>} : vector<160x128xbf16>, vector<128x128xbf16>, vector<160x128xf32> -> vector<160x128xf32>
    %c0_11 = arith.constant 0 : index
    %c0_12 = arith.constant 0 : index
    %c0_13 = arith.constant 0 : index
    %9 = vector.load %arg3[%c0_11, %c0_12, %c0_13] : memref<6x1x128xf32, #tpu.memory_space<vmem>>, vector<1x1x128xf32>
    %10 = vector.shape_cast %9 : vector<1x1x128xf32> to vector<1x128xf32>
    %11 = vector.broadcast %10 : vector<1x128xf32> to vector<160x128xf32>
    %12 = arith.addf %8, %11 : vector<160x128xf32>
    %cst_14 = arith.constant 0.000000e+00 : f32
    %13 = vector.broadcast %cst_14 : f32 to vector<160x128xf32>
    %14 = arith.maximumf %12, %13 : vector<160x128xf32>
    %15 = arith.truncf %14 : vector<160x128xf32> to vector<160x128xbf16>
    %c1 = arith.constant 1 : index
    %c0_15 = arith.constant 0 : index
    %c0_16 = arith.constant 0 : index
    %16 = vector.load %arg2[%c1, %c0_15, %c0_16] : memref<6x128x128xbf16, #tpu.memory_space<vmem>>, vector<1x128x128xbf16>
    %17 = vector.shape_cast %16 : vector<1x128x128xbf16> to vector<128x128xbf16>
    %cst_17 = arith.constant dense<0.000000e+00> : vector<160x128xf32>
    %18 = tpu.matmul %15, %17, %cst_17 {dimension_numbers = #tpu.dot_dimension_numbers<[1], [0], [0], [1], [0, 0, 1, 1], [], []>} : vector<160x128xbf16>, vector<128x128xbf16>, vector<160x128xf32> -> vector<160x128xf32>
    %c1_18 = arith.constant 1 : index
    %c0_19 = arith.constant 0 : index
    %c0_20 = arith.constant 0 : index
    %19 = vector.load %arg3[%c1_18, %c0_19, %c0_20] : memref<6x1x128xf32, #tpu.memory_space<vmem>>, vector<1x1x128xf32>
    %20 = vector.shape_cast %19 : vector<1x1x128xf32> to vector<1x128xf32>
    %21 = vector.broadcast %20 : vector<1x128xf32> to vector<160x128xf32>
    %22 = arith.addf %18, %21 : vector<160x128xf32>
    %cst_21 = arith.constant 0.000000e+00 : f32
    %23 = vector.broadcast %cst_21 : f32 to vector<160x128xf32>
    %24 = arith.maximumf %22, %23 : vector<160x128xf32>
    %25 = arith.truncf %24 : vector<160x128xf32> to vector<160x128xbf16>
    %c2 = arith.constant 2 : index
    %c0_22 = arith.constant 0 : index
    %c0_23 = arith.constant 0 : index
    %26 = vector.load %arg2[%c2, %c0_22, %c0_23] : memref<6x128x128xbf16, #tpu.memory_space<vmem>>, vector<1x128x128xbf16>
    %27 = vector.shape_cast %26 : vector<1x128x128xbf16> to vector<128x128xbf16>
    %cst_24 = arith.constant dense<0.000000e+00> : vector<160x128xf32>
    %28 = tpu.matmul %25, %27, %cst_24 {dimension_numbers = #tpu.dot_dimension_numbers<[1], [0], [0], [1], [0, 0, 1, 1], [], []>} : vector<160x128xbf16>, vector<128x128xbf16>, vector<160x128xf32> -> vector<160x128xf32>
    %c2_25 = arith.constant 2 : index
    %c0_26 = arith.constant 0 : index
    %c0_27 = arith.constant 0 : index
    %29 = vector.load %arg3[%c2_25, %c0_26, %c0_27] : memref<6x1x128xf32, #tpu.memory_space<vmem>>, vector<1x1x128xf32>
    %30 = vector.shape_cast %29 : vector<1x1x128xf32> to vector<1x128xf32>
    %31 = vector.broadcast %30 : vector<1x128xf32> to vector<160x128xf32>
    %32 = arith.addf %28, %31 : vector<160x128xf32>
    %cst_28 = arith.constant 0.000000e+00 : f32
    %33 = vector.broadcast %cst_28 : f32 to vector<160x128xf32>
    %34 = arith.maximumf %32, %33 : vector<160x128xf32>
    %35 = arith.truncf %34 : vector<160x128xf32> to vector<160x128xbf16>
    %c3 = arith.constant 3 : index
    %c0_29 = arith.constant 0 : index
    %c0_30 = arith.constant 0 : index
    %36 = vector.load %arg2[%c3, %c0_29, %c0_30] : memref<6x128x128xbf16, #tpu.memory_space<vmem>>, vector<1x128x128xbf16>
    %37 = vector.shape_cast %36 : vector<1x128x128xbf16> to vector<128x128xbf16>
    %cst_31 = arith.constant dense<0.000000e+00> : vector<160x128xf32>
    %38 = tpu.matmul %35, %37, %cst_31 {dimension_numbers = #tpu.dot_dimension_numbers<[1], [0], [0], [1], [0, 0, 1, 1], [], []>} : vector<160x128xbf16>, vector<128x128xbf16>, vector<160x128xf32> -> vector<160x128xf32>
    %c3_32 = arith.constant 3 : index
    %c0_33 = arith.constant 0 : index
    %c0_34 = arith.constant 0 : index
    %39 = vector.load %arg3[%c3_32, %c0_33, %c0_34] : memref<6x1x128xf32, #tpu.memory_space<vmem>>, vector<1x1x128xf32>
    %40 = vector.shape_cast %39 : vector<1x1x128xf32> to vector<1x128xf32>
    %41 = vector.broadcast %40 : vector<1x128xf32> to vector<160x128xf32>
    %42 = arith.addf %38, %41 : vector<160x128xf32>
    %cst_35 = arith.constant 0.000000e+00 : f32
    %43 = vector.broadcast %cst_35 : f32 to vector<160x128xf32>
    %44 = arith.maximumf %42, %43 : vector<160x128xf32>
    %45 = arith.truncf %44 : vector<160x128xf32> to vector<160x128xbf16>
    %c4 = arith.constant 4 : index
    %c0_36 = arith.constant 0 : index
    %c0_37 = arith.constant 0 : index
    %46 = vector.load %arg2[%c4, %c0_36, %c0_37] : memref<6x128x128xbf16, #tpu.memory_space<vmem>>, vector<1x128x128xbf16>
    %47 = vector.shape_cast %46 : vector<1x128x128xbf16> to vector<128x128xbf16>
    %cst_38 = arith.constant dense<0.000000e+00> : vector<160x128xf32>
    %48 = tpu.matmul %45, %47, %cst_38 {dimension_numbers = #tpu.dot_dimension_numbers<[1], [0], [0], [1], [0, 0, 1, 1], [], []>} : vector<160x128xbf16>, vector<128x128xbf16>, vector<160x128xf32> -> vector<160x128xf32>
    %c4_39 = arith.constant 4 : index
    %c0_40 = arith.constant 0 : index
    %c0_41 = arith.constant 0 : index
    %49 = vector.load %arg3[%c4_39, %c0_40, %c0_41] : memref<6x1x128xf32, #tpu.memory_space<vmem>>, vector<1x1x128xf32>
    %50 = vector.shape_cast %49 : vector<1x1x128xf32> to vector<1x128xf32>
    %51 = vector.broadcast %50 : vector<1x128xf32> to vector<160x128xf32>
    %52 = arith.addf %48, %51 : vector<160x128xf32>
    %cst_42 = arith.constant 0.000000e+00 : f32
    %53 = vector.broadcast %cst_42 : f32 to vector<160x128xf32>
    %54 = arith.maximumf %52, %53 : vector<160x128xf32>
    %55 = arith.truncf %54 : vector<160x128xf32> to vector<160x128xbf16>
    %c5 = arith.constant 5 : index
    %c0_43 = arith.constant 0 : index
    %c0_44 = arith.constant 0 : index
    %56 = vector.load %arg2[%c5, %c0_43, %c0_44] : memref<6x128x128xbf16, #tpu.memory_space<vmem>>, vector<1x128x128xbf16>
    %57 = vector.shape_cast %56 : vector<1x128x128xbf16> to vector<128x128xbf16>
    %cst_45 = arith.constant dense<0.000000e+00> : vector<160x128xf32>
    %58 = tpu.matmul %55, %57, %cst_45 {dimension_numbers = #tpu.dot_dimension_numbers<[1], [0], [0], [1], [0, 0, 1, 1], [], []>} : vector<160x128xbf16>, vector<128x128xbf16>, vector<160x128xf32> -> vector<160x128xf32>
    %c5_46 = arith.constant 5 : index
    %c0_47 = arith.constant 0 : index
    %c0_48 = arith.constant 0 : index
    %59 = vector.load %arg3[%c5_46, %c0_47, %c0_48] : memref<6x1x128xf32, #tpu.memory_space<vmem>>, vector<1x1x128xf32>
    %60 = vector.shape_cast %59 : vector<1x1x128xf32> to vector<1x128xf32>
    %61 = vector.broadcast %60 : vector<1x128xf32> to vector<160x128xf32>
    %62 = arith.addf %58, %61 : vector<160x128xf32>
    %63 = arith.truncf %62 : vector<160x128xf32> to vector<160x128xbf16>
    %c0_49 = arith.constant 0 : index
    %c0_50 = arith.constant 0 : index
    %64 = vector.load %arg4[%c0_49, %c0_50] : memref<160x128xbf16, #tpu.memory_space<vmem>>, vector<160x128xbf16>
    tpu.vector_store %arg4[%c0_49, %c0_50], %63 {strides = array<i32>} : memref<160x128xbf16, #tpu.memory_space<vmem>>, vector<160x128xbf16>,
    return
  }
  func.func @transform_0(%arg0: i32) -> (i32, i32) {
    %c0_i32 = arith.constant 0 : i32
    %c0_i32_0 = arith.constant 0 : i32
    return %arg0, %c0_i32 : i32, i32
  }
  func.func @transform_1(%arg0: i32) -> (i32, i32, i32) {
    %c0_i32 = arith.constant 0 : i32
    %c0_i32_0 = arith.constant 0 : i32
    %c0_i32_1 = arith.constant 0 : i32
    %c0_i32_2 = arith.constant 0 : i32
    return %c0_i32, %c0_i32_0, %c0_i32_1 : i32, i32, i32
  }
  func.func @transform_2(%arg0: i32) -> (i32, i32, i32) {
    %c0_i32 = arith.constant 0 : i32
    %c0_i32_0 = arith.constant 0 : i32
    %c0_i32_1 = arith.constant 0 : i32
    %c0_i32_2 = arith.constant 0 : i32
    return %c0_i32, %c0_i32_0, %c0_i32_1 : i32, i32, i32
  }
  func.func @transform_3(%arg0: i32) -> (i32, i32) {
    %c0_i32 = arith.constant 0 : i32
    %c0_i32_0 = arith.constant 0 : i32
    return %arg0, %c0_i32 : i32, i32
  }
}

module attributes {stable_mosaic.version = 11 : i64} {
  func.func @mlp_kernel(%arg0: i32, %arg1: memref<160x100xf32, #tpu.memory_space<vmem>>, %arg2: memref<6x128x128xbf16, #tpu.memory_space<vmem>>, %arg3: memref<6x1x128xf32, #tpu.memory_space<vmem>>, %arg4: memref<160x128xbf16, #tpu.memory_space<vmem>>, %arg5: memref<160x128xbf16, #tpu.memory_space<vmem>>) attributes {dimension_semantics = [#tpu.dimension_semantics<parallel>], iteration_bounds = array<i64: 2>, scalar_prefetch = 0 : i64, scratch_operands = 1 : i64, tpu.core_type = #tpu.core_type<tc>, window_params = [{transform_indices = @transform_0, window_bounds = array<i64: 160, 100>}, {pipeline_mode = #tpu.pipeline_mode<synchronous>, transform_indices = @transform_1, window_bounds = array<i64: 6, 128, 128>}, {pipeline_mode = #tpu.pipeline_mode<synchronous>, transform_indices = @transform_2, window_bounds = array<i64: 6, 1, 128>}, {transform_indices = @transform_3, window_bounds = array<i64: 160, 128>}]} {
    %cst = arith.constant 0.000000e+00 : bf16
    %0 = vector.broadcast %cst : bf16 to vector<160x128xbf16>
    %c0 = arith.constant 0 : index
    %c0_0 = arith.constant 0 : index
    %1 = vector.load %arg5[%c0, %c0_0] : memref<160x128xbf16, #tpu.memory_space<vmem>>, vector<160x128xbf16>
    tpu.vector_store %arg5[%c0, %c0_0], %0 {strides = array<i32>} : memref<160x128xbf16, #tpu.memory_space<vmem>>, vector<160x128xbf16>,
    %c0_1 = arith.constant 0 : index
    %c0_2 = arith.constant 0 : index
    %2 = vector.load %arg1[%c0_1, %c0_2] : memref<160x100xf32, #tpu.memory_space<vmem>>, vector<160x100xf32>
    %3 = arith.truncf %2 : vector<160x100xf32> to vector<160x100xbf16>
    %c0_3 = arith.constant 0 : index
    %c0_4 = arith.constant 0 : index
    %4 = vector.load %arg5[%c0_3, %c0_4] : memref<160x128xbf16, #tpu.memory_space<vmem>>, vector<160x100xbf16>
    tpu.vector_store %arg5[%c0_3, %c0_4], %3 {strides = array<i32>} : memref<160x128xbf16, #tpu.memory_space<vmem>>, vector<160x100xbf16>,
    %c0_5 = arith.constant 0 : index
    %c0_6 = arith.constant 0 : index
    %5 = vector.load %arg5[%c0_5, %c0_6] : memref<160x128xbf16, #tpu.memory_space<vmem>>, vector<160x128xbf16>
    %c0_7 = arith.constant 0 : index
    %c0_8 = arith.constant 0 : index
    %c0_9 = arith.constant 0 : index
    %6 = vector.load %arg2[%c0_7, %c0_8, %c0_9] : memref<6x128x128xbf16, #tpu.memory_space<vmem>>, vector<1x128x128xbf16>
    %7 = vector.shape_cast %6 : vector<1x128x128xbf16> to vector<128x128xbf16>
    %cst_10 = arith.constant dense<0.000000e+00> : vector<160x128xf32>
    %8 = tpu.matmul %5, %7, %cst_10 {dimension_numbers = #tpu.dot_dimension_numbers<[1], [0], [0], [1], [0, 0, 1, 1], [], []>} : vector<160x128xbf16>, vector<128x128xbf16>, vector<160x128xf32> -> vector<160x128xf32>
    %c0_11 = arith.constant 0 : index
    %c0_12 = arith.constant 0 : index
    %c0_13 = arith.constant 0 : index
    %9 = vector.load %arg3[%c0_11, %c0_12, %c0_13] : memref<6x1x128xf32, #tpu.memory_space<vmem>>, vector<1x1x128xf32>
    %10 = vector.shape_cast %9 : vector<1x1x128xf32> to vector<1x128xf32>
    %11 = vector.broadcast %10 : vector<1x128xf32> to vector<160x128xf32>
    %12 = arith.addf %8, %11 : vector<160x128xf32>
    %cst_14 = arith.constant 0.000000e+00 : f32
    %13 = vector.broadcast %cst_14 : f32 to vector<160x128xf32>
    %14 = arith.maximumf %12, %13 : vector<160x128xf32>
    %15 = arith.truncf %14 : vector<160x128xf32> to vector<160x128xbf16>
    %c1 = arith.constant 1 : index
    %c0_15 = arith.constant 0 : index
    %c0_16 = arith.constant 0 : index
    %16 = vector.load %arg2[%c1, %c0_15, %c0_16] : memref<6x128x128xbf16, #tpu.memory_space<vmem>>, vector<1x128x128xbf16>
    %17 = vector.shape_cast %16 : vector<1x128x128xbf16> to vector<128x128xbf16>
    %cst_17 = arith.constant dense<0.000000e+00> : vector<160x128xf32>
    %18 = tpu.matmul %15, %17, %cst_17 {dimension_numbers = #tpu.dot_dimension_numbers<[1], [0], [0], [1], [0, 0, 1, 1], [], []>} : vector<160x128xbf16>, vector<128x128xbf16>, vector<160x128xf32> -> vector<160x128xf32>
    %c1_18 = arith.constant 1 : index
    %c0_19 = arith.constant 0 : index
    %c0_20 = arith.constant 0 : index
    %19 = vector.load %arg3[%c1_18, %c0_19, %c0_20] : memref<6x1x128xf32, #tpu.memory_space<vmem>>, vector<1x1x128xf32>
    %20 = vector.shape_cast %19 : vector<1x1x128xf32> to vector<1x128xf32>
    %21 = vector.broadcast %20 : vector<1x128xf32> to vector<160x128xf32>
    %22 = arith.addf %18, %21 : vector<160x128xf32>
    %cst_21 = arith.constant 0.000000e+00 : f32
    %23 = vector.broadcast %cst_21 : f32 to vector<160x128xf32>
    %24 = arith.maximumf %22, %23 : vector<160x128xf32>
    %25 = arith.truncf %24 : vector<160x128xf32> to vector<160x128xbf16>
    %c2 = arith.constant 2 : index
    %c0_22 = arith.constant 0 : index
    %c0_23 = arith.constant 0 : index
    %26 = vector.load %arg2[%c2, %c0_22, %c0_23] : memref<6x128x128xbf16, #tpu.memory_space<vmem>>, vector<1x128x128xbf16>
    %27 = vector.shape_cast %26 : vector<1x128x128xbf16> to vector<128x128xbf16>
    %cst_24 = arith.constant dense<0.000000e+00> : vector<160x128xf32>
    %28 = tpu.matmul %25, %27, %cst_24 {dimension_numbers = #tpu.dot_dimension_numbers<[1], [0], [0], [1], [0, 0, 1, 1], [], []>} : vector<160x128xbf16>, vector<128x128xbf16>, vector<160x128xf32> -> vector<160x128xf32>
    %c2_25 = arith.constant 2 : index
    %c0_26 = arith.constant 0 : index
    %c0_27 = arith.constant 0 : index
    %29 = vector.load %arg3[%c2_25, %c0_26, %c0_27] : memref<6x1x128xf32, #tpu.memory_space<vmem>>, vector<1x1x128xf32>
    %30 = vector.shape_cast %29 : vector<1x1x128xf32> to vector<1x128xf32>
    %31 = vector.broadcast %30 : vector<1x128xf32> to vector<160x128xf32>
    %32 = arith.addf %28, %31 : vector<160x128xf32>
    %cst_28 = arith.constant 0.000000e+00 : f32
    %33 = vector.broadcast %cst_28 : f32 to vector<160x128xf32>
    %34 = arith.maximumf %32, %33 : vector<160x128xf32>
    %35 = arith.truncf %34 : vector<160x128xf32> to vector<160x128xbf16>
    %c3 = arith.constant 3 : index
    %c0_29 = arith.constant 0 : index
    %c0_30 = arith.constant 0 : index
    %36 = vector.load %arg2[%c3, %c0_29, %c0_30] : memref<6x128x128xbf16, #tpu.memory_space<vmem>>, vector<1x128x128xbf16>
    %37 = vector.shape_cast %36 : vector<1x128x128xbf16> to vector<128x128xbf16>
    %cst_31 = arith.constant dense<0.000000e+00> : vector<160x128xf32>
    %38 = tpu.matmul %35, %37, %cst_31 {dimension_numbers = #tpu.dot_dimension_numbers<[1], [0], [0], [1], [0, 0, 1, 1], [], []>} : vector<160x128xbf16>, vector<128x128xbf16>, vector<160x128xf32> -> vector<160x128xf32>
    %c3_32 = arith.constant 3 : index
    %c0_33 = arith.constant 0 : index
    %c0_34 = arith.constant 0 : index
    %39 = vector.load %arg3[%c3_32, %c0_33, %c0_34] : memref<6x1x128xf32, #tpu.memory_space<vmem>>, vector<1x1x128xf32>
    %40 = vector.shape_cast %39 : vector<1x1x128xf32> to vector<1x128xf32>
    %41 = vector.broadcast %40 : vector<1x128xf32> to vector<160x128xf32>
    %42 = arith.addf %38, %41 : vector<160x128xf32>
    %cst_35 = arith.constant 0.000000e+00 : f32
    %43 = vector.broadcast %cst_35 : f32 to vector<160x128xf32>
    %44 = arith.maximumf %42, %43 : vector<160x128xf32>
    %45 = arith.truncf %44 : vector<160x128xf32> to vector<160x128xbf16>
    %c4 = arith.constant 4 : index
    %c0_36 = arith.constant 0 : index
    %c0_37 = arith.constant 0 : index
    %46 = vector.load %arg2[%c4, %c0_36, %c0_37] : memref<6x128x128xbf16, #tpu.memory_space<vmem>>, vector<1x128x128xbf16>
    %47 = vector.shape_cast %46 : vector<1x128x128xbf16> to vector<128x128xbf16>
    %cst_38 = arith.constant dense<0.000000e+00> : vector<160x128xf32>
    %48 = tpu.matmul %45, %47, %cst_38 {dimension_numbers = #tpu.dot_dimension_numbers<[1], [0], [0], [1], [0, 0, 1, 1], [], []>} : vector<160x128xbf16>, vector<128x128xbf16>, vector<160x128xf32> -> vector<160x128xf32>
    %c4_39 = arith.constant 4 : index
    %c0_40 = arith.constant 0 : index
    %c0_41 = arith.constant 0 : index
    %49 = vector.load %arg3[%c4_39, %c0_40, %c0_41] : memref<6x1x128xf32, #tpu.memory_space<vmem>>, vector<1x1x128xf32>
    %50 = vector.shape_cast %49 : vector<1x1x128xf32> to vector<1x128xf32>
    %51 = vector.broadcast %50 : vector<1x128xf32> to vector<160x128xf32>
    %52 = arith.addf %48, %51 : vector<160x128xf32>
    %cst_42 = arith.constant 0.000000e+00 : f32
    %53 = vector.broadcast %cst_42 : f32 to vector<160x128xf32>
    %54 = arith.maximumf %52, %53 : vector<160x128xf32>
    %55 = arith.truncf %54 : vector<160x128xf32> to vector<160x128xbf16>
    %c5 = arith.constant 5 : index
    %c0_43 = arith.constant 0 : index
    %c0_44 = arith.constant 0 : index
    %56 = vector.load %arg2[%c5, %c0_43, %c0_44] : memref<6x128x128xbf16, #tpu.memory_space<vmem>>, vector<1x128x128xbf16>
    %57 = vector.shape_cast %56 : vector<1x128x128xbf16> to vector<128x128xbf16>
    %cst_45 = arith.constant dense<0.000000e+00> : vector<160x128xf32>
    %58 = tpu.matmul %55, %57, %cst_45 {dimension_numbers = #tpu.dot_dimension_numbers<[1], [0], [0], [1], [0, 0, 1, 1], [], []>} : vector<160x128xbf16>, vector<128x128xbf16>, vector<160x128xf32> -> vector<160x128xf32>
    %c5_46 = arith.constant 5 : index
    %c0_47 = arith.constant 0 : index
    %c0_48 = arith.constant 0 : index
    %59 = vector.load %arg3[%c5_46, %c0_47, %c0_48] : memref<6x1x128xf32, #tpu.memory_space<vmem>>, vector<1x1x128xf32>
    %60 = vector.shape_cast %59 : vector<1x1x128xf32> to vector<1x128xf32>
    %61 = vector.broadcast %60 : vector<1x128xf32> to vector<160x128xf32>
    %62 = arith.addf %58, %61 : vector<160x128xf32>
    %63 = arith.truncf %62 : vector<160x128xf32> to vector<160x128xbf16>
    %c0_49 = arith.constant 0 : index
    %c0_50 = arith.constant 0 : index
    %64 = vector.load %arg4[%c0_49, %c0_50] : memref<160x128xbf16, #tpu.memory_space<vmem>>, vector<160x128xbf16>
    tpu.vector_store %arg4[%c0_49, %c0_50], %63 {strides = array<i32>} : memref<160x128xbf16, #tpu.memory_space<vmem>>, vector<160x128xbf16>,
    return
  }
  func.func @transform_0(%arg0: i32) -> (i32, i32) {
    %c0_i32 = arith.constant 0 : i32
    %c0_i32_0 = arith.constant 0 : i32
    return %arg0, %c0_i32 : i32, i32
  }
  func.func @transform_1(%arg0: i32) -> (i32, i32, i32) {
    %c0_i32 = arith.constant 0 : i32
    %c0_i32_0 = arith.constant 0 : i32
    %c0_i32_1 = arith.constant 0 : i32
    %c0_i32_2 = arith.constant 0 : i32
    return %c0_i32, %c0_i32_0, %c0_i32_1 : i32, i32, i32
  }
  func.func @transform_2(%arg0: i32) -> (i32, i32, i32) {
    %c0_i32 = arith.constant 0 : i32
    %c0_i32_0 = arith.constant 0 : i32
    %c0_i32_1 = arith.constant 0 : i32
    %c0_i32_2 = arith.constant 0 : i32
    return %c0_i32, %c0_i32_0, %c0_i32_1 : i32, i32, i32
  }
  func.func @transform_3(%arg0: i32) -> (i32, i32) {
    %c0_i32 = arith.constant 0 : i32
    %c0_i32_0 = arith.constant 0 : i32
    return %arg0, %c0_i32 : i32, i32
  }
}

</mosaic_0001>

<bundles_post_ra>
// kernel: tpu_custom_call.1
= control target key start
LH: loop header
LB: loop body
LE: loop exit
PB: predicated region body
PF: predicated region fallthrough
CT: control target
= control target key end

     0   :  { %8 = vsyncpa [#allocation4], 0  ;;  %s3170_s0 = inlined_call_operand.hbm [shape: f32[300,100], index: 0, kind: input, shape index: {}]   ;;  %s3171_s1 = inlined_call_operand.hbm [shape: bf16[6,128,128], index: 1, kind: input, shape index: {}]   ;;  %s3172_s2 = inlined_call_operand.hbm [shape: f32[6,1,128], index: 2, kind: input, shape index: {}]   ;;  %s3173_s3 = inlined_call_operand.hbm [shape: bf16[300,128], index: 3, kind: output, shape index: {}]  }
   0x1   :  { %10 = vsyncpa [#allocation4 + $0x1], 0 }
   0x2   :  { %11 = vsyncpa [#allocation7], 0 }
   0x3   :  { %12 = vsyncpa [#allocation5], 0 }
   0x4   :  { %14 = vsyncpa [#allocation5 + $0x1], 0  ;;  %s2792_s12 = smov 0   ;;  %s2794_s13 = smov 0  }
   0x5   :  { %s2796_s14 = smov 0   ;;  %s2798_s15 = smov 0  }
   0x6 LB: > { %s2813_s16 = sadd.s32 4294967295, %s2757_s15   ;;  %s1932_s17 = sadd.s32 4294967294, %s2757_s15   ;;  %s2757_s15 = sphi %s2798_s15, %s3190_s15   ;;  %s2753_s14 = sphi %s2796_s14, %s3189_s14   ;;  %s2749_s13 = sphi %s2794_s13, %s3188_s13   ;;  %s2745_s12 = sphi %s2792_s12, %s3187_s12  }
   0x7   : > { %s2817_s18 = sadd.s32 1, %s2757_s15   ;;  %s27_s19 = sadd.s32 1, %s2753_s14 }
   0x8   : > { %s24_s20 = ssub.s32 %s2757_s15, %s2817_s18  ;;  %p34_p0 = scmp.ne.s32.totalorder %s2753_s14, %s2749_s13 }
   0x9   : > { %p25_p1 = scmp.eq.s32.totalorder %s24_s20, 0  ;;  %p35_p2 = scmp.eq.s32.totalorder %s2757_s15, 0 }
   0xa   : > { %p40_p3 = scmp.ne.s32.totalorder %s2749_s13, %s2745_s12  ;;  %p3174_p4 = scmp.eq.s32.totalorder %s2813_s16, 0 }
   0xb   : > { %s2829_s21 = scalar_select %p25_p1, %s2753_s14, %s27_s19  }
   0xc   : > { %p2831_p5 = por %p35_p2, %p34_p0  ;;  %p2837_p6 = por %p3174_p4, %p40_p3 }
   0xd   : > { %p106_p7 = scmp.eq.s32.totalorder %s2813_s16, 1  ;;  %p112_p8 = scmp.eq.s32.totalorder %s1932_s17, 1 }
   0xe   : > { %s3177_s23 = scalar_select %p2837_p6, 1, 0 }
   0xf   : > { %p1933_p9 = scmp.ge.s32.totalorder %s2757_s15, 1  ;;  %p119_p10 = scmp.lt.s32.totalorder %s2757_s15, 3 }
  0x10   : > { %p2844_p11 = por %p106_p7, %p34_p0  ;;  %p2848_p12 = por %p112_p8, %p40_p3 }
  0x11   : > { %p2852_p13 = pnand %p1933_p9, %p119_p10  ;;  %s2759_s27 = smov [#allocation6]  }
  0x12   : > { %s3178_s24 = scalar_select %p2844_p11, 1, 0 }
  0x13   : > { %s3179_s25 = scalar_select %p2848_p12, 1, 0 }
  0x14   : > { %p2494_p1 = pneg %p2852_p13  ;;  %s131_s28 = sshll.u32 %s2759_s27, 4  ;;  %s132_s28 = int_to_ptr.vmem [resolvable:$true] %s131_s28 }
  0x15   : > { %s2760_s30 = smov [#allocation8]   ;;  %s2622_s5 = scalar_lea.vmem %s132_s28, 6144 }
  0x16   : > { %p2860_p2 = pnand %p2494_p1, %p3174_p4  ;;  %s144_s4 = sshll.u32 %s2760_s30, 4  ;;  %s145_s4 = int_to_ptr.vmem [resolvable:$true] %s144_s4 }
  0x17   : > { %p2623_p3 = scmp.ne.s32.totalorder %s132_s28, %s2622_s5  ;;  %p2630_p9 = scmp.lt.s32.totalorder %s132_s28, %s132_s28 }
  0x18   : > { %p2613_p0 = pneg %p2860_p2  ;;  %p2631_p10 = scmp.lt.s32.totalorder %s2622_s5, %s2622_s5 }
  0x1a   : > { %p2625_p7 = pnand %p2623_p3, %p2613_p0  ;;  %p2632_p12 = por %p2631_p10, %p2630_p9 }
  0x1c   : > { %p2626_p8 = pneg %p2625_p7 }
  0x1e   : > { %p2633_p1 = pnand %p2632_p12, %p2626_p8 }
  0x20   : > { %2636 = shalt.err (!%p2633_p1)
}
  0x21   : > { %s2761_s6 = smov 64   ;;  %s2762_s7 = smov 4  }
  0x22   : > { %2497 = dma.hbm_to_vmem [thread:$0]  (!%p2860_p2), %s3171_s1, 6144, %s132_s28, [#allocation7], %s2761_s6, %s2761_s6, %s2762_s7  }
  0x23   : > { %s2648_s10 = scalar_lea.vmem %s145_s4, 96  ;;  %p2656_p11 = scmp.lt.s32.totalorder %s145_s4, %s145_s4 }
  0x24   : > { %p2649_p4 = scmp.ne.s32.totalorder %s145_s4, %s2648_s10  ;;  %p2657_p6 = scmp.lt.s32.totalorder %s2648_s10, %s2648_s10 }
  0x26   : > { %p2651_p3 = pnand %p2649_p4, %p2613_p0  ;;  %p2658_p9 = por %p2657_p6, %p2656_p11 }
  0x28   : > { %p2652_p7 = pneg %p2651_p3 }
  0x2a   : > { %p2659_p12 = pnand %p2658_p9, %p2652_p7 }
  0x2c   : > { %2662 = shalt.err (!%p2659_p12)
}
  0x2d   : > { %s2763_s11 = smov 16   ;;  %s2764_s17 = smov 1  }
  0x2e   : > { %2500 = dma.hbm_to_vmem [thread:$0]  (!%p2860_p2), %s3172_s2, 96, %s145_s4, [#allocation7], %s2763_s11, %s2763_s11, %s2764_s17  }
  0x2f   : > { %p1936_p8 = scmp.ge.s32.totalorder %s2757_s15, 2 }
  0x31   : > { %154 = sbr.rel (%p1936_p8) target bundleno = 88 (0x58), region = 24 }
  0x36   : > { %157 = sbr.rel (!%p2831_p5) target bundleno = 88 (0x58), region = 28  ;;  %s158_s27 = sand.u32 (%p2831_p5), 1, %s2753_s14  }
  0x37   : > { %s163_s28 = smul.u32 (%p2831_p5), 20, %s2757_s15  ;;  %s2892_s6 = scalar_lea.sflag (%p2831_p5), [#allocation4], %s158_s27 }
  0x38   : > { %s2481_s30 = smul.u32 (%p2831_p5), 160, %s158_s27 }
  0x39   : > { %s164_s5 = ssub.s32 (%p2831_p5), 38, %s163_s28 }
  0x3a   : > { %p165_p4 = scmp.lt.s32.totalorder (%p2831_p5), %s164_s5, 20  ;;  %s162_s7 = scalar_lea.vmem (%p2831_p5), [#allocation3], %s2481_s30 }
  0x3c   : > { %s3192_s5 = smov (!%p165_p4, %s164_s5), 20 }
  0x3d   : > { %s2889_s29 = sshll.u32 %s3192_s5, 7 }
  0x3e   : > { %s169_s4 = ssub.s32 2560, %s2889_s29 }
  0x3f   : > { %170 = vsyncadd %s2892_s6, %s169_s4  ;;  %p1938_p5 = scmp.ne.s32.totalorder %s2889_s29, 0  ;;  %s2056_s22 = smul.u32 2560, %s2757_s15 }
  0x40   : > { %s175_s8 = sshll.u32 %s162_s7, 4  ;;  %s2667_s27 = scalar_lea.hbm %s3170_s0, 4864  ;;  %s2902_s8 = int_to_ptr.vmem [resolvable:$true] %s175_s8 }
  0x41   : > { %s2900_s11 = scalar_lea.hbm %s3170_s0, %s2056_s22 }
  0x42   : > { %s2663_s17 = scalar_lea.hbm %s2900_s11, %s2889_s29  ;;  %p2668_p0 = scmp.lt.s32.totalorder %s2900_s11, %s3170_s0 }
  0x43   : > { %p2664_p6 = scmp.ne.s32.totalorder %s2900_s11, %s2663_s17  ;;  %p2669_p10 = scmp.lt.s32.totalorder %s2667_s27, %s2663_s17 }
  0x45   : > { %p2665_p11 = pnand %p2664_p6, %p1938_p5  ;;  %p2670_p1 = por %p2669_p10, %p2668_p0 }
  0x47   : > { %p2666_p2 = pneg %p2665_p11 }
  0x49   : > { %p2671_p3 = pnand %p2670_p1, %p2666_p2 }
  0x4b   : > { %2674 = shalt.err (!%p2671_p3)
}
  0x4c   : > { %s2675_s5 = scalar_lea.vmem %s2902_s8, %s2889_s29  ;;  %s2765_s4 = smov [#allocation3]  }
  0x4d   : > { %p2676_p7 = scmp.ne.s32.totalorder %s2902_s8, %s2675_s5  ;;  %s2679_s7 = sshll.u32 %s2765_s4, 4  ;;  %s2680_s7 = int_to_ptr.vmem [resolvable:$false] %s2679_s7 }
  0x4e   : > { %s2681_s22 = scalar_lea.vmem %s2680_s7, 5120  ;;  %p2682_p4 = scmp.lt.s32.totalorder %s2902_s8, %s2680_s7 }
  0x4f   : > { %p2677_p9 = pnand %p2676_p7, %p1938_p5  ;;  %p2683_p6 = scmp.lt.s32.totalorder %s2681_s22, %s2675_s5 }
  0x51   : > { %p2678_p12 = pneg %p2677_p9  ;;  %p2684_p11 = por %p2683_p6, %p2682_p4 }
  0x53   : > { %p2685_p0 = pnand %p2684_p11, %p2678_p12 }
  0x55   : > { %2688 = shalt.err (!%p2685_p0)
}
  0x56   : > { %s2766_s9 = smov 128   ;;  %s2767_s10 = smov 8  }
  0x57   : > { %181 = dma.hbm_to_vmem [thread:$0]  (%p1938_p5), %s2900_s11, %s2889_s29, %s2902_s8, %s2892_s6, %s2766_s9, %s2766_s9, %s2767_s10  }
  0x58 PF: > { %187 = sbr.rel (%p2852_p13) target bundleno = 1423 (0x58f), region = 32  ;;  %s2931_s17 = sand.u32 (!%p2852_p13), 1, %s2749_s13  }
  0x59   : > { %s2482_s19 = smul.u32 (!%p2852_p13), 160, %s2931_s17  ;;  %s190_s20 = scalar_lea.sflag (!%p2852_p13), [#allocation4], %s2931_s17 }
  0x5a   : > { %p3182_p2 = scmp.ne.s32.totalorder (!%p2852_p13), %s3177_s23, 0 }
  0x5b   : > { %s2935_s27 = scalar_lea.vmem (!%p2852_p13), [#allocation3], %s2482_s19 }
  0x5d   : > { %2732 = dma.done.wait (%p3182_p2), %s190_s20, 2560  }
  0x5e   : > { %2734 = vsyncadd (%p3182_p2), %s190_s20, 4294964736  ;;  %p3183_p5 = scmp.eq.s32.totalorder %s2813_s16, 0 }
  0x60   : > { %2736 = dma.done.wait (%p3183_p5), [#allocation7], 6240   ;;  %p3184_p13 = pmov %p3183_p5 }
  0x61   : > { %v2768_v0 = vmov 0   ;;  %v2553_v1 = vld [vmem:[#allocation6 + $0x38] sm:$0xff]   ;;  %v2554_v2 = vld [vmem:[#allocation6 + $0x30] sm:$0xff]   ;;  %v2555_v3 = vld [vmem:[#allocation6 + $0x28] sm:$0xff]   ;;  %vm355_vm0 = vcmask 814080   ;;  %s2483_s23 = smul.u32 80, %s2931_s17 }
  0x62   : > { %2738 = vsyncadd (%p3184_p13), [#allocation7], 4294961056  ;;  %235 = vst [vmem:[#allocation2] sm:$0xf] %v2768_v0  ;;  %2265 = vmatprep.subr.bf16.mxu0 %v2553_v1  ;;  %v2556_v4 = vld [vmem:[#allocation6 + $0x20] sm:$0xff]   ;;  %v256_v6 = vld [vmem:[%s2935_s27 + $0x8] sm:$0xff] }
  0x63   : > { %236 = vst [vmem:[#allocation2 + $0x4] sm:$0xf] %v2768_v0  ;;  %237 = vst [vmem:[#allocation2 + $0x8] sm:$0xf] %v2768_v0  ;;  %2266 = vmatpush3.bf16.msra.mxu0 %v2553_v1  ;;  %v255_v5 = vld [vmem:[%s2935_s27] sm:$0xff]  ;;  %v257_v7 = vld [vmem:[%s2935_s27 + $0x10] sm:$0xff]  ;;  %v2058_v9 = vpack.c.bf16 %v256_v6, %v256_v6 }
  0x64   : > { %238 = vst [vmem:[#allocation2 + $0xc] sm:$0xf] %v2768_v0  ;;  %239 = vst [vmem:[#allocation2 + $0x10] sm:$0xf] %v2768_v0  ;;  %2267 = vmatprep.subr.bf16.mxu0 %v2554_v2  ;;  %v2057_v8 = vpack.c.bf16 %v255_v5, %v255_v5  ;;  %v258_v10 = vld [vmem:[%s2935_s27 + $0x18] sm:$0xff]  ;;  %v2059_v11 = vpack.c.bf16 %v257_v7, %v257_v7  ;;  %v259_v12 = vld [vmem:[%s2935_s27 + $0x20] sm:$0xff] }
  0x65   : > { %240 = vst [vmem:[#allocation2 + $0x14] sm:$0xf] %v2768_v0  ;;  %241 = vst [vmem:[#allocation2 + $0x18] sm:$0xf] %v2768_v0  ;;  %v260_v13 = vld [vmem:[%s2935_s27 + $0x28] sm:$0xff]  ;;  %v2557_v14 = vld [vmem:[#allocation6 + $0x18] sm:$0xff]   ;;  %v2060_v15 = vpack.c.bf16 %v258_v10, %v258_v10  ;;  %v2061_v16 = vpack.c.bf16 %v259_v12, %v259_v12 }
  0x66   : > { %242 = vst [vmem:[#allocation2 + $0x1c] sm:$0xf] %v2768_v0  ;;  %243 = vst [vmem:[#allocation2 + $0x20] sm:$0xf] %v2768_v0  ;;  %v2062_v17 = vpack.c.bf16 %v260_v13, %v260_v13  ;;  %v261_v18 = vld [vmem:[%s2935_s27 + $0x30] sm:$0xff]  ;;  %v262_v19 = vld [vmem:[%s2935_s27 + $0x38] sm:$0xff] }
  0x67   : > { %244 = vst [vmem:[#allocation2 + $0x24] sm:$0xf] %v2768_v0  ;;  %245 = vst [vmem:[#allocation2 + $0x28] sm:$0xf] %v2768_v0  ;;  %2268 = vmatpush3.bf16.msra.mxu0 %v2554_v2  ;;  %v263_v20 = vld [vmem:[%s2935_s27 + $0x40] sm:$0xff]  ;;  %v2063_v21 = vpack.c.bf16 %v261_v18, %v261_v18  ;;  %v2064_v22 = vpack.c.bf16 %v262_v19, %v262_v19  ;;  %v264_v23 = vld [vmem:[%s2935_s27 + $0x48] sm:$0xff] }
  0x68   : > { %246 = vst [vmem:[#allocation2 + $0x2c] sm:$0xf] %v2768_v0  ;;  %247 = vst [vmem:[#allocation2 + $0x30] sm:$0xf] %v2768_v0  ;;  %2269 = vmatprep.subr.bf16.mxu0 %v2555_v3  ;;  %v2065_v24 = vpack.c.bf16 %v263_v20, %v263_v20  ;;  %v265_v25 = vld [vmem:[%s2935_s27 + $0x50] sm:$0xff]  ;;  %v266_v26 = vld [vmem:[%s2935_s27 + $0x58] sm:$0xff]  ;;  %v2066_v27 = vpack.c.bf16 %v264_v23, %v264_v23 }
  0x69   : > { %248 = vst [vmem:[#allocation2 + $0x34] sm:$0xf] %v2768_v0  ;;  %249 = vst [vmem:[#allocation2 + $0x38] sm:$0xf] %v2768_v0  ;;  %v2067_v28 = vpack.c.bf16 %v265_v25, %v265_v25  ;;  %v2068_v29 = vpack.c.bf16 %v266_v26, %v266_v26  ;;  %v267_v30 = vld [vmem:[%s2935_s27 + $0x60] sm:$0xff]  ;;  %v268_v31 = vld [vmem:[%s2935_s27 + $0x68] sm:$0xff] }
  0x6a   : > { %250 = vst [vmem:[#allocation2 + $0x3c] sm:$0xf] %v2768_v0  ;;  %251 = vst [vmem:[#allocation2 + $0x40] sm:$0xf] %v2768_v0  ;;  %v269_v32 = vld [vmem:[%s2935_s27 + $0x70] sm:$0xff]  ;;  %v2069_v33 = vpack.c.bf16 %v267_v30, %v267_v30  ;;  %v2070_v34 = vpack.c.bf16 %v268_v31, %v268_v31  ;;  %v270_v35 = vld [vmem:[%s2935_s27 + $0x78] sm:$0xff] }
  0x6b   : > { %252 = vst [vmem:[#allocation2 + $0x44] sm:$0xf] %v2768_v0  ;;  %253 = vst [vmem:[#allocation2 + $0x48] sm:$0xf] %v2768_v0  ;;  %2270 = vmatpush3.bf16.msra.mxu0 %v2555_v3  ;;  %v2071_v36 = vpack.c.bf16 %v269_v32, %v269_v32  ;;  %v271_v37 = vld [vmem:[%s2935_s27 + $0x80] sm:$0xff]  ;;  %v272_v38 = vld [vmem:[%s2935_s27 + $0x88] sm:$0xff]  ;;  %v2072_v40 = vpack.c.bf16 %v270_v35, %v270_v35 }
  0x6c   : > { %254 = vst [vmem:[#allocation2 + $0x4c] sm:$0xf] %v2768_v0  ;;  %356 = vst.msk [vmem:[#allocation2] sm:$0xf] %vm355_vm0, %v2057_v8  ;;  %2271 = vmatprep.subr.bf16.mxu0 %v2556_v4  ;;  %v2558_v39 = vld [vmem:[#allocation6 + $0x10] sm:$0xff]   ;;  %v2073_v41 = vpack.c.bf16 %v271_v37, %v271_v37  ;;  %v2074_v42 = vpack.c.bf16 %v272_v38, %v272_v38  ;;  %v274_v44 = vld [vmem:[%s2935_s27 + $0x98] sm:$0xff] }
  0x6d   : > { %357 = vst.msk [vmem:[#allocation2 + $0x4] sm:$0xf] %vm355_vm0, %v2058_v9  ;;  %358 = vst.msk [vmem:[#allocation2 + $0x8] sm:$0xf] %vm355_vm0, %v2059_v11  ;;  %v273_v43 = vld [vmem:[%s2935_s27 + $0x90] sm:$0xff]  ;;  %v2076_v46 = vpack.c.bf16 %v274_v44, %v274_v44  ;;  %v2571_v47 = vld [vmem:[#allocation6 + $0x78] sm:$0xff]  }
  0x6e   : > { %359 = vst.msk [vmem:[#allocation2 + $0xc] sm:$0xf] %vm355_vm0, %v2060_v15  ;;  %360 = vst.msk [vmem:[#allocation2 + $0x10] sm:$0xf] %vm355_vm0, %v2061_v16  ;;  %v2075_v45 = vpack.c.bf16 %v273_v43, %v273_v43  ;;  %v2572_v48 = vld [vmem:[#allocation6 + $0x70] sm:$0xff]   ;;  %2301 = vmatprep.subr.bf16.mxu1 %v2571_v47  ;;  %v2573_v50 = vld [vmem:[#allocation6 + $0x68] sm:$0xff]  }
  0x6f   : > { %361 = vst.msk [vmem:[#allocation2 + $0x14] sm:$0xf] %vm355_vm0, %v2062_v17  ;;  %362 = vst.msk [vmem:[#allocation2 + $0x18] sm:$0xf] %vm355_vm0, %v2063_v21  ;;  %2272 = vmatpush3.bf16.msra.mxu0 %v2556_v4  ;;  %2302 = vmatpush3.bf16.msra.mxu1 %v2571_v47  ;;  %v2559_v51 = vld [vmem:[#allocation6 + $0x8] sm:$0xff]   ;;  %v2560_v52 = vld [vmem:[#allocation6] sm:$0xff]  }
  0x70   : > { %363 = vst.msk [vmem:[#allocation2 + $0x1c] sm:$0xf] %vm355_vm0, %v2064_v22  ;;  %364 = vst.msk [vmem:[#allocation2 + $0x20] sm:$0xf] %vm355_vm0, %v2065_v24  ;;  %2273 = vmatprep.subr.bf16.mxu0 %v2557_v14  ;;  %2303 = vmatprep.subr.bf16.mxu1 %v2572_v48  ;;  %v2574_v54 = vld [vmem:[#allocation6 + $0x60] sm:$0xff]   ;;  %v2575_v56 = vld [vmem:[#allocation6 + $0x58] sm:$0xff]  }
  0x71   : > { %365 = vst.msk [vmem:[#allocation2 + $0x24] sm:$0xf] %vm355_vm0, %v2066_v27  ;;  %366 = vst.msk [vmem:[#allocation2 + $0x28] sm:$0xf] %vm355_vm0, %v2067_v28  ;;  %v2576_v0 = vld [vmem:[#allocation6 + $0x50] sm:$0xff]   ;;  %v2577_v1 = vld [vmem:[#allocation6 + $0x48] sm:$0xff]  }
  0x72   : > { %367 = vst.msk [vmem:[#allocation2 + $0x2c] sm:$0xf] %vm355_vm0, %v2068_v29  ;;  %368 = vst.msk [vmem:[#allocation2 + $0x30] sm:$0xf] %vm355_vm0, %v2069_v33  ;;  %v2578_v2 = vld [vmem:[#allocation6 + $0x40] sm:$0xff]   ;;  %v2579_v3 = vld [vmem:[#allocation6 + $0xb8] sm:$0xff]  }
  0x73   : > { %369 = vst.msk [vmem:[#allocation2 + $0x34] sm:$0xf] %vm355_vm0, %v2070_v34  ;;  %370 = vst.msk [vmem:[#allocation2 + $0x38] sm:$0xf] %vm355_vm0, %v2071_v36  ;;  %2274 = vmatpush3.bf16.msra.mxu0 %v2557_v14  ;;  %2304 = vmatpush3.bf16.msra.mxu1 %v2572_v48  ;;  %v2580_v4 = vld [vmem:[#allocation6 + $0xb0] sm:$0xff]   ;;  %v2581_v5 = vld [vmem:[#allocation6 + $0xa8] sm:$0xff]  }
  0x74   : > { %371 = vst.msk [vmem:[#allocation2 + $0x3c] sm:$0xf] %vm355_vm0, %v2072_v40  ;;  %372 = vst.msk [vmem:[#allocation2 + $0x40] sm:$0xf] %vm355_vm0, %v2073_v41  ;;  %v2561_v49 = vld [vmem:[#allocation2] sm:$0xff]   ;;  %2275 = vmatprep.subr.bf16.mxu0 %v2558_v39  ;;  %2305 = vmatprep.subr.bf16.mxu1 %v2573_v50  ;;  %v2582_v6 = vld [vmem:[#allocation6 + $0xa0] sm:$0xff]  }
  0x75   : > { %373 = vst.msk [vmem:[#allocation2 + $0x44] sm:$0xf] %vm355_vm0, %v2074_v42  ;;  %374 = vst.msk [vmem:[#allocation2 + $0x48] sm:$0xf] %vm355_vm0, %v2075_v45  ;;  %2281 = vmatprep.mubr.bf16.mxu0 %v2561_v49  ;;  %v2562_v53 = vld [vmem:[#allocation2 + $0x8] sm:$0xff]   ;;  %v2584_v8 = vld [vmem:[#allocation6 + $0x90] sm:$0xff]  }
  0x76   : > { %375 = vst.msk [vmem:[#allocation2 + $0x4c] sm:$0xf] %vm355_vm0, %v2076_v46  ;;  %v2563_v55 = vld [vmem:[#allocation2 + $0x10] sm:$0xff]   ;;  %v2583_v7 = vld [vmem:[#allocation6 + $0x98] sm:$0xff]   ;;  %s3096_s26 = scalar_lea.vmem [#allocation9], %s2483_s23  ;;  %s1821_s29 = scalar_lea.sflag [#allocation5], %s2931_s17 }
  0x77   : > { %2276 = vmatpush3.bf16.msra.mxu0 %v2558_v39  ;;  %2306 = vmatpush3.bf16.msra.mxu1 %v2573_v50  ;;  %v2564_v57 = vld [vmem:[#allocation2 + $0x18] sm:$0xff]   ;;  %v2985_v11 = vld [vmem:[#allocation8] ss:$0 sm:$0xff]  ;;  %p3185_p10 = scmp.ne.s32.totalorder %s3178_s24, 0 }
  0x78   : > { %2277 = vmatprep.subr.bf16.mxu0 %v2559_v51  ;;  %2307 = vmatprep.subr.bf16.mxu1 %v2574_v54  ;;  %v2565_v58 = vld [vmem:[#allocation2 + $0x20] sm:$0xff]   ;;  %s1828_s6 = smul.u32 (%p3185_p10), 20, %s2813_s16 }
  0x79   : > { %v2566_v59 = vld [vmem:[#allocation2 + $0x28] sm:$0xff]  }
  0x7a   : > { %v2567_v60 = vld [vmem:[#allocation2 + $0x30] sm:$0xff]   ;;  %s1829_s8 = ssub.s32 (%p3185_p10), 38, %s1828_s6 }
  0x7b   : > { %2278 = vmatpush3.bf16.msra.mxu0 %v2559_v51  ;;  %2308 = vmatpush3.bf16.msra.mxu1 %v2574_v54  ;;  %v2568_v61 = vld [vmem:[#allocation2 + $0x38] sm:$0xff]   ;;  %p1830_p1 = scmp.lt.s32.totalorder (%p3185_p10), %s1829_s8, 20 }
  0x7c   : > { %2279 = vmatprep.subr.bf16.mxu0 %v2560_v52  ;;  %2309 = vmatprep.subr.bf16.mxu1 %v2575_v56  ;;  %v2569_v62 = vld [vmem:[#allocation2 + $0x40] sm:$0xff]  }
  0x7d   : > { %v2570_v63 = vld [vmem:[#allocation2 + $0x48] sm:$0xff]  }
  0x7f   : > { %2280 = vmatpush3.bf16.msra.mxu0 %v2560_v52  ;;  %2310 = vmatpush3.bf16.msra.mxu1 %v2575_v56 }
  0x80   : > { %2311 = vmatprep.subr.bf16.mxu1 %v2576_v0  ;;  %2337 = vmatprep.subr.bf16.mxu0 %v2579_v3 }
  0x82   : > { %2282 = vmatmul.mubr.bf16.vlgmr.msra.gmra.mxu0 %v2562_v53 }
  0x83   : > { %2285 = vmatprep.mubr.bf16.mxu0 %v2563_v55  ;;  %2312 = vmatpush3.bf16.msra.mxu1 %v2576_v0 }
  0x84   : > { %2313 = vmatprep.subr.bf16.mxu1 %v2577_v1  ;;  %2338 = vmatpush3.bf16.msra.mxu0 %v2579_v3 }
  0x85   : > { %2339 = vmatprep.subr.bf16.mxu0 %v2580_v4 }
  0x87   : > { %2314 = vmatpush3.bf16.msra.mxu1 %v2577_v1 }
  0x88   : > { %2315 = vmatprep.subr.bf16.mxu1 %v2578_v2  ;;  %2340 = vmatpush3.bf16.msra.mxu0 %v2580_v4 }
  0x89   : > { %2341 = vmatprep.subr.bf16.mxu0 %v2581_v5 }
  0x8a   : > { %2286 = vmatmul.mubr.bf16.gmra.mxu0 %v2564_v57 }
  0x8b   : > { %2289 = vmatprep.mubr.bf16.mxu0 %v2565_v58  ;;  %2316 = vmatpush3.bf16.msra.mxu1 %v2578_v2 }
  0x8c   : > { %2342 = vmatpush3.bf16.msra.mxu0 %v2581_v5 }
  0x8d   : > { %2343 = vmatprep.subr.bf16.mxu0 %v2582_v6 }
  0x90   : > { %2344 = vmatpush3.bf16.msra.mxu0 %v2582_v6 }
  0x91   : > { %2345 = vmatprep.subr.bf16.mxu0 %v2583_v7 }
  0x92   : > { %2290 = vmatmul.mubr.bf16.gmra.mxu0 %v2566_v59 }
  0x93   : > { %2293 = vmatprep.mubr.bf16.mxu0 %v2567_v60 }
  0x94   : > { %2346 = vmatpush3.bf16.msra.mxu0 %v2583_v7 }
  0x95   : > { %2347 = vmatprep.subr.bf16.mxu0 %v2584_v8 }
  0x98   : > { %2348 = vmatpush3.bf16.msra.mxu0 %v2584_v8 }
  0x9a   : > { %2294 = vmatmul.mubr.bf16.gmra.mxu0 %v2568_v61 }
  0x9b   : > { %2297 = vmatprep.mubr.bf16.mxu0 %v2569_v62 }
  0xa2   : > { %2298 = vmatmul.mubr.bf16.gmra.mxu0 %v2570_v63 }
 0x142   : > { %v2283_v9 = vpop.f32.mrf.mxu0 }
 0x143   : > { %v570_v15 = vadd.f32 %v2283_v9, %v2985_v11 }
 0x144   : > { %v561_v10 = vpop.f32.mrf.mxu0 }
 0x145   : > { %v562_v13 = vadd.f32 %v2985_v11, %v561_v10  ;;  %v642_v22 = vmax.f32 %v570_v15, 0.0 }
 0x146   : > { %v2284_v12 = vpop.f32.mrf.mxu0 }
 0x147   : > { %v573_v14 = vadd.f32 %v2284_v12, %v2985_v11  ;;  %v640_v20 = vmax.f32 %v562_v13, 0.0 }
 0x148   : > { %v564_v16 = vpop.f32.mrf.mxu0 }
 0x149   : > { %v565_v17 = vadd.f32 %v2985_v11, %v564_v16  ;;  %v643_v18 = vmax.f32 %v573_v14, 0.0 }
 0x14a   : > { %v2287_v19 = vpop.f32.mrf.mxu0 }
 0x14b   : > { %v641_v21 = vmax.f32 %v565_v17, 0.0  ;;  %v661_v25 = vpack.c.bf16 %v643_v18, %v642_v22  ;;  %v586_v29 = vadd.f32 %v2287_v19, %v2985_v11  ;;  %v2585_v17 = vld [vmem:[#allocation6 + $0x88] sm:$0xff]   ;;  %v2586_v18 = vld [vmem:[#allocation6 + $0x80] sm:$0xff]   ;;  %v2587_v19 = vld [vmem:[#allocation6 + $0xf8] sm:$0xff]  }
 0x14c   : > { %v577_v23 = vpop.f32.mrf.mxu0  ;;  %2349 = vmatprep.subr.bf16.mxu0 %v2585_v17  ;;  %2373 = vmatprep.subr.bf16.mxu1 %v2587_v19  ;;  %v2591_v22 = vld [vmem:[#allocation6 + $0xd8] sm:$0xff]  }
 0x14d   : > { %v660_v24 = vpack.c.bf16 %v641_v21, %v640_v20  ;;  %v578_v27 = vadd.f32 %v2985_v11, %v577_v23  ;;  %v646_v36 = vmax.f32 %v586_v29, 0.0  ;;  %2350 = vmatpush3.bf16.msra.mxu0 %v2585_v17  ;;  %v2588_v20 = vld [vmem:[#allocation6 + $0xf0] sm:$0xff]   ;;  %v2590_v21 = vld [vmem:[#allocation6 + $0xe0] sm:$0xff]  }
 0x14e   : > { %v2288_v26 = vpop.f32.mrf.mxu0  ;;  %2351 = vmatprep.subr.bf16.mxu0 %v2586_v18  ;;  %v2592_v23 = vld [vmem:[#allocation6 + $0xd0] sm:$0xff]  }
 0x14f   : > { %v589_v28 = vadd.f32 %v2288_v26, %v2985_v11  ;;  %2317 = vmatprep.mubr.bf16.mxu1 %v660_v24  ;;  %v644_v34 = vmax.f32 %v578_v27, 0.0  ;;  %v3007_v26 = vld [vmem:[#allocation8 + $0x1] ss:$0 sm:$0xff] }
 0x150   : > { %v580_v30 = vpop.f32.mrf.mxu0  ;;  %2318 = vmatmul.mubr.bf16.vlgmr.msra.gmra.mxu1 %v661_v25 }
 0x151   : > { %v581_v31 = vadd.f32 %v2985_v11, %v580_v30  ;;  %v647_v32 = vmax.f32 %v589_v28, 0.0  ;;  %2352 = vmatpush3.bf16.msra.mxu0 %v2586_v18  ;;  %2374 = vmatpush3.bf16.msra.mxu1 %v2587_v19 }
 0x152   : > { %v2291_v33 = vpop.f32.mrf.mxu0  ;;  %2375 = vmatprep.subr.bf16.mxu1 %v2588_v20 }
 0x153   : > { %v645_v35 = vmax.f32 %v581_v31, 0.0  ;;  %v663_v39 = vpack.c.bf16 %v647_v32, %v646_v36  ;;  %v602_v43 = vadd.f32 %v2291_v33, %v2985_v11 }
 0x154   : > { %v593_v37 = vpop.f32.mrf.mxu0 }
 0x155   : > { %v662_v38 = vpack.c.bf16 %v645_v35, %v644_v34  ;;  %v594_v41 = vadd.f32 %v2985_v11, %v593_v37  ;;  %v650_v50 = vmax.f32 %v602_v43, 0.0  ;;  %2376 = vmatpush3.bf16.msra.mxu1 %v2588_v20 }
 0x156   : > { %v2292_v40 = vpop.f32.mrf.mxu0 }
 0x157   : > { %v605_v42 = vadd.f32 %v2292_v40, %v2985_v11  ;;  %2321 = vmatprep.mubr.bf16.mxu1 %v662_v38  ;;  %v648_v48 = vmax.f32 %v594_v41, 0.0 }
 0x158   : > { %v596_v44 = vpop.f32.mrf.mxu0  ;;  %2322 = vmatmul.mubr.bf16.gmra.mxu1 %v663_v39 }
 0x159   : > { %v597_v45 = vadd.f32 %v2985_v11, %v596_v44  ;;  %v651_v46 = vmax.f32 %v605_v42, 0.0 }
 0x15a   : > { %v2295_v47 = vpop.f32.mrf.mxu0 }
 0x15b   : > { %v649_v49 = vmax.f32 %v597_v45, 0.0  ;;  %v665_v53 = vpack.c.bf16 %v651_v46, %v650_v50  ;;  %v618_v57 = vadd.f32 %v2295_v47, %v2985_v11 }
 0x15c   : > { %v609_v51 = vpop.f32.mrf.mxu0 }
 0x15d   : > { %v664_v52 = vpack.c.bf16 %v649_v49, %v648_v48  ;;  %v610_v55 = vadd.f32 %v2985_v11, %v609_v51  ;;  %v654_v0 = vmax.f32 %v618_v57, 0.0 }
 0x15e   : > { %v2296_v54 = vpop.f32.mrf.mxu0 }
 0x15f   : > { %v621_v56 = vadd.f32 %v2296_v54, %v2985_v11  ;;  %2325 = vmatprep.mubr.bf16.mxu1 %v664_v52  ;;  %v652_v62 = vmax.f32 %v610_v55, 0.0 }
 0x160   : > { %v612_v58 = vpop.f32.mrf.mxu0  ;;  %2326 = vmatmul.mubr.bf16.gmra.mxu1 %v665_v53 }
 0x161   : > { %v613_v59 = vadd.f32 %v2985_v11, %v612_v58  ;;  %v655_v60 = vmax.f32 %v621_v56, 0.0 }
 0x162   : > { %v2299_v61 = vpop.f32.mrf.mxu0 }
 0x163   : > { %v653_v63 = vmax.f32 %v613_v59, 0.0  ;;  %v667_v3 = vpack.c.bf16 %v655_v60, %v654_v0  ;;  %v634_v7 = vadd.f32 %v2299_v61, %v2985_v11 }
 0x164   : > { %v625_v1 = vpop.f32.mrf.mxu0 }
 0x165   : > { %v666_v2 = vpack.c.bf16 %v653_v63, %v652_v62  ;;  %v626_v5 = vadd.f32 %v2985_v11, %v625_v1  ;;  %v658_v14 = vmax.f32 %v634_v7, 0.0 }
 0x166   : > { %v2300_v4 = vpop.f32.mrf.mxu0 }
 0x167   : > { %v637_v6 = vadd.f32 %v2300_v4, %v2985_v11  ;;  %2329 = vmatprep.mubr.bf16.mxu1 %v666_v2  ;;  %v656_v12 = vmax.f32 %v626_v5, 0.0 }
 0x168   : > { %v628_v8 = vpop.f32.mrf.mxu0  ;;  %2330 = vmatmul.mubr.bf16.gmra.mxu1 %v667_v3 }
 0x169   : > { %v629_v9 = vadd.f32 %v2985_v11, %v628_v8  ;;  %v659_v10 = vmax.f32 %v637_v6, 0.0  ;;  %v2589_v11 = vld [vmem:[#allocation6 + $0xe8] sm:$0xff]  }
 0x16a   : > { %2377 = vmatprep.subr.bf16.mxu1 %v2589_v11 }
 0x16b   : > { %v657_v13 = vmax.f32 %v629_v9, 0.0  ;;  %v669_v16 = vpack.c.bf16 %v659_v10, %v658_v14  ;;  %2378 = vmatpush3.bf16.msra.mxu1 %v2589_v11 }
 0x16c   : > { %2379 = vmatprep.subr.bf16.mxu1 %v2590_v21 }
 0x16d   : > { %v668_v15 = vpack.c.bf16 %v657_v13, %v656_v12 }
 0x16f   : > { %2333 = vmatprep.mubr.bf16.mxu1 %v668_v15  ;;  %2380 = vmatpush3.bf16.msra.mxu1 %v2590_v21 }
 0x170   : > { %2334 = vmatmul.mubr.bf16.gmra.mxu1 %v669_v16  ;;  %2381 = vmatprep.subr.bf16.mxu1 %v2591_v22 }
 0x173   : > { %2382 = vmatpush3.bf16.msra.mxu1 %v2591_v22 }
 0x174   : > { %2383 = vmatprep.subr.bf16.mxu1 %v2592_v23 }
 0x177   : > { %2384 = vmatpush3.bf16.msra.mxu1 %v2592_v23 }
 0x210   : > { %v2319_v24 = vpop.f32.mrf.mxu1 }
 0x211   : > { %v786_v30 = vadd.f32 %v2319_v24, %v3007_v26 }
 0x212   : > { %v777_v25 = vpop.f32.mrf.mxu1 }
 0x213   : > { %v778_v28 = vadd.f32 %v3007_v26, %v777_v25  ;;  %v858_v37 = vmax.f32 %v786_v30, 0.0 }
 0x214   : > { %v2320_v27 = vpop.f32.mrf.mxu1 }
 0x215   : > { %v789_v29 = vadd.f32 %v2320_v27, %v3007_v26  ;;  %v856_v35 = vmax.f32 %v778_v28, 0.0 }
 0x216   : > { %v780_v31 = vpop.f32.mrf.mxu1 }
 0x217   : > { %v781_v32 = vadd.f32 %v3007_v26, %v780_v31  ;;  %v859_v33 = vmax.f32 %v789_v29, 0.0 }
 0x218   : > { %v2323_v34 = vpop.f32.mrf.mxu1 }
 0x219   : > { %v857_v36 = vmax.f32 %v781_v32, 0.0  ;;  %v877_v40 = vpack.c.bf16 %v859_v33, %v858_v37  ;;  %v802_v44 = vadd.f32 %v2323_v34, %v3007_v26  ;;  %v2593_v32 = vld [vmem:[#allocation6 + $0xc8] sm:$0xff]   ;;  %v2594_v33 = vld [vmem:[#allocation6 + $0xc0] sm:$0xff]   ;;  %v2595_v34 = vld [vmem:[#allocation6 + $0x138] sm:$0xff]  }
 0x21a   : > { %v793_v38 = vpop.f32.mrf.mxu1  ;;  %2385 = vmatprep.subr.bf16.mxu1 %v2593_v32  ;;  %2409 = vmatprep.subr.bf16.mxu0 %v2595_v34  ;;  %v2599_v37 = vld [vmem:[#allocation6 + $0x118] sm:$0xff]  }
 0x21b   : > { %v876_v39 = vpack.c.bf16 %v857_v36, %v856_v35  ;;  %v794_v42 = vadd.f32 %v3007_v26, %v793_v38  ;;  %v862_v51 = vmax.f32 %v802_v44, 0.0  ;;  %2386 = vmatpush3.bf16.msra.mxu1 %v2593_v32  ;;  %v2596_v35 = vld [vmem:[#allocation6 + $0x130] sm:$0xff]   ;;  %v2598_v36 = vld [vmem:[#allocation6 + $0x120] sm:$0xff]  }
 0x21c   : > { %v2324_v41 = vpop.f32.mrf.mxu1  ;;  %2387 = vmatprep.subr.bf16.mxu1 %v2594_v33  ;;  %v2600_v38 = vld [vmem:[#allocation6 + $0x110] sm:$0xff]  }
 0x21d   : > { %v805_v43 = vadd.f32 %v2324_v41, %v3007_v26  ;;  %2353 = vmatprep.mubr.bf16.mxu0 %v876_v39  ;;  %v860_v49 = vmax.f32 %v794_v42, 0.0  ;;  %v3029_v41 = vld [vmem:[#allocation8 + $0x2] ss:$0 sm:$0xff] }
 0x21e   : > { %v796_v45 = vpop.f32.mrf.mxu1  ;;  %2354 = vmatmul.mubr.bf16.vlgmr.msra.gmra.mxu0 %v877_v40 }
 0x21f   : > { %v797_v46 = vadd.f32 %v3007_v26, %v796_v45  ;;  %v863_v47 = vmax.f32 %v805_v43, 0.0  ;;  %2388 = vmatpush3.bf16.msra.mxu1 %v2594_v33  ;;  %2410 = vmatpush3.bf16.msra.mxu0 %v2595_v34 }
 0x220   : > { %v2327_v48 = vpop.f32.mrf.mxu1  ;;  %2411 = vmatprep.subr.bf16.mxu0 %v2596_v35 }
 0x221   : > { %v861_v50 = vmax.f32 %v797_v46, 0.0  ;;  %v879_v54 = vpack.c.bf16 %v863_v47, %v862_v51  ;;  %v818_v58 = vadd.f32 %v2327_v48, %v3007_v26 }
 0x222   : > { %v809_v52 = vpop.f32.mrf.mxu1 }
 0x223   : > { %v878_v53 = vpack.c.bf16 %v861_v50, %v860_v49  ;;  %v810_v56 = vadd.f32 %v3007_v26, %v809_v52  ;;  %v866_v1 = vmax.f32 %v818_v58, 0.0  ;;  %2412 = vmatpush3.bf16.msra.mxu0 %v2596_v35 }
 0x224   : > { %v2328_v55 = vpop.f32.mrf.mxu1 }
 0x225   : > { %v821_v57 = vadd.f32 %v2328_v55, %v3007_v26  ;;  %2357 = vmatprep.mubr.bf16.mxu0 %v878_v53  ;;  %v864_v63 = vmax.f32 %v810_v56, 0.0 }
 0x226   : > { %v812_v59 = vpop.f32.mrf.mxu1  ;;  %2358 = vmatmul.mubr.bf16.gmra.mxu0 %v879_v54 }
 0x227   : > { %v813_v60 = vadd.f32 %v3007_v26, %v812_v59  ;;  %v867_v61 = vmax.f32 %v821_v57, 0.0 }
 0x228   : > { %v2331_v62 = vpop.f32.mrf.mxu1 }
 0x229   : > { %v865_v0 = vmax.f32 %v813_v60, 0.0  ;;  %v881_v4 = vpack.c.bf16 %v867_v61, %v866_v1  ;;  %v834_v8 = vadd.f32 %v2331_v62, %v3007_v26 }
 0x22a   : > { %v825_v2 = vpop.f32.mrf.mxu1 }
 0x22b   : > { %v880_v3 = vpack.c.bf16 %v865_v0, %v864_v63  ;;  %v826_v6 = vadd.f32 %v3007_v26, %v825_v2  ;;  %v870_v16 = vmax.f32 %v834_v8, 0.0 }
 0x22c   : > { %v2332_v5 = vpop.f32.mrf.mxu1 }
 0x22d   : > { %v837_v7 = vadd.f32 %v2332_v5, %v3007_v26  ;;  %2361 = vmatprep.mubr.bf16.mxu0 %v880_v3  ;;  %v868_v14 = vmax.f32 %v826_v6, 0.0 }
 0x22e   : > { %v828_v9 = vpop.f32.mrf.mxu1  ;;  %2362 = vmatmul.mubr.bf16.gmra.mxu0 %v881_v4 }
 0x22f   : > { %v829_v10 = vadd.f32 %v3007_v26, %v828_v9  ;;  %v871_v12 = vmax.f32 %v837_v7, 0.0 }
 0x230   : > { %v2335_v13 = vpop.f32.mrf.mxu1 }
 0x231   : > { %v869_v15 = vmax.f32 %v829_v10, 0.0  ;;  %v883_v19 = vpack.c.bf16 %v871_v12, %v870_v16  ;;  %v850_v22 = vadd.f32 %v2335_v13, %v3007_v26 }
 0x232   : > { %v841_v17 = vpop.f32.mrf.mxu1 }
 0x233   : > { %v882_v18 = vpack.c.bf16 %v869_v15, %v868_v14  ;;  %v842_v11 = vadd.f32 %v3007_v26, %v841_v17  ;;  %v874_v29 = vmax.f32 %v850_v22, 0.0 }
 0x234   : > { %v2336_v20 = vpop.f32.mrf.mxu1 }
 0x235   : > { %v853_v21 = vadd.f32 %v2336_v20, %v3007_v26  ;;  %2365 = vmatprep.mubr.bf16.mxu0 %v882_v18  ;;  %v872_v27 = vmax.f32 %v842_v11, 0.0 }
 0x236   : > { %v844_v23 = vpop.f32.mrf.mxu1  ;;  %2366 = vmatmul.mubr.bf16.gmra.mxu0 %v883_v19 }
 0x237   : > { %v845_v24 = vadd.f32 %v3007_v26, %v844_v23  ;;  %v875_v25 = vmax.f32 %v853_v21, 0.0  ;;  %v2597_v26 = vld [vmem:[#allocation6 + $0x128] sm:$0xff]  }
 0x238   : > { %2413 = vmatprep.subr.bf16.mxu0 %v2597_v26 }
 0x239   : > { %v873_v28 = vmax.f32 %v845_v24, 0.0  ;;  %v885_v31 = vpack.c.bf16 %v875_v25, %v874_v29  ;;  %2414 = vmatpush3.bf16.msra.mxu0 %v2597_v26 }
 0x23a   : > { %2415 = vmatprep.subr.bf16.mxu0 %v2598_v36 }
 0x23b   : > { %v884_v30 = vpack.c.bf16 %v873_v28, %v872_v27 }
 0x23d   : > { %2369 = vmatprep.mubr.bf16.mxu0 %v884_v30  ;;  %2416 = vmatpush3.bf16.msra.mxu0 %v2598_v36 }
 0x23e   : > { %2370 = vmatmul.mubr.bf16.gmra.mxu0 %v885_v31  ;;  %2417 = vmatprep.subr.bf16.mxu0 %v2599_v37 }
 0x241   : > { %2418 = vmatpush3.bf16.msra.mxu0 %v2599_v37 }
 0x242   : > { %2419 = vmatprep.subr.bf16.mxu0 %v2600_v38 }
 0x245   : > { %2420 = vmatpush3.bf16.msra.mxu0 %v2600_v38 }
 0x2de   : > { %v2355_v39 = vpop.f32.mrf.mxu0 }
 0x2df   : > { %v1002_v45 = vadd.f32 %v2355_v39, %v3029_v41 }
 0x2e0   : > { %v993_v40 = vpop.f32.mrf.mxu0 }
 0x2e1   : > { %v994_v43 = vadd.f32 %v3029_v41, %v993_v40  ;;  %v1074_v52 = vmax.f32 %v1002_v45, 0.0 }
 0x2e2   : > { %v2356_v42 = vpop.f32.mrf.mxu0 }
 0x2e3   : > { %v1005_v44 = vadd.f32 %v2356_v42, %v3029_v41  ;;  %v1072_v50 = vmax.f32 %v994_v43, 0.0 }
 0x2e4   : > { %v996_v46 = vpop.f32.mrf.mxu0 }
 0x2e5   : > { %v997_v47 = vadd.f32 %v3029_v41, %v996_v46  ;;  %v1075_v48 = vmax.f32 %v1005_v44, 0.0 }
 0x2e6   : > { %v2359_v49 = vpop.f32.mrf.mxu0 }
 0x2e7   : > { %v1073_v51 = vmax.f32 %v997_v47, 0.0  ;;  %v1093_v55 = vpack.c.bf16 %v1075_v48, %v1074_v52  ;;  %v1018_v59 = vadd.f32 %v2359_v49, %v3029_v41  ;;  %v2601_v47 = vld [vmem:[#allocation6 + $0x108] sm:$0xff]   ;;  %v2602_v48 = vld [vmem:[#allocation6 + $0x100] sm:$0xff]   ;;  %v2603_v49 = vld [vmem:[#allocation6 + $0x178] sm:$0xff]  }
 0x2e8   : > { %v1009_v53 = vpop.f32.mrf.mxu0  ;;  %2421 = vmatprep.subr.bf16.mxu0 %v2601_v47  ;;  %2445 = vmatprep.subr.bf16.mxu1 %v2603_v49  ;;  %v2607_v52 = vld [vmem:[#allocation6 + $0x158] sm:$0xff]  }
 0x2e9   : > { %v1092_v54 = vpack.c.bf16 %v1073_v51, %v1072_v50  ;;  %v1010_v57 = vadd.f32 %v3029_v41, %v1009_v53  ;;  %v1078_v2 = vmax.f32 %v1018_v59, 0.0  ;;  %2422 = vmatpush3.bf16.msra.mxu0 %v2601_v47  ;;  %v2604_v50 = vld [vmem:[#allocation6 + $0x170] sm:$0xff]   ;;  %v2606_v51 = vld [vmem:[#allocation6 + $0x160] sm:$0xff]  }
 0x2ea   : > { %v2360_v56 = vpop.f32.mrf.mxu0  ;;  %2423 = vmatprep.subr.bf16.mxu0 %v2602_v48  ;;  %v2608_v53 = vld [vmem:[#allocation6 + $0x150] sm:$0xff]  }
 0x2eb   : > { %v1021_v58 = vadd.f32 %v2360_v56, %v3029_v41  ;;  %2389 = vmatprep.mubr.bf16.mxu1 %v1092_v54  ;;  %v1076_v0 = vmax.f32 %v1010_v57, 0.0  ;;  %v3051_v56 = vld [vmem:[#allocation8 + $0x3] ss:$0 sm:$0xff] }
 0x2ec   : > { %v1012_v60 = vpop.f32.mrf.mxu0  ;;  %2390 = vmatmul.mubr.bf16.vlgmr.msra.gmra.mxu1 %v1093_v55 }
 0x2ed   : > { %v1013_v61 = vadd.f32 %v3029_v41, %v1012_v60  ;;  %v1079_v62 = vmax.f32 %v1021_v58, 0.0  ;;  %2424 = vmatpush3.bf16.msra.mxu0 %v2602_v48  ;;  %2446 = vmatpush3.bf16.msra.mxu1 %v2603_v49 }
 0x2ee   : > { %v2363_v63 = vpop.f32.mrf.mxu0  ;;  %2447 = vmatprep.subr.bf16.mxu1 %v2604_v50 }
 0x2ef   : > { %v1077_v1 = vmax.f32 %v1013_v61, 0.0  ;;  %v1095_v5 = vpack.c.bf16 %v1079_v62, %v1078_v2  ;;  %v1034_v9 = vadd.f32 %v2363_v63, %v3029_v41 }
 0x2f0   : > { %v1025_v3 = vpop.f32.mrf.mxu0 }
 0x2f1   : > { %v1094_v4 = vpack.c.bf16 %v1077_v1, %v1076_v0  ;;  %v1026_v7 = vadd.f32 %v3029_v41, %v1025_v3  ;;  %v1082_v17 = vmax.f32 %v1034_v9, 0.0  ;;  %2448 = vmatpush3.bf16.msra.mxu1 %v2604_v50 }
 0x2f2   : > { %v2364_v6 = vpop.f32.mrf.mxu0 }
 0x2f3   : > { %v1037_v8 = vadd.f32 %v2364_v6, %v3029_v41  ;;  %2393 = vmatprep.mubr.bf16.mxu1 %v1094_v4  ;;  %v1080_v15 = vmax.f32 %v1026_v7, 0.0 }
 0x2f4   : > { %v1028_v10 = vpop.f32.mrf.mxu0  ;;  %2394 = vmatmul.mubr.bf16.gmra.mxu1 %v1095_v5 }
 0x2f5   : > { %v1029_v12 = vadd.f32 %v3029_v41, %v1028_v10  ;;  %v1083_v13 = vmax.f32 %v1037_v8, 0.0 }
 0x2f6   : > { %v2367_v14 = vpop.f32.mrf.mxu0 }
 0x2f7   : > { %v1081_v16 = vmax.f32 %v1029_v12, 0.0  ;;  %v1097_v20 = vpack.c.bf16 %v1083_v13, %v1082_v17  ;;  %v1050_v23 = vadd.f32 %v2367_v14, %v3029_v41 }
 0x2f8   : > { %v1041_v18 = vpop.f32.mrf.mxu0 }
 0x2f9   : > { %v1096_v19 = vpack.c.bf16 %v1081_v16, %v1080_v15  ;;  %v1042_v21 = vadd.f32 %v3029_v41, %v1041_v18  ;;  %v1086_v31 = vmax.f32 %v1050_v23, 0.0 }
 0x2fa   : > { %v2368_v11 = vpop.f32.mrf.mxu0 }
 0x2fb   : > { %v1053_v22 = vadd.f32 %v2368_v11, %v3029_v41  ;;  %2397 = vmatprep.mubr.bf16.mxu1 %v1096_v19  ;;  %v1084_v29 = vmax.f32 %v1042_v21, 0.0 }
 0x2fc   : > { %v1044_v24 = vpop.f32.mrf.mxu0  ;;  %2398 = vmatmul.mubr.bf16.gmra.mxu1 %v1097_v20 }
 0x2fd   : > { %v1045_v25 = vadd.f32 %v3029_v41, %v1044_v24  ;;  %v1087_v27 = vmax.f32 %v1053_v22, 0.0 }
 0x2fe   : > { %v2371_v28 = vpop.f32.mrf.mxu0 }
 0x2ff   : > { %v1085_v30 = vmax.f32 %v1045_v25, 0.0  ;;  %v1099_v34 = vpack.c.bf16 %v1087_v27, %v1086_v31  ;;  %v1066_v37 = vadd.f32 %v2371_v28, %v3029_v41 }
 0x300   : > { %v1057_v32 = vpop.f32.mrf.mxu0 }
 0x301   : > { %v1098_v33 = vpack.c.bf16 %v1085_v30, %v1084_v29  ;;  %v1058_v26 = vadd.f32 %v3029_v41, %v1057_v32  ;;  %v1090_v44 = vmax.f32 %v1066_v37, 0.0 }
 0x302   : > { %v2372_v35 = vpop.f32.mrf.mxu0 }
 0x303   : > { %v1069_v36 = vadd.f32 %v2372_v35, %v3029_v41  ;;  %2401 = vmatprep.mubr.bf16.mxu1 %v1098_v33  ;;  %v1088_v42 = vmax.f32 %v1058_v26, 0.0 }
 0x304   : > { %v1060_v38 = vpop.f32.mrf.mxu0  ;;  %2402 = vmatmul.mubr.bf16.gmra.mxu1 %v1099_v34 }
 0x305   : > { %v1061_v39 = vadd.f32 %v3029_v41, %v1060_v38  ;;  %v1091_v40 = vmax.f32 %v1069_v36, 0.0  ;;  %v2605_v41 = vld [vmem:[#allocation6 + $0x168] sm:$0xff]  }
 0x306   : > { %2449 = vmatprep.subr.bf16.mxu1 %v2605_v41 }
 0x307   : > { %v1089_v43 = vmax.f32 %v1061_v39, 0.0  ;;  %v1101_v46 = vpack.c.bf16 %v1091_v40, %v1090_v44  ;;  %2450 = vmatpush3.bf16.msra.mxu1 %v2605_v41 }
 0x308   : > { %2451 = vmatprep.subr.bf16.mxu1 %v2606_v51 }
 0x309   : > { %v1100_v45 = vpack.c.bf16 %v1089_v43, %v1088_v42 }
 0x30b   : > { %2405 = vmatprep.mubr.bf16.mxu1 %v1100_v45  ;;  %2452 = vmatpush3.bf16.msra.mxu1 %v2606_v51 }
 0x30c   : > { %2406 = vmatmul.mubr.bf16.gmra.mxu1 %v1101_v46  ;;  %2453 = vmatprep.subr.bf16.mxu1 %v2607_v52 }
 0x30f   : > { %2454 = vmatpush3.bf16.msra.mxu1 %v2607_v52 }
 0x310   : > { %2455 = vmatprep.subr.bf16.mxu1 %v2608_v53 }
 0x313   : > { %2456 = vmatpush3.bf16.msra.mxu1 %v2608_v53 }
 0x3ac   : > { %v2391_v54 = vpop.f32.mrf.mxu1 }
 0x3ad   : > { %v1218_v60 = vadd.f32 %v2391_v54, %v3051_v56 }
 0x3ae   : > { %v1209_v55 = vpop.f32.mrf.mxu1 }
 0x3af   : > { %v1210_v58 = vadd.f32 %v3051_v56, %v1209_v55  ;;  %v1290_v3 = vmax.f32 %v1218_v60, 0.0 }
 0x3b0   : > { %v2392_v57 = vpop.f32.mrf.mxu1 }
 0x3b1   : > { %v1221_v59 = vadd.f32 %v2392_v57, %v3051_v56  ;;  %v1288_v1 = vmax.f32 %v1210_v58, 0.0 }
 0x3b2   : > { %v1212_v61 = vpop.f32.mrf.mxu1 }
 0x3b3   : > { %v1213_v62 = vadd.f32 %v3051_v56, %v1212_v61  ;;  %v1291_v63 = vmax.f32 %v1221_v59, 0.0 }
 0x3b4   : > { %v2395_v0 = vpop.f32.mrf.mxu1 }
 0x3b5   : > { %v1289_v2 = vmax.f32 %v1213_v62, 0.0  ;;  %v1309_v6 = vpack.c.bf16 %v1291_v63, %v1290_v3  ;;  %v1234_v10 = vadd.f32 %v2395_v0, %v3051_v56  ;;  %v2609_v62 = vld [vmem:[#allocation6 + $0x148] sm:$0xff]   ;;  %v2610_v63 = vld [vmem:[#allocation6 + $0x140] sm:$0xff]  }
 0x3b6   : > { %v1225_v4 = vpop.f32.mrf.mxu1  ;;  %2457 = vmatprep.subr.bf16.mxu1 %v2609_v62 }
 0x3b7   : > { %v1308_v5 = vpack.c.bf16 %v1289_v2, %v1288_v1  ;;  %v1226_v8 = vadd.f32 %v3051_v56, %v1225_v4  ;;  %v1294_v18 = vmax.f32 %v1234_v10, 0.0  ;;  %2458 = vmatpush3.bf16.msra.mxu1 %v2609_v62  ;;  %v3073_v2 = vld [vmem:[#allocation8 + $0x4] ss:$0 sm:$0xff] }
 0x3b8   : > { %v2396_v7 = vpop.f32.mrf.mxu1  ;;  %2459 = vmatprep.subr.bf16.mxu1 %v2610_v63 }
 0x3b9   : > { %v1237_v9 = vadd.f32 %v2396_v7, %v3051_v56  ;;  %2425 = vmatprep.mubr.bf16.mxu0 %v1308_v5  ;;  %v1292_v16 = vmax.f32 %v1226_v8, 0.0 }
 0x3ba   : > { %v1228_v12 = vpop.f32.mrf.mxu1  ;;  %2426 = vmatmul.mubr.bf16.vlgmr.msra.gmra.mxu0 %v1309_v6 }
 0x3bb   : > { %v1229_v13 = vadd.f32 %v3051_v56, %v1228_v12  ;;  %v1295_v14 = vmax.f32 %v1237_v9, 0.0  ;;  %2460 = vmatpush3.bf16.msra.mxu1 %v2610_v63 }
 0x3bc   : > { %v2399_v15 = vpop.f32.mrf.mxu1 }
 0x3bd   : > { %v1293_v17 = vmax.f32 %v1229_v13, 0.0  ;;  %v1311_v11 = vpack.c.bf16 %v1295_v14, %v1294_v18  ;;  %v1250_v24 = vadd.f32 %v2399_v15, %v3051_v56 }
 0x3be   : > { %v1241_v19 = vpop.f32.mrf.mxu1 }
 0x3bf   : > { %v1310_v20 = vpack.c.bf16 %v1293_v17, %v1292_v16  ;;  %v1242_v22 = vadd.f32 %v3051_v56, %v1241_v19  ;;  %v1298_v32 = vmax.f32 %v1250_v24, 0.0 }
 0x3c0   : > { %v2400_v21 = vpop.f32.mrf.mxu1 }
 0x3c1   : > { %v1253_v23 = vadd.f32 %v2400_v21, %v3051_v56  ;;  %2429 = vmatprep.mubr.bf16.mxu0 %v1310_v20  ;;  %v1296_v30 = vmax.f32 %v1242_v22, 0.0 }
 0x3c2   : > { %v1244_v25 = vpop.f32.mrf.mxu1  ;;  %2430 = vmatmul.mubr.bf16.gmra.mxu0 %v1311_v11 }
 0x3c3   : > { %v1245_v27 = vadd.f32 %v3051_v56, %v1244_v25  ;;  %v1299_v28 = vmax.f32 %v1253_v23, 0.0 }
 0x3c4   : > { %v2403_v29 = vpop.f32.mrf.mxu1 }
 0x3c5   : > { %v1297_v31 = vmax.f32 %v1245_v27, 0.0  ;;  %v1313_v35 = vpack.c.bf16 %v1299_v28, %v1298_v32  ;;  %v1266_v38 = vadd.f32 %v2403_v29, %v3051_v56 }
 0x3c6   : > { %v1257_v33 = vpop.f32.mrf.mxu1 }
 0x3c7   : > { %v1312_v34 = vpack.c.bf16 %v1297_v31, %v1296_v30  ;;  %v1258_v36 = vadd.f32 %v3051_v56, %v1257_v33  ;;  %v1302_v46 = vmax.f32 %v1266_v38, 0.0 }
 0x3c8   : > { %v2404_v26 = vpop.f32.mrf.mxu1 }
 0x3c9   : > { %v1269_v37 = vadd.f32 %v2404_v26, %v3051_v56  ;;  %2433 = vmatprep.mubr.bf16.mxu0 %v1312_v34  ;;  %v1300_v44 = vmax.f32 %v1258_v36, 0.0 }
 0x3ca   : > { %v1260_v39 = vpop.f32.mrf.mxu1  ;;  %2434 = vmatmul.mubr.bf16.gmra.mxu0 %v1313_v35 }
 0x3cb   : > { %v1261_v40 = vadd.f32 %v3051_v56, %v1260_v39  ;;  %v1303_v42 = vmax.f32 %v1269_v37, 0.0 }
 0x3cc   : > { %v2407_v43 = vpop.f32.mrf.mxu1 }
 0x3cd   : > { %v1301_v45 = vmax.f32 %v1261_v40, 0.0  ;;  %v1315_v49 = vpack.c.bf16 %v1303_v42, %v1302_v46  ;;  %v1282_v52 = vadd.f32 %v2407_v43, %v3051_v56 }
 0x3ce   : > { %v1273_v47 = vpop.f32.mrf.mxu1 }
 0x3cf   : > { %v1314_v48 = vpack.c.bf16 %v1301_v45, %v1300_v44  ;;  %v1274_v41 = vadd.f32 %v3051_v56, %v1273_v47  ;;  %v1306_v59 = vmax.f32 %v1282_v52, 0.0 }
 0x3d0   : > { %v2408_v50 = vpop.f32.mrf.mxu1 }
 0x3d1   : > { %v1285_v51 = vadd.f32 %v2408_v50, %v3051_v56  ;;  %2437 = vmatprep.mubr.bf16.mxu0 %v1314_v48  ;;  %v1304_v57 = vmax.f32 %v1274_v41, 0.0 }
 0x3d2   : > { %v1276_v53 = vpop.f32.mrf.mxu1  ;;  %2438 = vmatmul.mubr.bf16.gmra.mxu0 %v1315_v49 }
 0x3d3   : > { %v1277_v54 = vadd.f32 %v3051_v56, %v1276_v53  ;;  %v1307_v55 = vmax.f32 %v1285_v51, 0.0 }
 0x3d5   : > { %v1305_v58 = vmax.f32 %v1277_v54, 0.0  ;;  %v1317_v61 = vpack.c.bf16 %v1307_v55, %v1306_v59 }
 0x3d7   : > { %v1316_v60 = vpack.c.bf16 %v1305_v58, %v1304_v57 }
 0x3d9   : > { %2441 = vmatprep.mubr.bf16.mxu0 %v1316_v60 }
 0x3da   : > { %2442 = vmatmul.mubr.bf16.gmra.mxu0 %v1317_v61 }
 0x47a   : > { %v2427_v0 = vpop.f32.mrf.mxu0 }
 0x47b   : > { %v1434_v5 = vadd.f32 %v2427_v0, %v3073_v2 }
 0x47c   : > { %v1425_v1 = vpop.f32.mrf.mxu0 }
 0x47d   : > { %v1426_v56 = vadd.f32 %v3073_v2, %v1425_v1  ;;  %v1506_v13 = vmax.f32 %v1434_v5, 0.0 }
 0x47e   : > { %v2428_v3 = vpop.f32.mrf.mxu0 }
 0x47f   : > { %v1437_v4 = vadd.f32 %v2428_v3, %v3073_v2  ;;  %v1504_v10 = vmax.f32 %v1426_v56, 0.0 }
 0x480   : > { %v1428_v6 = vpop.f32.mrf.mxu0 }
 0x481   : > { %v1429_v7 = vadd.f32 %v3073_v2, %v1428_v6  ;;  %v1507_v8 = vmax.f32 %v1437_v4, 0.0 }
 0x482   : > { %v2431_v9 = vpop.f32.mrf.mxu0 }
 0x483   : > { %v1505_v12 = vmax.f32 %v1429_v7, 0.0  ;;  %v1525_v16 = vpack.c.bf16 %v1507_v8, %v1506_v13  ;;  %v1450_v20 = vadd.f32 %v2431_v9, %v3073_v2  ;;  %v2020_v8 = vld [vmem:[#allocation8 + $0x5] ss:$0 sm:$0xff] }
 0x484   : > { %v1441_v14 = vpop.f32.mrf.mxu0 }
 0x485   : > { %v1524_v15 = vpack.c.bf16 %v1505_v12, %v1504_v10  ;;  %v1442_v18 = vadd.f32 %v3073_v2, %v1441_v14  ;;  %v1510_v27 = vmax.f32 %v1450_v20, 0.0 }
 0x486   : > { %v2432_v17 = vpop.f32.mrf.mxu0 }
 0x487   : > { %v1453_v19 = vadd.f32 %v2432_v17, %v3073_v2  ;;  %2461 = vmatprep.mubr.bf16.mxu1 %v1524_v15  ;;  %v1508_v24 = vmax.f32 %v1442_v18, 0.0 }
 0x488   : > { %v1444_v11 = vpop.f32.mrf.mxu0  ;;  %2462 = vmatmul.mubr.bf16.vlgmr.msra.gmra.mxu1 %v1525_v16 }
 0x489   : > { %v1445_v21 = vadd.f32 %v3073_v2, %v1444_v11  ;;  %v1511_v22 = vmax.f32 %v1453_v19, 0.0 }
 0x48a   : > { %v2435_v23 = vpop.f32.mrf.mxu0 }
 0x48b   : > { %v1509_v25 = vmax.f32 %v1445_v21, 0.0  ;;  %v1527_v30 = vpack.c.bf16 %v1511_v22, %v1510_v27  ;;  %v1466_v34 = vadd.f32 %v2435_v23, %v3073_v2 }
 0x48c   : > { %v1457_v28 = vpop.f32.mrf.mxu0 }
 0x48d   : > { %v1526_v29 = vpack.c.bf16 %v1509_v25, %v1508_v24  ;;  %v1458_v32 = vadd.f32 %v3073_v2, %v1457_v28  ;;  %v1514_v40 = vmax.f32 %v1466_v34, 0.0 }
 0x48e   : > { %v2436_v31 = vpop.f32.mrf.mxu0 }
 0x48f   : > { %v1469_v33 = vadd.f32 %v2436_v31, %v3073_v2  ;;  %2465 = vmatprep.mubr.bf16.mxu1 %v1526_v29  ;;  %v1512_v38 = vmax.f32 %v1458_v32, 0.0 }
 0x490   : > { %v1460_v35 = vpop.f32.mrf.mxu0  ;;  %2466 = vmatmul.mubr.bf16.gmra.mxu1 %v1527_v30 }
 0x491   : > { %v1461_v26 = vadd.f32 %v3073_v2, %v1460_v35  ;;  %v1515_v36 = vmax.f32 %v1469_v33, 0.0 }
 0x492   : > { %v2439_v37 = vpop.f32.mrf.mxu0 }
 0x493   : > { %v1513_v39 = vmax.f32 %v1461_v26, 0.0  ;;  %v1529_v44 = vpack.c.bf16 %v1515_v36, %v1514_v40  ;;  %v1482_v48 = vadd.f32 %v2439_v37, %v3073_v2 }
 0x494   : > { %v1473_v42 = vpop.f32.mrf.mxu0 }
 0x495   : > { %v1528_v43 = vpack.c.bf16 %v1513_v39, %v1512_v38  ;;  %v1474_v46 = vadd.f32 %v3073_v2, %v1473_v42  ;;  %v1518_v54 = vmax.f32 %v1482_v48, 0.0 }
 0x496   : > { %v2440_v45 = vpop.f32.mrf.mxu0 }
 0x497   : > { %v1485_v47 = vadd.f32 %v2440_v45, %v3073_v2  ;;  %2469 = vmatprep.mubr.bf16.mxu1 %v1528_v43  ;;  %v1516_v52 = vmax.f32 %v1474_v46, 0.0 }
 0x498   : > { %v1476_v49 = vpop.f32.mrf.mxu0  ;;  %2470 = vmatmul.mubr.bf16.gmra.mxu1 %v1529_v44 }
 0x499   : > { %v1477_v50 = vadd.f32 %v3073_v2, %v1476_v49  ;;  %v1519_v41 = vmax.f32 %v1485_v47, 0.0 }
 0x49a   : > { %v2443_v51 = vpop.f32.mrf.mxu0 }
 0x49b   : > { %v1517_v53 = vmax.f32 %v1477_v50, 0.0  ;;  %v1531_v58 = vpack.c.bf16 %v1519_v41, %v1518_v54  ;;  %v1498_v62 = vadd.f32 %v2443_v51, %v3073_v2 }
 0x49c   : > { %v1489_v55 = vpop.f32.mrf.mxu0 }
 0x49d   : > { %v1530_v57 = vpack.c.bf16 %v1517_v53, %v1516_v52  ;;  %v1490_v60 = vadd.f32 %v3073_v2, %v1489_v55  ;;  %v1522_v4 = vmax.f32 %v1498_v62, 0.0 }
 0x49e   : > { %v2444_v59 = vpop.f32.mrf.mxu0 }
 0x49f   : > { %v1501_v61 = vadd.f32 %v2444_v59, %v3073_v2  ;;  %2473 = vmatprep.mubr.bf16.mxu1 %v1530_v57  ;;  %v1520_v3 = vmax.f32 %v1490_v60, 0.0 }
 0x4a0   : > { %v1492_v63 = vpop.f32.mrf.mxu0  ;;  %2474 = vmatmul.mubr.bf16.gmra.mxu1 %v1531_v58 }
 0x4a1   : > { %v1493_v0 = vadd.f32 %v3073_v2, %v1492_v63  ;;  %v1523_v1 = vmax.f32 %v1501_v61, 0.0 }
 0x4a3   : > { %v1521_v56 = vmax.f32 %v1493_v0, 0.0  ;;  %v1533_v6 = vpack.c.bf16 %v1523_v1, %v1522_v4 }
 0x4a5   : > { %v1532_v5 = vpack.c.bf16 %v1521_v56, %v1520_v3 }
 0x4a7   : > { %2477 = vmatprep.mubr.bf16.mxu1 %v1532_v5 }
 0x4a8   : > { %2478 = vmatmul.mubr.bf16.gmra.mxu1 %v1533_v6 }
 0x548   : > { %v2463_v7 = vpop.f32.mrf.mxu1 }
 0x549   : > { %v1650_v12 = vadd.f32 %v2463_v7, %v2020_v8 }
 0x54a   : > { %v1641_v9 = vpop.f32.mrf.mxu1 }
 0x54b   : > { %v1642_v15 = vadd.f32 %v2020_v8, %v1641_v9 }
 0x54c   : > { %v2464_v10 = vpop.f32.mrf.mxu1 }
 0x54d   : > { %v1653_v13 = vadd.f32 %v2464_v10, %v2020_v8 }
 0x54e   : > { %v1644_v14 = vpop.f32.mrf.mxu1 }
 0x54f   : > { %v2106_v16 = vpack.c.bf16 %v1653_v13, %v1650_v12  ;;  %v1645_v17 = vadd.f32 %v2020_v8, %v1644_v14 }
 0x550   : > { %v2467_v2 = vpop.f32.mrf.mxu1 }
 0x551   : > { %2148 = vst [vmem:[%s3096_s26 + $0x8] sm:$0xff] %v2106_v16   ;;  %v2101_v18 = vpack.c.bf16 %v1645_v17, %v1642_v15  ;;  %v1666_v11 = vadd.f32 %v2467_v2, %v2020_v8 }
 0x552   : > { %v1657_v19 = vpop.f32.mrf.mxu1 }
 0x553   : > { %2102 = vst [vmem:[%s3096_s26] sm:$0xff] %v2101_v18   ;;  %v1658_v23 = vadd.f32 %v2020_v8, %v1657_v19 }
 0x554   : > { %v2468_v20 = vpop.f32.mrf.mxu1 }
 0x555   : > { %v1669_v21 = vadd.f32 %v2468_v20, %v2020_v8 }
 0x556   : > { %v1660_v22 = vpop.f32.mrf.mxu1 }
 0x557   : > { %v2116_v24 = vpack.c.bf16 %v1669_v21, %v1666_v11  ;;  %v1661_v25 = vadd.f32 %v2020_v8, %v1660_v22 }
 0x558   : > { %v2471_v27 = vpop.f32.mrf.mxu1 }
 0x559   : > { %2150 = vst [vmem:[%s3096_s26 + $0x18] sm:$0xff] %v2116_v24   ;;  %v2111_v28 = vpack.c.bf16 %v1661_v25, %v1658_v23  ;;  %v1682_v31 = vadd.f32 %v2471_v27, %v2020_v8 }
 0x55a   : > { %v1673_v29 = vpop.f32.mrf.mxu1 }
 0x55b   : > { %2149 = vst [vmem:[%s3096_s26 + $0x10] sm:$0xff] %v2111_v28   ;;  %v1674_v34 = vadd.f32 %v2020_v8, %v1673_v29 }
 0x55c   : > { %v2472_v30 = vpop.f32.mrf.mxu1 }
 0x55d   : > { %v1685_v32 = vadd.f32 %v2472_v30, %v2020_v8 }
 0x55e   : > { %v1676_v33 = vpop.f32.mrf.mxu1 }
 0x55f   : > { %v2126_v35 = vpack.c.bf16 %v1685_v32, %v1682_v31  ;;  %v1677_v26 = vadd.f32 %v2020_v8, %v1676_v33 }
 0x560   : > { %v2475_v36 = vpop.f32.mrf.mxu1 }
 0x561   : > { %2152 = vst [vmem:[%s3096_s26 + $0x28] sm:$0xff] %v2126_v35   ;;  %v2121_v37 = vpack.c.bf16 %v1677_v26, %v1674_v34  ;;  %v1698_v40 = vadd.f32 %v2475_v36, %v2020_v8 }
 0x562   : > { %v1689_v38 = vpop.f32.mrf.mxu1 }
 0x563   : > { %2151 = vst [vmem:[%s3096_s26 + $0x20] sm:$0xff] %v2121_v37   ;;  %v1690_v44 = vadd.f32 %v2020_v8, %v1689_v38 }
 0x564   : > { %v2476_v39 = vpop.f32.mrf.mxu1 }
 0x565   : > { %v1701_v42 = vadd.f32 %v2476_v39, %v2020_v8 }
 0x566   : > { %v1692_v43 = vpop.f32.mrf.mxu1 }
 0x567   : > { %v2136_v45 = vpack.c.bf16 %v1701_v42, %v1698_v40  ;;  %v1693_v46 = vadd.f32 %v2020_v8, %v1692_v43 }
 0x568   : > { %v2479_v47 = vpop.f32.mrf.mxu1 }
 0x569   : > { %2154 = vst [vmem:[%s3096_s26 + $0x38] sm:$0xff] %v2136_v45   ;;  %v2131_v48 = vpack.c.bf16 %v1693_v46, %v1690_v44  ;;  %v1714_v41 = vadd.f32 %v2479_v47, %v2020_v8 }
 0x56a   : > { %v1705_v49 = vpop.f32.mrf.mxu1 }
 0x56b   : > { %2153 = vst [vmem:[%s3096_s26 + $0x30] sm:$0xff] %v2131_v48   ;;  %v1706_v53 = vadd.f32 %v2020_v8, %v1705_v49 }
 0x56c   : > { %v2480_v50 = vpop.f32.mrf.mxu1 }
 0x56d   : > { %v1717_v51 = vadd.f32 %v2480_v50, %v2020_v8 }
 0x56e   : > { %v1708_v52 = vpop.f32.mrf.mxu1 }
 0x56f   : > { %v2146_v54 = vpack.c.bf16 %v1717_v51, %v1714_v41  ;;  %v1709_v55 = vadd.f32 %v2020_v8, %v1708_v52  ;;  %1827 = sbr.rel (!%p3185_p10) target bundleno = 1423 (0x58f), region = 48 }
 0x571   : > { %2156 = vst [vmem:[%s3096_s26 + $0x48] sm:$0xff] %v2146_v54   ;;  %v2141_v57 = vpack.c.bf16 %v1709_v55, %v1706_v53 }
 0x573   : > { %2155 = vst [vmem:[%s3096_s26 + $0x40] sm:$0xff] %v2141_v57  }
 0x574   : > { %s3194_s8 = smov (!%p1830_p1, %s1829_s8), 20 }
 0x575   : > { %s3112_s11 = sshll.u32 %s3194_s8, 6 }
 0x576   : > { %s1834_s28 = ssub.s32 1280, %s3112_s11 }
 0x577   : > { %1835 = vsyncadd %s1821_s29, %s1834_s28  ;;  %p2050_p3 = scmp.ne.s32.totalorder %s3112_s11, 0  ;;  %s2097_s24 = smul.u32 1280, %s2813_s16 }
 0x578   : > { %s1840_s30 = sshll.u32 %s3096_s26, 4  ;;  %s2769_s9 = smov [#allocation9]   ;;  %s3125_s30 = int_to_ptr.vmem [resolvable:$true] %s1840_s30 }
 0x579   : > { %s3123_s7 = scalar_lea.hbm %s3173_s3, %s2097_s24  ;;  %s2689_s22 = scalar_lea.vmem %s3125_s30, %s3112_s11 }
 0x57a   : > { %p2690_p7 = scmp.ne.s32.totalorder %s3125_s30, %s2689_s22  ;;  %s2693_s10 = sshll.u32 %s2769_s9, 4  ;;  %s2694_s10 = int_to_ptr.vmem [resolvable:$false] %s2693_s10 }
 0x57b   : > { %s2695_s16 = scalar_lea.vmem %s2694_s10, 2560  ;;  %p2696_p4 = scmp.lt.s32.totalorder %s3125_s30, %s2694_s10 }
 0x57c   : > { %p2691_p9 = pnand %p2690_p7, %p2050_p3  ;;  %p2697_p6 = scmp.lt.s32.totalorder %s2695_s16, %s2689_s22 }
 0x57e   : > { %p2692_p12 = pneg %p2691_p9  ;;  %p2698_p11 = por %p2697_p6, %p2696_p4 }
 0x580   : > { %p2699_p0 = pnand %p2698_p11, %p2692_p12 }
 0x582   : > { %2702 = shalt.err (!%p2699_p0)
}
 0x583   : > { %s2703_s19 = scalar_lea.hbm %s3123_s7, %s3112_s11  ;;  %s2707_s23 = scalar_lea.hbm %s3173_s3, 2432 }
 0x584   : > { %p2704_p2 = scmp.ne.s32.totalorder %s3123_s7, %s2703_s19  ;;  %p2708_p10 = scmp.lt.s32.totalorder %s3123_s7, %s3173_s3 }
 0x585   : > { %p2709_p1 = scmp.lt.s32.totalorder %s2707_s23, %s2703_s19 }
 0x586   : > { %p2705_p5 = pnand %p2704_p2, %p2050_p3 }
 0x587   : > { %p2710_p7 = por %p2709_p1, %p2708_p10 }
 0x588   : > { %p2706_p13 = pneg %p2705_p5 }
 0x58a   : > { %p2711_p9 = pnand %p2710_p7, %p2706_p13 }
 0x58c   : > { %2714 = shalt.err (!%p2711_p9)
}
 0x58d   : > { %s2770_s8 = smov 64   ;;  %s2771_s28 = smov 4  }
 0x58e   : > { %1846 = dma.vmem_to_hbm [thread:$0]  (%p2050_p3), %s3125_s30, %s3112_s11, %s3123_s7, %s1821_s29, %s2770_s8, %s2770_s8, %s2771_s28  }
 0x58f PF: > { %s1855_s24 = sand.u32 1, %s2745_s12   ;;  %p3186_p12 = scmp.ne.s32.totalorder %s3179_s25, 0 }
 0x590   : > { %s1856_s5 = scalar_lea.sflag [#allocation5], %s1855_s24 }
 0x591   : > { %p2502_p4 = pnand %p1936_p8, %p3186_p12 }
 0x593   : > { %p2503_p6 = pneg %p2502_p4 }
 0x595   : > { %2740 = dma.done.wait (%p2503_p6), %s1856_s5, 1280  }
 0x596   : > { %2742 = vsyncadd (%p2503_p6), %s1856_s5, 4294966016  ;;  %p17_p11 = scmp.ge.s32.totalorder %s2817_s18, 4   ;;  %s3187_s12 = smov %s2749_s13 }
 0x597   : > { %s3188_s13 = smov %s2753_s14  ;;  %s3189_s14 = smov %s2829_s21 }
 0x598   : > { %s3190_s15 = smov %s2817_s18  ;;  %19 = sbr.rel (!%p17_p11) target bundleno = 6 (0x6), region = 95 }
 0x59d   :  { %1861 = vsyncpa [#allocation4], 1 }
 0x59e   :  { %1863 = vsyncpa [#allocation4 + $0x1], 1 }
 0x59f   :  { %1864 = vsyncpa [#allocation7], 1 }
 0x5a0   :  { %1865 = vsyncpa [#allocation5], 1 }
 0x5a1   :  { %1867 = vsyncpa [#allocation5 + $0x1], 1 }

// kernel: tpu_custom_call.1
= control target key start
LH: loop header
LB: loop body
LE: loop exit
PB: predicated region body
PF: predicated region fallthrough
CT: control target
= control target key end

     0   :  { %8 = vsyncpa [#allocation4], 0  ;;  %s3170_s0 = inlined_call_operand.hbm [shape: f32[300,100], index: 0, kind: input, shape index: {}]   ;;  %s3171_s1 = inlined_call_operand.hbm [shape: bf16[6,128,128], index: 1, kind: input, shape index: {}]   ;;  %s3172_s2 = inlined_call_operand.hbm [shape: f32[6,1,128], index: 2, kind: input, shape index: {}]   ;;  %s3173_s3 = inlined_call_operand.hbm [shape: bf16[300,128], index: 3, kind: output, shape index: {}]  }
   0x1   :  { %10 = vsyncpa [#allocation4 + $0x1], 0 }
   0x2   :  { %11 = vsyncpa [#allocation7], 0 }
   0x3   :  { %12 = vsyncpa [#allocation5], 0 }
   0x4   :  { %14 = vsyncpa [#allocation5 + $0x1], 0  ;;  %s2792_s12 = smov 0   ;;  %s2794_s13 = smov 0  }
   0x5   :  { %s2796_s14 = smov 0   ;;  %s2798_s15 = smov 0  }
   0x6 LB: > { %s2813_s16 = sadd.s32 4294967295, %s2757_s15   ;;  %s1932_s17 = sadd.s32 4294967294, %s2757_s15   ;;  %s2757_s15 = sphi %s2798_s15, %s3190_s15   ;;  %s2753_s14 = sphi %s2796_s14, %s3189_s14   ;;  %s2749_s13 = sphi %s2794_s13, %s3188_s13   ;;  %s2745_s12 = sphi %s2792_s12, %s3187_s12  }
   0x7   : > { %s2817_s18 = sadd.s32 1, %s2757_s15   ;;  %s27_s19 = sadd.s32 1, %s2753_s14 }
   0x8   : > { %s24_s20 = ssub.s32 %s2757_s15, %s2817_s18  ;;  %p34_p0 = scmp.ne.s32.totalorder %s2753_s14, %s2749_s13 }
   0x9   : > { %p25_p1 = scmp.eq.s32.totalorder %s24_s20, 0  ;;  %p35_p2 = scmp.eq.s32.totalorder %s2757_s15, 0 }
   0xa   : > { %p40_p3 = scmp.ne.s32.totalorder %s2749_s13, %s2745_s12  ;;  %p3174_p4 = scmp.eq.s32.totalorder %s2813_s16, 0 }
   0xb   : > { %s2829_s21 = scalar_select %p25_p1, %s2753_s14, %s27_s19  }
   0xc   : > { %p2831_p5 = por %p35_p2, %p34_p0  ;;  %p2837_p6 = por %p3174_p4, %p40_p3 }
   0xd   : > { %p106_p7 = scmp.eq.s32.totalorder %s2813_s16, 1  ;;  %p112_p8 = scmp.eq.s32.totalorder %s1932_s17, 1 }
   0xe   : > { %s3177_s23 = scalar_select %p2837_p6, 1, 0 }
   0xf   : > { %p1933_p9 = scmp.ge.s32.totalorder %s2757_s15, 1  ;;  %p119_p10 = scmp.lt.s32.totalorder %s2757_s15, 3 }
  0x10   : > { %p2844_p11 = por %p106_p7, %p34_p0  ;;  %p2848_p12 = por %p112_p8, %p40_p3 }
  0x11   : > { %p2852_p13 = pnand %p1933_p9, %p119_p10  ;;  %s2759_s27 = smov [#allocation6]  }
  0x12   : > { %s3178_s24 = scalar_select %p2844_p11, 1, 0 }
  0x13   : > { %s3179_s25 = scalar_select %p2848_p12, 1, 0 }
  0x14   : > { %p2494_p1 = pneg %p2852_p13  ;;  %s131_s28 = sshll.u32 %s2759_s27, 4  ;;  %s132_s28 = int_to_ptr.vmem [resolvable:$true] %s131_s28 }
  0x15   : > { %s2760_s30 = smov [#allocation8]   ;;  %s2622_s5 = scalar_lea.vmem %s132_s28, 6144 }
  0x16   : > { %p2860_p2 = pnand %p2494_p1, %p3174_p4  ;;  %s144_s4 = sshll.u32 %s2760_s30, 4  ;;  %s145_s4 = int_to_ptr.vmem [resolvable:$true] %s144_s4 }
  0x17   : > { %p2623_p3 = scmp.ne.s32.totalorder %s132_s28, %s2622_s5  ;;  %p2630_p9 = scmp.lt.s32.totalorder %s132_s28, %s132_s28 }
  0x18   : > { %p2613_p0 = pneg %p2860_p2  ;;  %p2631_p10 = scmp.lt.s32.totalorder %s2622_s5, %s2622_s5 }
  0x1a   : > { %p2625_p7 = pnand %p2623_p3, %p2613_p0  ;;  %p2632_p12 = por %p2631_p10, %p2630_p9 }
  0x1c   : > { %p2626_p8 = pneg %p2625_p7 }
  0x1e   : > { %p2633_p1 = pnand %p2632_p12, %p2626_p8 }
  0x20   : > { %2636 = shalt.err (!%p2633_p1)
}
  0x21   : > { %s2761_s6 = smov 64   ;;  %s2762_s7 = smov 4  }
  0x22   : > { %2497 = dma.hbm_to_vmem [thread:$0]  (!%p2860_p2), %s3171_s1, 6144, %s132_s28, [#allocation7], %s2761_s6, %s2761_s6, %s2762_s7  }
  0x23   : > { %s2648_s10 = scalar_lea.vmem %s145_s4, 96  ;;  %p2656_p11 = scmp.lt.s32.totalorder %s145_s4, %s145_s4 }
  0x24   : > { %p2649_p4 = scmp.ne.s32.totalorder %s145_s4, %s2648_s10  ;;  %p2657_p6 = scmp.lt.s32.totalorder %s2648_s10, %s2648_s10 }
  0x26   : > { %p2651_p3 = pnand %p2649_p4, %p2613_p0  ;;  %p2658_p9 = por %p2657_p6, %p2656_p11 }
  0x28   : > { %p2652_p7 = pneg %p2651_p3 }
  0x2a   : > { %p2659_p12 = pnand %p2658_p9, %p2652_p7 }
  0x2c   : > { %2662 = shalt.err (!%p2659_p12)
}
  0x2d   : > { %s2763_s11 = smov 16   ;;  %s2764_s17 = smov 1  }
  0x2e   : > { %2500 = dma.hbm_to_vmem [thread:$0]  (!%p2860_p2), %s3172_s2, 96, %s145_s4, [#allocation7], %s2763_s11, %s2763_s11, %s2764_s17  }
  0x2f   : > { %p1936_p8 = scmp.ge.s32.totalorder %s2757_s15, 2 }
  0x31   : > { %154 = sbr.rel (%p1936_p8) target bundleno = 88 (0x58), region = 24 }
  0x36   : > { %157 = sbr.rel (!%p2831_p5) target bundleno = 88 (0x58), region = 28  ;;  %s158_s27 = sand.u32 (%p2831_p5), 1, %s2753_s14  }
  0x37   : > { %s163_s28 = smul.u32 (%p2831_p5), 20, %s2757_s15  ;;  %s2892_s6 = scalar_lea.sflag (%p2831_p5), [#allocation4], %s158_s27 }
  0x38   : > { %s2481_s30 = smul.u32 (%p2831_p5), 160, %s158_s27 }
  0x39   : > { %s164_s5 = ssub.s32 (%p2831_p5), 38, %s163_s28 }
  0x3a   : > { %p165_p4 = scmp.lt.s32.totalorder (%p2831_p5), %s164_s5, 20  ;;  %s162_s7 = scalar_lea.vmem (%p2831_p5), [#allocation3], %s2481_s30 }
  0x3c   : > { %s3192_s5 = smov (!%p165_p4, %s164_s5), 20 }
  0x3d   : > { %s2889_s29 = sshll.u32 %s3192_s5, 7 }
  0x3e   : > { %s169_s4 = ssub.s32 2560, %s2889_s29 }
  0x3f   : > { %170 = vsyncadd %s2892_s6, %s169_s4  ;;  %p1938_p5 = scmp.ne.s32.totalorder %s2889_s29, 0  ;;  %s2056_s22 = smul.u32 2560, %s2757_s15 }
  0x40   : > { %s175_s8 = sshll.u32 %s162_s7, 4  ;;  %s2667_s27 = scalar_lea.hbm %s3170_s0, 4864  ;;  %s2902_s8 = int_to_ptr.vmem [resolvable:$true] %s175_s8 }
  0x41   : > { %s2900_s11 = scalar_lea.hbm %s3170_s0, %s2056_s22 }
  0x42   : > { %s2663_s17 = scalar_lea.hbm %s2900_s11, %s2889_s29  ;;  %p2668_p0 = scmp.lt.s32.totalorder %s2900_s11, %s3170_s0 }
  0x43   : > { %p2664_p6 = scmp.ne.s32.totalorder %s2900_s11, %s2663_s17  ;;  %p2669_p10 = scmp.lt.s32.totalorder %s2667_s27, %s2663_s17 }
  0x45   : > { %p2665_p11 = pnand %p2664_p6, %p1938_p5  ;;  %p2670_p1 = por %p2669_p10, %p2668_p0 }
  0x47   : > { %p2666_p2 = pneg %p2665_p11 }
  0x49   : > { %p2671_p3 = pnand %p2670_p1, %p2666_p2 }
  0x4b   : > { %2674 = shalt.err (!%p2671_p3)
}
  0x4c   : > { %s2675_s5 = scalar_lea.vmem %s2902_s8, %s2889_s29  ;;  %s2765_s4 = smov [#allocation3]  }
  0x4d   : > { %p2676_p7 = scmp.ne.s32.totalorder %s2902_s8, %s2675_s5  ;;  %s2679_s7 = sshll.u32 %s2765_s4, 4  ;;  %s2680_s7 = int_to_ptr.vmem [resolvable:$false] %s2679_s7 }
  0x4e   : > { %s2681_s22 = scalar_lea.vmem %s2680_s7, 5120  ;;  %p2682_p4 = scmp.lt.s32.totalorder %s2902_s8, %s2680_s7 }
  0x4f   : > { %p2677_p9 = pnand %p2676_p7, %p1938_p5  ;;  %p2683_p6 = scmp.lt.s32.totalorder %s2681_s22, %s2675_s5 }
  0x51   : > { %p2678_p12 = pneg %p2677_p9  ;;  %p2684_p11 = por %p2683_p6, %p2682_p4 }
  0x53   : > { %p2685_p0 = pnand %p2684_p11, %p2678_p12 }
  0x55   : > { %2688 = shalt.err (!%p2685_p0)
}
  0x56   : > { %s2766_s9 = smov 128   ;;  %s2767_s10 = smov 8  }
  0x57   : > { %181 = dma.hbm_to_vmem [thread:$0]  (%p1938_p5), %s2900_s11, %s2889_s29, %s2902_s8, %s2892_s6, %s2766_s9, %s2766_s9, %s2767_s10  }
  0x58 PF: > { %187 = sbr.rel (%p2852_p13) target bundleno = 1423 (0x58f), region = 32  ;;  %s2931_s17 = sand.u32 (!%p2852_p13), 1, %s2749_s13  }
  0x59   : > { %s2482_s19 = smul.u32 (!%p2852_p13), 160, %s2931_s17  ;;  %s190_s20 = scalar_lea.sflag (!%p2852_p13), [#allocation4], %s2931_s17 }
  0x5a   : > { %p3182_p2 = scmp.ne.s32.totalorder (!%p2852_p13), %s3177_s23, 0 }
  0x5b   : > { %s2935_s27 = scalar_lea.vmem (!%p2852_p13), [#allocation3], %s2482_s19 }
  0x5d   : > { %2732 = dma.done.wait (%p3182_p2), %s190_s20, 2560  }
  0x5e   : > { %2734 = vsyncadd (%p3182_p2), %s190_s20, 4294964736  ;;  %p3183_p5 = scmp.eq.s32.totalorder %s2813_s16, 0 }
  0x60   : > { %2736 = dma.done.wait (%p3183_p5), [#allocation7], 6240   ;;  %p3184_p13 = pmov %p3183_p5 }
  0x61   : > { %v2768_v0 = vmov 0   ;;  %v2553_v1 = vld [vmem:[#allocation6 + $0x38] sm:$0xff]   ;;  %v2554_v2 = vld [vmem:[#allocation6 + $0x30] sm:$0xff]   ;;  %v2555_v3 = vld [vmem:[#allocation6 + $0x28] sm:$0xff]   ;;  %vm355_vm0 = vcmask 814080   ;;  %s2483_s23 = smul.u32 80, %s2931_s17 }
  0x62   : > { %2738 = vsyncadd (%p3184_p13), [#allocation7], 4294961056  ;;  %235 = vst [vmem:[#allocation2] sm:$0xf] %v2768_v0  ;;  %2265 = vmatprep.subr.bf16.mxu0 %v2553_v1  ;;  %v2556_v4 = vld [vmem:[#allocation6 + $0x20] sm:$0xff]   ;;  %v256_v6 = vld [vmem:[%s2935_s27 + $0x8] sm:$0xff] }
  0x63   : > { %236 = vst [vmem:[#allocation2 + $0x4] sm:$0xf] %v2768_v0  ;;  %237 = vst [vmem:[#allocation2 + $0x8] sm:$0xf] %v2768_v0  ;;  %2266 = vmatpush3.bf16.msra.mxu0 %v2553_v1  ;;  %v255_v5 = vld [vmem:[%s2935_s27] sm:$0xff]  ;;  %v257_v7 = vld [vmem:[%s2935_s27 + $0x10] sm:$0xff]  ;;  %v2058_v9 = vpack.c.bf16 %v256_v6, %v256_v6 }
  0x64   : > { %238 = vst [vmem:[#allocation2 + $0xc] sm:$0xf] %v2768_v0  ;;  %239 = vst [vmem:[#allocation2 + $0x10] sm:$0xf] %v2768_v0  ;;  %2267 = vmatprep.subr.bf16.mxu0 %v2554_v2  ;;  %v2057_v8 = vpack.c.bf16 %v255_v5, %v255_v5  ;;  %v258_v10 = vld [vmem:[%s2935_s27 + $0x18] sm:$0xff]  ;;  %v2059_v11 = vpack.c.bf16 %v257_v7, %v257_v7  ;;  %v259_v12 = vld [vmem:[%s2935_s27 + $0x20] sm:$0xff] }
  0x65   : > { %240 = vst [vmem:[#allocation2 + $0x14] sm:$0xf] %v2768_v0  ;;  %241 = vst [vmem:[#allocation2 + $0x18] sm:$0xf] %v2768_v0  ;;  %v260_v13 = vld [vmem:[%s2935_s27 + $0x28] sm:$0xff]  ;;  %v2557_v14 = vld [vmem:[#allocation6 + $0x18] sm:$0xff]   ;;  %v2060_v15 = vpack.c.bf16 %v258_v10, %v258_v10  ;;  %v2061_v16 = vpack.c.bf16 %v259_v12, %v259_v12 }
  0x66   : > { %242 = vst [vmem:[#allocation2 + $0x1c] sm:$0xf] %v2768_v0  ;;  %243 = vst [vmem:[#allocation2 + $0x20] sm:$0xf] %v2768_v0  ;;  %v2062_v17 = vpack.c.bf16 %v260_v13, %v260_v13  ;;  %v261_v18 = vld [vmem:[%s2935_s27 + $0x30] sm:$0xff]  ;;  %v262_v19 = vld [vmem:[%s2935_s27 + $0x38] sm:$0xff] }
  0x67   : > { %244 = vst [vmem:[#allocation2 + $0x24] sm:$0xf] %v2768_v0  ;;  %245 = vst [vmem:[#allocation2 + $0x28] sm:$0xf] %v2768_v0  ;;  %2268 = vmatpush3.bf16.msra.mxu0 %v2554_v2  ;;  %v263_v20 = vld [vmem:[%s2935_s27 + $0x40] sm:$0xff]  ;;  %v2063_v21 = vpack.c.bf16 %v261_v18, %v261_v18  ;;  %v2064_v22 = vpack.c.bf16 %v262_v19, %v262_v19  ;;  %v264_v23 = vld [vmem:[%s2935_s27 + $0x48] sm:$0xff] }
  0x68   : > { %246 = vst [vmem:[#allocation2 + $0x2c] sm:$0xf] %v2768_v0  ;;  %247 = vst [vmem:[#allocation2 + $0x30] sm:$0xf] %v2768_v0  ;;  %2269 = vmatprep.subr.bf16.mxu0 %v2555_v3  ;;  %v2065_v24 = vpack.c.bf16 %v263_v20, %v263_v20  ;;  %v265_v25 = vld [vmem:[%s2935_s27 + $0x50] sm:$0xff]  ;;  %v266_v26 = vld [vmem:[%s2935_s27 + $0x58] sm:$0xff]  ;;  %v2066_v27 = vpack.c.bf16 %v264_v23, %v264_v23 }
  0x69   : > { %248 = vst [vmem:[#allocation2 + $0x34] sm:$0xf] %v2768_v0  ;;  %249 = vst [vmem:[#allocation2 + $0x38] sm:$0xf] %v2768_v0  ;;  %v2067_v28 = vpack.c.bf16 %v265_v25, %v265_v25  ;;  %v2068_v29 = vpack.c.bf16 %v266_v26, %v266_v26  ;;  %v267_v30 = vld [vmem:[%s2935_s27 + $0x60] sm:$0xff]  ;;  %v268_v31 = vld [vmem:[%s2935_s27 + $0x68] sm:$0xff] }
  0x6a   : > { %250 = vst [vmem:[#allocation2 + $0x3c] sm:$0xf] %v2768_v0  ;;  %251 = vst [vmem:[#allocation2 + $0x40] sm:$0xf] %v2768_v0  ;;  %v269_v32 = vld [vmem:[%s2935_s27 + $0x70] sm:$0xff]  ;;  %v2069_v33 = vpack.c.bf16 %v267_v30, %v267_v30  ;;  %v2070_v34 = vpack.c.bf16 %v268_v31, %v268_v31  ;;  %v270_v35 = vld [vmem:[%s2935_s27 + $0x78] sm:$0xff] }
  0x6b   : > { %252 = vst [vmem:[#allocation2 + $0x44] sm:$0xf] %v2768_v0  ;;  %253 = vst [vmem:[#allocation2 + $0x48] sm:$0xf] %v2768_v0  ;;  %2270 = vmatpush3.bf16.msra.mxu0 %v2555_v3  ;;  %v2071_v36 = vpack.c.bf16 %v269_v32, %v269_v32  ;;  %v271_v37 = vld [vmem:[%s2935_s27 + $0x80] sm:$0xff]  ;;  %v272_v38 = vld [vmem:[%s2935_s27 + $0x88] sm:$0xff]  ;;  %v2072_v40 = vpack.c.bf16 %v270_v35, %v270_v35 }
  0x6c   : > { %254 = vst [vmem:[#allocation2 + $0x4c] sm:$0xf] %v2768_v0  ;;  %356 = vst.msk [vmem:[#allocation2] sm:$0xf] %vm355_vm0, %v2057_v8  ;;  %2271 = vmatprep.subr.bf16.mxu0 %v2556_v4  ;;  %v2558_v39 = vld [vmem:[#allocation6 + $0x10] sm:$0xff]   ;;  %v2073_v41 = vpack.c.bf16 %v271_v37, %v271_v37  ;;  %v2074_v42 = vpack.c.bf16 %v272_v38, %v272_v38  ;;  %v274_v44 = vld [vmem:[%s2935_s27 + $0x98] sm:$0xff] }
  0x6d   : > { %357 = vst.msk [vmem:[#allocation2 + $0x4] sm:$0xf] %vm355_vm0, %v2058_v9  ;;  %358 = vst.msk [vmem:[#allocation2 + $0x8] sm:$0xf] %vm355_vm0, %v2059_v11  ;;  %v273_v43 = vld [vmem:[%s2935_s27 + $0x90] sm:$0xff]  ;;  %v2076_v46 = vpack.c.bf16 %v274_v44, %v274_v44  ;;  %v2571_v47 = vld [vmem:[#allocation6 + $0x78] sm:$0xff]  }
  0x6e   : > { %359 = vst.msk [vmem:[#allocation2 + $0xc] sm:$0xf] %vm355_vm0, %v2060_v15  ;;  %360 = vst.msk [vmem:[#allocation2 + $0x10] sm:$0xf] %vm355_vm0, %v2061_v16  ;;  %v2075_v45 = vpack.c.bf16 %v273_v43, %v273_v43  ;;  %v2572_v48 = vld [vmem:[#allocation6 + $0x70] sm:$0xff]   ;;  %2301 = vmatprep.subr.bf16.mxu1 %v2571_v47  ;;  %v2573_v50 = vld [vmem:[#allocation6 + $0x68] sm:$0xff]  }
  0x6f   : > { %361 = vst.msk [vmem:[#allocation2 + $0x14] sm:$0xf] %vm355_vm0, %v2062_v17  ;;  %362 = vst.msk [vmem:[#allocation2 + $0x18] sm:$0xf] %vm355_vm0, %v2063_v21  ;;  %2272 = vmatpush3.bf16.msra.mxu0 %v2556_v4  ;;  %2302 = vmatpush3.bf16.msra.mxu1 %v2571_v47  ;;  %v2559_v51 = vld [vmem:[#allocation6 + $0x8] sm:$0xff]   ;;  %v2560_v52 = vld [vmem:[#allocation6] sm:$0xff]  }
  0x70   : > { %363 = vst.msk [vmem:[#allocation2 + $0x1c] sm:$0xf] %vm355_vm0, %v2064_v22  ;;  %364 = vst.msk [vmem:[#allocation2 + $0x20] sm:$0xf] %vm355_vm0, %v2065_v24  ;;  %2273 = vmatprep.subr.bf16.mxu0 %v2557_v14  ;;  %2303 = vmatprep.subr.bf16.mxu1 %v2572_v48  ;;  %v2574_v54 = vld [vmem:[#allocation6 + $0x60] sm:$0xff]   ;;  %v2575_v56 = vld [vmem:[#allocation6 + $0x58] sm:$0xff]  }
  0x71   : > { %365 = vst.msk [vmem:[#allocation2 + $0x24] sm:$0xf] %vm355_vm0, %v2066_v27  ;;  %366 = vst.msk [vmem:[#allocation2 + $0x28] sm:$0xf] %vm355_vm0, %v2067_v28  ;;  %v2576_v0 = vld [vmem:[#allocation6 + $0x50] sm:$0xff]   ;;  %v2577_v1 = vld [vmem:[#allocation6 + $0x48] sm:$0xff]  }
  0x72   : > { %367 = vst.msk [vmem:[#allocation2 + $0x2c] sm:$0xf] %vm355_vm0, %v2068_v29  ;;  %368 = vst.msk [vmem:[#allocation2 + $0x30] sm:$0xf] %vm355_vm0, %v2069_v33  ;;  %v2578_v2 = vld [vmem:[#allocation6 + $0x40] sm:$0xff]   ;;  %v2579_v3 = vld [vmem:[#allocation6 + $0xb8] sm:$0xff]  }
  0x73   : > { %369 = vst.msk [vmem:[#allocation2 + $0x34] sm:$0xf] %vm355_vm0, %v2070_v34  ;;  %370 = vst.msk [vmem:[#allocation2 + $0x38] sm:$0xf] %vm355_vm0, %v2071_v36  ;;  %2274 = vmatpush3.bf16.msra.mxu0 %v2557_v14  ;;  %2304 = vmatpush3.bf16.msra.mxu1 %v2572_v48  ;;  %v2580_v4 = vld [vmem:[#allocation6 + $0xb0] sm:$0xff]   ;;  %v2581_v5 = vld [vmem:[#allocation6 + $0xa8] sm:$0xff]  }
  0x74   : > { %371 = vst.msk [vmem:[#allocation2 + $0x3c] sm:$0xf] %vm355_vm0, %v2072_v40  ;;  %372 = vst.msk [vmem:[#allocation2 + $0x40] sm:$0xf] %vm355_vm0, %v2073_v41  ;;  %v2561_v49 = vld [vmem:[#allocation2] sm:$0xff]   ;;  %2275 = vmatprep.subr.bf16.mxu0 %v2558_v39  ;;  %2305 = vmatprep.subr.bf16.mxu1 %v2573_v50  ;;  %v2582_v6 = vld [vmem:[#allocation6 + $0xa0] sm:$0xff]  }
  0x75   : > { %373 = vst.msk [vmem:[#allocation2 + $0x44] sm:$0xf] %vm355_vm0, %v2074_v42  ;;  %374 = vst.msk [vmem:[#allocation2 + $0x48] sm:$0xf] %vm355_vm0, %v2075_v45  ;;  %2281 = vmatprep.mubr.bf16.mxu0 %v2561_v49  ;;  %v2562_v53 = vld [vmem:[#allocation2 + $0x8] sm:$0xff]   ;;  %v2584_v8 = vld [vmem:[#allocation6 + $0x90] sm:$0xff]  }
  0x76   : > { %375 = vst.msk [vmem:[#allocation2 + $0x4c] sm:$0xf] %vm355_vm0, %v2076_v46  ;;  %v2563_v55 = vld [vmem:[#allocation2 + $0x10] sm:$0xff]   ;;  %v2583_v7 = vld [vmem:[#allocation6 + $0x98] sm:$0xff]   ;;  %s3096_s26 = scalar_lea.vmem [#allocation9], %s2483_s23  ;;  %s1821_s29 = scalar_lea.sflag [#allocation5], %s2931_s17 }
  0x77   : > { %2276 = vmatpush3.bf16.msra.mxu0 %v2558_v39  ;;  %2306 = vmatpush3.bf16.msra.mxu1 %v2573_v50  ;;  %v2564_v57 = vld [vmem:[#allocation2 + $0x18] sm:$0xff]   ;;  %v2985_v11 = vld [vmem:[#allocation8] ss:$0 sm:$0xff]  ;;  %p3185_p10 = scmp.ne.s32.totalorder %s3178_s24, 0 }
  0x78   : > { %2277 = vmatprep.subr.bf16.mxu0 %v2559_v51  ;;  %2307 = vmatprep.subr.bf16.mxu1 %v2574_v54  ;;  %v2565_v58 = vld [vmem:[#allocation2 + $0x20] sm:$0xff]   ;;  %s1828_s6 = smul.u32 (%p3185_p10), 20, %s2813_s16 }
  0x79   : > { %v2566_v59 = vld [vmem:[#allocation2 + $0x28] sm:$0xff]  }
  0x7a   : > { %v2567_v60 = vld [vmem:[#allocation2 + $0x30] sm:$0xff]   ;;  %s1829_s8 = ssub.s32 (%p3185_p10), 38, %s1828_s6 }
  0x7b   : > { %2278 = vmatpush3.bf16.msra.mxu0 %v2559_v51  ;;  %2308 = vmatpush3.bf16.msra.mxu1 %v2574_v54  ;;  %v2568_v61 = vld [vmem:[#allocation2 + $0x38] sm:$0xff]   ;;  %p1830_p1 = scmp.lt.s32.totalorder (%p3185_p10), %s1829_s8, 20 }
  0x7c   : > { %2279 = vmatprep.subr.bf16.mxu0 %v2560_v52  ;;  %2309 = vmatprep.subr.bf16.mxu1 %v2575_v56  ;;  %v2569_v62 = vld [vmem:[#allocation2 + $0x40] sm:$0xff]  }
  0x7d   : > { %v2570_v63 = vld [vmem:[#allocation2 + $0x48] sm:$0xff]  }
  0x7f   : > { %2280 = vmatpush3.bf16.msra.mxu0 %v2560_v52  ;;  %2310 = vmatpush3.bf16.msra.mxu1 %v2575_v56 }
  0x80   : > { %2311 = vmatprep.subr.bf16.mxu1 %v2576_v0  ;;  %2337 = vmatprep.subr.bf16.mxu0 %v2579_v3 }
  0x82   : > { %2282 = vmatmul.mubr.bf16.vlgmr.msra.gmra.mxu0 %v2562_v53 }
  0x83   : > { %2285 = vmatprep.mubr.bf16.mxu0 %v2563_v55  ;;  %2312 = vmatpush3.bf16.msra.mxu1 %v2576_v0 }
  0x84   : > { %2313 = vmatprep.subr.bf16.mxu1 %v2577_v1  ;;  %2338 = vmatpush3.bf16.msra.mxu0 %v2579_v3 }
  0x85   : > { %2339 = vmatprep.subr.bf16.mxu0 %v2580_v4 }
  0x87   : > { %2314 = vmatpush3.bf16.msra.mxu1 %v2577_v1 }
  0x88   : > { %2315 = vmatprep.subr.bf16.mxu1 %v2578_v2  ;;  %2340 = vmatpush3.bf16.msra.mxu0 %v2580_v4 }
  0x89   : > { %2341 = vmatprep.subr.bf16.mxu0 %v2581_v5 }
  0x8a   : > { %2286 = vmatmul.mubr.bf16.gmra.mxu0 %v2564_v57 }
  0x8b   : > { %2289 = vmatprep.mubr.bf16.mxu0 %v2565_v58  ;;  %2316 = vmatpush3.bf16.msra.mxu1 %v2578_v2 }
  0x8c   : > { %2342 = vmatpush3.bf16.msra.mxu0 %v2581_v5 }
  0x8d   : > { %2343 = vmatprep.subr.bf16.mxu0 %v2582_v6 }
  0x90   : > { %2344 = vmatpush3.bf16.msra.mxu0 %v2582_v6 }
  0x91   : > { %2345 = vmatprep.subr.bf16.mxu0 %v2583_v7 }
  0x92   : > { %2290 = vmatmul.mubr.bf16.gmra.mxu0 %v2566_v59 }
  0x93   : > { %2293 = vmatprep.mubr.bf16.mxu0 %v2567_v60 }
  0x94   : > { %2346 = vmatpush3.bf16.msra.mxu0 %v2583_v7 }
  0x95   : > { %2347 = vmatprep.subr.bf16.mxu0 %v2584_v8 }
  0x98   : > { %2348 = vmatpush3.bf16.msra.mxu0 %v2584_v8 }
  0x9a   : > { %2294 = vmatmul.mubr.bf16.gmra.mxu0 %v2568_v61 }
  0x9b   : > { %2297 = vmatprep.mubr.bf16.mxu0 %v2569_v62 }
  0xa2   : > { %2298 = vmatmul.mubr.bf16.gmra.mxu0 %v2570_v63 }
 0x142   : > { %v2283_v9 = vpop.f32.mrf.mxu0 }
 0x143   : > { %v570_v15 = vadd.f32 %v2283_v9, %v2985_v11 }
 0x144   : > { %v561_v10 = vpop.f32.mrf.mxu0 }
 0x145   : > { %v562_v13 = vadd.f32 %v2985_v11, %v561_v10  ;;  %v642_v22 = vmax.f32 %v570_v15, 0.0 }
 0x146   : > { %v2284_v12 = vpop.f32.mrf.mxu0 }
 0x147   : > { %v573_v14 = vadd.f32 %v2284_v12, %v2985_v11  ;;  %v640_v20 = vmax.f32 %v562_v13, 0.0 }
 0x148   : > { %v564_v16 = vpop.f32.mrf.mxu0 }
 0x149   : > { %v565_v17 = vadd.f32 %v2985_v11, %v564_v16  ;;  %v643_v18 = vmax.f32 %v573_v14, 0.0 }
 0x14a   : > { %v2287_v19 = vpop.f32.mrf.mxu0 }
 0x14b   : > { %v641_v21 = vmax.f32 %v565_v17, 0.0  ;;  %v661_v25 = vpack.c.bf16 %v643_v18, %v642_v22  ;;  %v586_v29 = vadd.f32 %v2287_v19, %v2985_v11  ;;  %v2585_v17 = vld [vmem:[#allocation6 + $0x88] sm:$0xff]   ;;  %v2586_v18 = vld [vmem:[#allocation6 + $0x80] sm:$0xff]   ;;  %v2587_v19 = vld [vmem:[#allocation6 + $0xf8] sm:$0xff]  }
 0x14c   : > { %v577_v23 = vpop.f32.mrf.mxu0  ;;  %2349 = vmatprep.subr.bf16.mxu0 %v2585_v17  ;;  %2373 = vmatprep.subr.bf16.mxu1 %v2587_v19  ;;  %v2591_v22 = vld [vmem:[#allocation6 + $0xd8] sm:$0xff]  }
 0x14d   : > { %v660_v24 = vpack.c.bf16 %v641_v21, %v640_v20  ;;  %v578_v27 = vadd.f32 %v2985_v11, %v577_v23  ;;  %v646_v36 = vmax.f32 %v586_v29, 0.0  ;;  %2350 = vmatpush3.bf16.msra.mxu0 %v2585_v17  ;;  %v2588_v20 = vld [vmem:[#allocation6 + $0xf0] sm:$0xff]   ;;  %v2590_v21 = vld [vmem:[#allocation6 + $0xe0] sm:$0xff]  }
 0x14e   : > { %v2288_v26 = vpop.f32.mrf.mxu0  ;;  %2351 = vmatprep.subr.bf16.mxu0 %v2586_v18  ;;  %v2592_v23 = vld [vmem:[#allocation6 + $0xd0] sm:$0xff]  }
 0x14f   : > { %v589_v28 = vadd.f32 %v2288_v26, %v2985_v11  ;;  %2317 = vmatprep.mubr.bf16.mxu1 %v660_v24  ;;  %v644_v34 = vmax.f32 %v578_v27, 0.0  ;;  %v3007_v26 = vld [vmem:[#allocation8 + $0x1] ss:$0 sm:$0xff] }
 0x150   : > { %v580_v30 = vpop.f32.mrf.mxu0  ;;  %2318 = vmatmul.mubr.bf16.vlgmr.msra.gmra.mxu1 %v661_v25 }
 0x151   : > { %v581_v31 = vadd.f32 %v2985_v11, %v580_v30  ;;  %v647_v32 = vmax.f32 %v589_v28, 0.0  ;;  %2352 = vmatpush3.bf16.msra.mxu0 %v2586_v18  ;;  %2374 = vmatpush3.bf16.msra.mxu1 %v2587_v19 }
 0x152   : > { %v2291_v33 = vpop.f32.mrf.mxu0  ;;  %2375 = vmatprep.subr.bf16.mxu1 %v2588_v20 }
 0x153   : > { %v645_v35 = vmax.f32 %v581_v31, 0.0  ;;  %v663_v39 = vpack.c.bf16 %v647_v32, %v646_v36  ;;  %v602_v43 = vadd.f32 %v2291_v33, %v2985_v11 }
 0x154   : > { %v593_v37 = vpop.f32.mrf.mxu0 }
 0x155   : > { %v662_v38 = vpack.c.bf16 %v645_v35, %v644_v34  ;;  %v594_v41 = vadd.f32 %v2985_v11, %v593_v37  ;;  %v650_v50 = vmax.f32 %v602_v43, 0.0  ;;  %2376 = vmatpush3.bf16.msra.mxu1 %v2588_v20 }
 0x156   : > { %v2292_v40 = vpop.f32.mrf.mxu0 }
 0x157   : > { %v605_v42 = vadd.f32 %v2292_v40, %v2985_v11  ;;  %2321 = vmatprep.mubr.bf16.mxu1 %v662_v38  ;;  %v648_v48 = vmax.f32 %v594_v41, 0.0 }
 0x158   : > { %v596_v44 = vpop.f32.mrf.mxu0  ;;  %2322 = vmatmul.mubr.bf16.gmra.mxu1 %v663_v39 }
 0x159   : > { %v597_v45 = vadd.f32 %v2985_v11, %v596_v44  ;;  %v651_v46 = vmax.f32 %v605_v42, 0.0 }
 0x15a   : > { %v2295_v47 = vpop.f32.mrf.mxu0 }
 0x15b   : > { %v649_v49 = vmax.f32 %v597_v45, 0.0  ;;  %v665_v53 = vpack.c.bf16 %v651_v46, %v650_v50  ;;  %v618_v57 = vadd.f32 %v2295_v47, %v2985_v11 }
 0x15c   : > { %v609_v51 = vpop.f32.mrf.mxu0 }
 0x15d   : > { %v664_v52 = vpack.c.bf16 %v649_v49, %v648_v48  ;;  %v610_v55 = vadd.f32 %v2985_v11, %v609_v51  ;;  %v654_v0 = vmax.f32 %v618_v57, 0.0 }
 0x15e   : > { %v2296_v54 = vpop.f32.mrf.mxu0 }
 0x15f   : > { %v621_v56 = vadd.f32 %v2296_v54, %v2985_v11  ;;  %2325 = vmatprep.mubr.bf16.mxu1 %v664_v52  ;;  %v652_v62 = vmax.f32 %v610_v55, 0.0 }
 0x160   : > { %v612_v58 = vpop.f32.mrf.mxu0  ;;  %2326 = vmatmul.mubr.bf16.gmra.mxu1 %v665_v53 }
 0x161   : > { %v613_v59 = vadd.f32 %v2985_v11, %v612_v58  ;;  %v655_v60 = vmax.f32 %v621_v56, 0.0 }
 0x162   : > { %v2299_v61 = vpop.f32.mrf.mxu0 }
 0x163   : > { %v653_v63 = vmax.f32 %v613_v59, 0.0  ;;  %v667_v3 = vpack.c.bf16 %v655_v60, %v654_v0  ;;  %v634_v7 = vadd.f32 %v2299_v61, %v2985_v11 }
 0x164   : > { %v625_v1 = vpop.f32.mrf.mxu0 }
 0x165   : > { %v666_v2 = vpack.c.bf16 %v653_v63, %v652_v62  ;;  %v626_v5 = vadd.f32 %v2985_v11, %v625_v1  ;;  %v658_v14 = vmax.f32 %v634_v7, 0.0 }
 0x166   : > { %v2300_v4 = vpop.f32.mrf.mxu0 }
 0x167   : > { %v637_v6 = vadd.f32 %v2300_v4, %v2985_v11  ;;  %2329 = vmatprep.mubr.bf16.mxu1 %v666_v2  ;;  %v656_v12 = vmax.f32 %v626_v5, 0.0 }
 0x168   : > { %v628_v8 = vpop.f32.mrf.mxu0  ;;  %2330 = vmatmul.mubr.bf16.gmra.mxu1 %v667_v3 }
 0x169   : > { %v629_v9 = vadd.f32 %v2985_v11, %v628_v8  ;;  %v659_v10 = vmax.f32 %v637_v6, 0.0  ;;  %v2589_v11 = vld [vmem:[#allocation6 + $0xe8] sm:$0xff]  }
 0x16a   : > { %2377 = vmatprep.subr.bf16.mxu1 %v2589_v11 }
 0x16b   : > { %v657_v13 = vmax.f32 %v629_v9, 0.0  ;;  %v669_v16 = vpack.c.bf16 %v659_v10, %v658_v14  ;;  %2378 = vmatpush3.bf16.msra.mxu1 %v2589_v11 }
 0x16c   : > { %2379 = vmatprep.subr.bf16.mxu1 %v2590_v21 }
 0x16d   : > { %v668_v15 = vpack.c.bf16 %v657_v13, %v656_v12 }
 0x16f   : > { %2333 = vmatprep.mubr.bf16.mxu1 %v668_v15  ;;  %2380 = vmatpush3.bf16.msra.mxu1 %v2590_v21 }
 0x170   : > { %2334 = vmatmul.mubr.bf16.gmra.mxu1 %v669_v16  ;;  %2381 = vmatprep.subr.bf16.mxu1 %v2591_v22 }
 0x173   : > { %2382 = vmatpush3.bf16.msra.mxu1 %v2591_v22 }
 0x174   : > { %2383 = vmatprep.subr.bf16.mxu1 %v2592_v23 }
 0x177   : > { %2384 = vmatpush3.bf16.msra.mxu1 %v2592_v23 }
 0x210   : > { %v2319_v24 = vpop.f32.mrf.mxu1 }
 0x211   : > { %v786_v30 = vadd.f32 %v2319_v24, %v3007_v26 }
 0x212   : > { %v777_v25 = vpop.f32.mrf.mxu1 }
 0x213   : > { %v778_v28 = vadd.f32 %v3007_v26, %v777_v25  ;;  %v858_v37 = vmax.f32 %v786_v30, 0.0 }
 0x214   : > { %v2320_v27 = vpop.f32.mrf.mxu1 }
 0x215   : > { %v789_v29 = vadd.f32 %v2320_v27, %v3007_v26  ;;  %v856_v35 = vmax.f32 %v778_v28, 0.0 }
 0x216   : > { %v780_v31 = vpop.f32.mrf.mxu1 }
 0x217   : > { %v781_v32 = vadd.f32 %v3007_v26, %v780_v31  ;;  %v859_v33 = vmax.f32 %v789_v29, 0.0 }
 0x218   : > { %v2323_v34 = vpop.f32.mrf.mxu1 }
 0x219   : > { %v857_v36 = vmax.f32 %v781_v32, 0.0  ;;  %v877_v40 = vpack.c.bf16 %v859_v33, %v858_v37  ;;  %v802_v44 = vadd.f32 %v2323_v34, %v3007_v26  ;;  %v2593_v32 = vld [vmem:[#allocation6 + $0xc8] sm:$0xff]   ;;  %v2594_v33 = vld [vmem:[#allocation6 + $0xc0] sm:$0xff]   ;;  %v2595_v34 = vld [vmem:[#allocation6 + $0x138] sm:$0xff]  }
 0x21a   : > { %v793_v38 = vpop.f32.mrf.mxu1  ;;  %2385 = vmatprep.subr.bf16.mxu1 %v2593_v32  ;;  %2409 = vmatprep.subr.bf16.mxu0 %v2595_v34  ;;  %v2599_v37 = vld [vmem:[#allocation6 + $0x118] sm:$0xff]  }
 0x21b   : > { %v876_v39 = vpack.c.bf16 %v857_v36, %v856_v35  ;;  %v794_v42 = vadd.f32 %v3007_v26, %v793_v38  ;;  %v862_v51 = vmax.f32 %v802_v44, 0.0  ;;  %2386 = vmatpush3.bf16.msra.mxu1 %v2593_v32  ;;  %v2596_v35 = vld [vmem:[#allocation6 + $0x130] sm:$0xff]   ;;  %v2598_v36 = vld [vmem:[#allocation6 + $0x120] sm:$0xff]  }
 0x21c   : > { %v2324_v41 = vpop.f32.mrf.mxu1  ;;  %2387 = vmatprep.subr.bf16.mxu1 %v2594_v33  ;;  %v2600_v38 = vld [vmem:[#allocation6 + $0x110] sm:$0xff]  }
 0x21d   : > { %v805_v43 = vadd.f32 %v2324_v41, %v3007_v26  ;;  %2353 = vmatprep.mubr.bf16.mxu0 %v876_v39  ;;  %v860_v49 = vmax.f32 %v794_v42, 0.0  ;;  %v3029_v41 = vld [vmem:[#allocation8 + $0x2] ss:$0 sm:$0xff] }
 0x21e   : > { %v796_v45 = vpop.f32.mrf.mxu1  ;;  %2354 = vmatmul.mubr.bf16.vlgmr.msra.gmra.mxu0 %v877_v40 }
 0x21f   : > { %v797_v46 = vadd.f32 %v3007_v26, %v796_v45  ;;  %v863_v47 = vmax.f32 %v805_v43, 0.0  ;;  %2388 = vmatpush3.bf16.msra.mxu1 %v2594_v33  ;;  %2410 = vmatpush3.bf16.msra.mxu0 %v2595_v34 }
 0x220   : > { %v2327_v48 = vpop.f32.mrf.mxu1  ;;  %2411 = vmatprep.subr.bf16.mxu0 %v2596_v35 }
 0x221   : > { %v861_v50 = vmax.f32 %v797_v46, 0.0  ;;  %v879_v54 = vpack.c.bf16 %v863_v47, %v862_v51  ;;  %v818_v58 = vadd.f32 %v2327_v48, %v3007_v26 }
 0x222   : > { %v809_v52 = vpop.f32.mrf.mxu1 }
 0x223   : > { %v878_v53 = vpack.c.bf16 %v861_v50, %v860_v49  ;;  %v810_v56 = vadd.f32 %v3007_v26, %v809_v52  ;;  %v866_v1 = vmax.f32 %v818_v58, 0.0  ;;  %2412 = vmatpush3.bf16.msra.mxu0 %v2596_v35 }
 0x224   : > { %v2328_v55 = vpop.f32.mrf.mxu1 }
 0x225   : > { %v821_v57 = vadd.f32 %v2328_v55, %v3007_v26  ;;  %2357 = vmatprep.mubr.bf16.mxu0 %v878_v53  ;;  %v864_v63 = vmax.f32 %v810_v56, 0.0 }
 0x226   : > { %v812_v59 = vpop.f32.mrf.mxu1  ;;  %2358 = vmatmul.mubr.bf16.gmra.mxu0 %v879_v54 }
 0x227   : > { %v813_v60 = vadd.f32 %v3007_v26, %v812_v59  ;;  %v867_v61 = vmax.f32 %v821_v57, 0.0 }
 0x228   : > { %v2331_v62 = vpop.f32.mrf.mxu1 }
 0x229   : > { %v865_v0 = vmax.f32 %v813_v60, 0.0  ;;  %v881_v4 = vpack.c.bf16 %v867_v61, %v866_v1  ;;  %v834_v8 = vadd.f32 %v2331_v62, %v3007_v26 }
 0x22a   : > { %v825_v2 = vpop.f32.mrf.mxu1 }
 0x22b   : > { %v880_v3 = vpack.c.bf16 %v865_v0, %v864_v63  ;;  %v826_v6 = vadd.f32 %v3007_v26, %v825_v2  ;;  %v870_v16 = vmax.f32 %v834_v8, 0.0 }
 0x22c   : > { %v2332_v5 = vpop.f32.mrf.mxu1 }
 0x22d   : > { %v837_v7 = vadd.f32 %v2332_v5, %v3007_v26  ;;  %2361 = vmatprep.mubr.bf16.mxu0 %v880_v3  ;;  %v868_v14 = vmax.f32 %v826_v6, 0.0 }
 0x22e   : > { %v828_v9 = vpop.f32.mrf.mxu1  ;;  %2362 = vmatmul.mubr.bf16.gmra.mxu0 %v881_v4 }
 0x22f   : > { %v829_v10 = vadd.f32 %v3007_v26, %v828_v9  ;;  %v871_v12 = vmax.f32 %v837_v7, 0.0 }
 0x230   : > { %v2335_v13 = vpop.f32.mrf.mxu1 }
 0x231   : > { %v869_v15 = vmax.f32 %v829_v10, 0.0  ;;  %v883_v19 = vpack.c.bf16 %v871_v12, %v870_v16  ;;  %v850_v22 = vadd.f32 %v2335_v13, %v3007_v26 }
 0x232   : > { %v841_v17 = vpop.f32.mrf.mxu1 }
 0x233   : > { %v882_v18 = vpack.c.bf16 %v869_v15, %v868_v14  ;;  %v842_v11 = vadd.f32 %v3007_v26, %v841_v17  ;;  %v874_v29 = vmax.f32 %v850_v22, 0.0 }
 0x234   : > { %v2336_v20 = vpop.f32.mrf.mxu1 }
 0x235   : > { %v853_v21 = vadd.f32 %v2336_v20, %v3007_v26  ;;  %2365 = vmatprep.mubr.bf16.mxu0 %v882_v18  ;;  %v872_v27 = vmax.f32 %v842_v11, 0.0 }
 0x236   : > { %v844_v23 = vpop.f32.mrf.mxu1  ;;  %2366 = vmatmul.mubr.bf16.gmra.mxu0 %v883_v19 }
 0x237   : > { %v845_v24 = vadd.f32 %v3007_v26, %v844_v23  ;;  %v875_v25 = vmax.f32 %v853_v21, 0.0  ;;  %v2597_v26 = vld [vmem:[#allocation6 + $0x128] sm:$0xff]  }
 0x238   : > { %2413 = vmatprep.subr.bf16.mxu0 %v2597_v26 }
 0x239   : > { %v873_v28 = vmax.f32 %v845_v24, 0.0  ;;  %v885_v31 = vpack.c.bf16 %v875_v25, %v874_v29  ;;  %2414 = vmatpush3.bf16.msra.mxu0 %v2597_v26 }
 0x23a   : > { %2415 = vmatprep.subr.bf16.mxu0 %v2598_v36 }
 0x23b   : > { %v884_v30 = vpack.c.bf16 %v873_v28, %v872_v27 }
 0x23d   : > { %2369 = vmatprep.mubr.bf16.mxu0 %v884_v30  ;;  %2416 = vmatpush3.bf16.msra.mxu0 %v2598_v36 }
 0x23e   : > { %2370 = vmatmul.mubr.bf16.gmra.mxu0 %v885_v31  ;;  %2417 = vmatprep.subr.bf16.mxu0 %v2599_v37 }
 0x241   : > { %2418 = vmatpush3.bf16.msra.mxu0 %v2599_v37 }
 0x242   : > { %2419 = vmatprep.subr.bf16.mxu0 %v2600_v38 }
 0x245   : > { %2420 = vmatpush3.bf16.msra.mxu0 %v2600_v38 }
 0x2de   : > { %v2355_v39 = vpop.f32.mrf.mxu0 }
 0x2df   : > { %v1002_v45 = vadd.f32 %v2355_v39, %v3029_v41 }
 0x2e0   : > { %v993_v40 = vpop.f32.mrf.mxu0 }
 0x2e1   : > { %v994_v43 = vadd.f32 %v3029_v41, %v993_v40  ;;  %v1074_v52 = vmax.f32 %v1002_v45, 0.0 }
 0x2e2   : > { %v2356_v42 = vpop.f32.mrf.mxu0 }
 0x2e3   : > { %v1005_v44 = vadd.f32 %v2356_v42, %v3029_v41  ;;  %v1072_v50 = vmax.f32 %v994_v43, 0.0 }
 0x2e4   : > { %v996_v46 = vpop.f32.mrf.mxu0 }
 0x2e5   : > { %v997_v47 = vadd.f32 %v3029_v41, %v996_v46  ;;  %v1075_v48 = vmax.f32 %v1005_v44, 0.0 }
 0x2e6   : > { %v2359_v49 = vpop.f32.mrf.mxu0 }
 0x2e7   : > { %v1073_v51 = vmax.f32 %v997_v47, 0.0  ;;  %v1093_v55 = vpack.c.bf16 %v1075_v48, %v1074_v52  ;;  %v1018_v59 = vadd.f32 %v2359_v49, %v3029_v41  ;;  %v2601_v47 = vld [vmem:[#allocation6 + $0x108] sm:$0xff]   ;;  %v2602_v48 = vld [vmem:[#allocation6 + $0x100] sm:$0xff]   ;;  %v2603_v49 = vld [vmem:[#allocation6 + $0x178] sm:$0xff]  }
 0x2e8   : > { %v1009_v53 = vpop.f32.mrf.mxu0  ;;  %2421 = vmatprep.subr.bf16.mxu0 %v2601_v47  ;;  %2445 = vmatprep.subr.bf16.mxu1 %v2603_v49  ;;  %v2607_v52 = vld [vmem:[#allocation6 + $0x158] sm:$0xff]  }
 0x2e9   : > { %v1092_v54 = vpack.c.bf16 %v1073_v51, %v1072_v50  ;;  %v1010_v57 = vadd.f32 %v3029_v41, %v1009_v53  ;;  %v1078_v2 = vmax.f32 %v1018_v59, 0.0  ;;  %2422 = vmatpush3.bf16.msra.mxu0 %v2601_v47  ;;  %v2604_v50 = vld [vmem:[#allocation6 + $0x170] sm:$0xff]   ;;  %v2606_v51 = vld [vmem:[#allocation6 + $0x160] sm:$0xff]  }
 0x2ea   : > { %v2360_v56 = vpop.f32.mrf.mxu0  ;;  %2423 = vmatprep.subr.bf16.mxu0 %v2602_v48  ;;  %v2608_v53 = vld [vmem:[#allocation6 + $0x150] sm:$0xff]  }
 0x2eb   : > { %v1021_v58 = vadd.f32 %v2360_v56, %v3029_v41  ;;  %2389 = vmatprep.mubr.bf16.mxu1 %v1092_v54  ;;  %v1076_v0 = vmax.f32 %v1010_v57, 0.0  ;;  %v3051_v56 = vld [vmem:[#allocation8 + $0x3] ss:$0 sm:$0xff] }
 0x2ec   : > { %v1012_v60 = vpop.f32.mrf.mxu0  ;;  %2390 = vmatmul.mubr.bf16.vlgmr.msra.gmra.mxu1 %v1093_v55 }
 0x2ed   : > { %v1013_v61 = vadd.f32 %v3029_v41, %v1012_v60  ;;  %v1079_v62 = vmax.f32 %v1021_v58, 0.0  ;;  %2424 = vmatpush3.bf16.msra.mxu0 %v2602_v48  ;;  %2446 = vmatpush3.bf16.msra.mxu1 %v2603_v49 }
 0x2ee   : > { %v2363_v63 = vpop.f32.mrf.mxu0  ;;  %2447 = vmatprep.subr.bf16.mxu1 %v2604_v50 }
 0x2ef   : > { %v1077_v1 = vmax.f32 %v1013_v61, 0.0  ;;  %v1095_v5 = vpack.c.bf16 %v1079_v62, %v1078_v2  ;;  %v1034_v9 = vadd.f32 %v2363_v63, %v3029_v41 }
 0x2f0   : > { %v1025_v3 = vpop.f32.mrf.mxu0 }
 0x2f1   : > { %v1094_v4 = vpack.c.bf16 %v1077_v1, %v1076_v0  ;;  %v1026_v7 = vadd.f32 %v3029_v41, %v1025_v3  ;;  %v1082_v17 = vmax.f32 %v1034_v9, 0.0  ;;  %2448 = vmatpush3.bf16.msra.mxu1 %v2604_v50 }
 0x2f2   : > { %v2364_v6 = vpop.f32.mrf.mxu0 }
 0x2f3   : > { %v1037_v8 = vadd.f32 %v2364_v6, %v3029_v41  ;;  %2393 = vmatprep.mubr.bf16.mxu1 %v1094_v4  ;;  %v1080_v15 = vmax.f32 %v1026_v7, 0.0 }
 0x2f4   : > { %v1028_v10 = vpop.f32.mrf.mxu0  ;;  %2394 = vmatmul.mubr.bf16.gmra.mxu1 %v1095_v5 }
 0x2f5   : > { %v1029_v12 = vadd.f32 %v3029_v41, %v1028_v10  ;;  %v1083_v13 = vmax.f32 %v1037_v8, 0.0 }
 0x2f6   : > { %v2367_v14 = vpop.f32.mrf.mxu0 }
 0x2f7   : > { %v1081_v16 = vmax.f32 %v1029_v12, 0.0  ;;  %v1097_v20 = vpack.c.bf16 %v1083_v13, %v1082_v17  ;;  %v1050_v23 = vadd.f32 %v2367_v14, %v3029_v41 }
 0x2f8   : > { %v1041_v18 = vpop.f32.mrf.mxu0 }
 0x2f9   : > { %v1096_v19 = vpack.c.bf16 %v1081_v16, %v1080_v15  ;;  %v1042_v21 = vadd.f32 %v3029_v41, %v1041_v18  ;;  %v1086_v31 = vmax.f32 %v1050_v23, 0.0 }
 0x2fa   : > { %v2368_v11 = vpop.f32.mrf.mxu0 }
 0x2fb   : > { %v1053_v22 = vadd.f32 %v2368_v11, %v3029_v41  ;;  %2397 = vmatprep.mubr.bf16.mxu1 %v1096_v19  ;;  %v1084_v29 = vmax.f32 %v1042_v21, 0.0 }
 0x2fc   : > { %v1044_v24 = vpop.f32.mrf.mxu0  ;;  %2398 = vmatmul.mubr.bf16.gmra.mxu1 %v1097_v20 }
 0x2fd   : > { %v1045_v25 = vadd.f32 %v3029_v41, %v1044_v24  ;;  %v1087_v27 = vmax.f32 %v1053_v22, 0.0 }
 0x2fe   : > { %v2371_v28 = vpop.f32.mrf.mxu0 }
 0x2ff   : > { %v1085_v30 = vmax.f32 %v1045_v25, 0.0  ;;  %v1099_v34 = vpack.c.bf16 %v1087_v27, %v1086_v31  ;;  %v1066_v37 = vadd.f32 %v2371_v28, %v3029_v41 }
 0x300   : > { %v1057_v32 = vpop.f32.mrf.mxu0 }
 0x301   : > { %v1098_v33 = vpack.c.bf16 %v1085_v30, %v1084_v29  ;;  %v1058_v26 = vadd.f32 %v3029_v41, %v1057_v32  ;;  %v1090_v44 = vmax.f32 %v1066_v37, 0.0 }
 0x302   : > { %v2372_v35 = vpop.f32.mrf.mxu0 }
 0x303   : > { %v1069_v36 = vadd.f32 %v2372_v35, %v3029_v41  ;;  %2401 = vmatprep.mubr.bf16.mxu1 %v1098_v33  ;;  %v1088_v42 = vmax.f32 %v1058_v26, 0.0 }
 0x304   : > { %v1060_v38 = vpop.f32.mrf.mxu0  ;;  %2402 = vmatmul.mubr.bf16.gmra.mxu1 %v1099_v34 }
 0x305   : > { %v1061_v39 = vadd.f32 %v3029_v41, %v1060_v38  ;;  %v1091_v40 = vmax.f32 %v1069_v36, 0.0  ;;  %v2605_v41 = vld [vmem:[#allocation6 + $0x168] sm:$0xff]  }
 0x306   : > { %2449 = vmatprep.subr.bf16.mxu1 %v2605_v41 }
 0x307   : > { %v1089_v43 = vmax.f32 %v1061_v39, 0.0  ;;  %v1101_v46 = vpack.c.bf16 %v1091_v40, %v1090_v44  ;;  %2450 = vmatpush3.bf16.msra.mxu1 %v2605_v41 }
 0x308   : > { %2451 = vmatprep.subr.bf16.mxu1 %v2606_v51 }
 0x309   : > { %v1100_v45 = vpack.c.bf16 %v1089_v43, %v1088_v42 }
 0x30b   : > { %2405 = vmatprep.mubr.bf16.mxu1 %v1100_v45  ;;  %2452 = vmatpush3.bf16.msra.mxu1 %v2606_v51 }
 0x30c   : > { %2406 = vmatmul.mubr.bf16.gmra.mxu1 %v1101_v46  ;;  %2453 = vmatprep.subr.bf16.mxu1 %v2607_v52 }
 0x30f   : > { %2454 = vmatpush3.bf16.msra.mxu1 %v2607_v52 }
 0x310   : > { %2455 = vmatprep.subr.bf16.mxu1 %v2608_v53 }
 0x313   : > { %2456 = vmatpush3.bf16.msra.mxu1 %v2608_v53 }
 0x3ac   : > { %v2391_v54 = vpop.f32.mrf.mxu1 }
 0x3ad   : > { %v1218_v60 = vadd.f32 %v2391_v54, %v3051_v56 }
 0x3ae   : > { %v1209_v55 = vpop.f32.mrf.mxu1 }
 0x3af   : > { %v1210_v58 = vadd.f32 %v3051_v56, %v1209_v55  ;;  %v1290_v3 = vmax.f32 %v1218_v60, 0.0 }
 0x3b0   : > { %v2392_v57 = vpop.f32.mrf.mxu1 }
 0x3b1   : > { %v1221_v59 = vadd.f32 %v2392_v57, %v3051_v56  ;;  %v1288_v1 = vmax.f32 %v1210_v58, 0.0 }
 0x3b2   : > { %v1212_v61 = vpop.f32.mrf.mxu1 }
 0x3b3   : > { %v1213_v62 = vadd.f32 %v3051_v56, %v1212_v61  ;;  %v1291_v63 = vmax.f32 %v1221_v59, 0.0 }
 0x3b4   : > { %v2395_v0 = vpop.f32.mrf.mxu1 }
 0x3b5   : > { %v1289_v2 = vmax.f32 %v1213_v62, 0.0  ;;  %v1309_v6 = vpack.c.bf16 %v1291_v63, %v1290_v3  ;;  %v1234_v10 = vadd.f32 %v2395_v0, %v3051_v56  ;;  %v2609_v62 = vld [vmem:[#allocation6 + $0x148] sm:$0xff]   ;;  %v2610_v63 = vld [vmem:[#allocation6 + $0x140] sm:$0xff]  }
 0x3b6   : > { %v1225_v4 = vpop.f32.mrf.mxu1  ;;  %2457 = vmatprep.subr.bf16.mxu1 %v2609_v62 }
 0x3b7   : > { %v1308_v5 = vpack.c.bf16 %v1289_v2, %v1288_v1  ;;  %v1226_v8 = vadd.f32 %v3051_v56, %v1225_v4  ;;  %v1294_v18 = vmax.f32 %v1234_v10, 0.0  ;;  %2458 = vmatpush3.bf16.msra.mxu1 %v2609_v62  ;;  %v3073_v2 = vld [vmem:[#allocation8 + $0x4] ss:$0 sm:$0xff] }
 0x3b8   : > { %v2396_v7 = vpop.f32.mrf.mxu1  ;;  %2459 = vmatprep.subr.bf16.mxu1 %v2610_v63 }
 0x3b9   : > { %v1237_v9 = vadd.f32 %v2396_v7, %v3051_v56  ;;  %2425 = vmatprep.mubr.bf16.mxu0 %v1308_v5  ;;  %v1292_v16 = vmax.f32 %v1226_v8, 0.0 }
 0x3ba   : > { %v1228_v12 = vpop.f32.mrf.mxu1  ;;  %2426 = vmatmul.mubr.bf16.vlgmr.msra.gmra.mxu0 %v1309_v6 }
 0x3bb   : > { %v1229_v13 = vadd.f32 %v3051_v56, %v1228_v12  ;;  %v1295_v14 = vmax.f32 %v1237_v9, 0.0  ;;  %2460 = vmatpush3.bf16.msra.mxu1 %v2610_v63 }
 0x3bc   : > { %v2399_v15 = vpop.f32.mrf.mxu1 }
 0x3bd   : > { %v1293_v17 = vmax.f32 %v1229_v13, 0.0  ;;  %v1311_v11 = vpack.c.bf16 %v1295_v14, %v1294_v18  ;;  %v1250_v24 = vadd.f32 %v2399_v15, %v3051_v56 }
 0x3be   : > { %v1241_v19 = vpop.f32.mrf.mxu1 }
 0x3bf   : > { %v1310_v20 = vpack.c.bf16 %v1293_v17, %v1292_v16  ;;  %v1242_v22 = vadd.f32 %v3051_v56, %v1241_v19  ;;  %v1298_v32 = vmax.f32 %v1250_v24, 0.0 }
 0x3c0   : > { %v2400_v21 = vpop.f32.mrf.mxu1 }
 0x3c1   : > { %v1253_v23 = vadd.f32 %v2400_v21, %v3051_v56  ;;  %2429 = vmatprep.mubr.bf16.mxu0 %v1310_v20  ;;  %v1296_v30 = vmax.f32 %v1242_v22, 0.0 }
 0x3c2   : > { %v1244_v25 = vpop.f32.mrf.mxu1  ;;  %2430 = vmatmul.mubr.bf16.gmra.mxu0 %v1311_v11 }
 0x3c3   : > { %v1245_v27 = vadd.f32 %v3051_v56, %v1244_v25  ;;  %v1299_v28 = vmax.f32 %v1253_v23, 0.0 }
 0x3c4   : > { %v2403_v29 = vpop.f32.mrf.mxu1 }
 0x3c5   : > { %v1297_v31 = vmax.f32 %v1245_v27, 0.0  ;;  %v1313_v35 = vpack.c.bf16 %v1299_v28, %v1298_v32  ;;  %v1266_v38 = vadd.f32 %v2403_v29, %v3051_v56 }
 0x3c6   : > { %v1257_v33 = vpop.f32.mrf.mxu1 }
 0x3c7   : > { %v1312_v34 = vpack.c.bf16 %v1297_v31, %v1296_v30  ;;  %v1258_v36 = vadd.f32 %v3051_v56, %v1257_v33  ;;  %v1302_v46 = vmax.f32 %v1266_v38, 0.0 }
 0x3c8   : > { %v2404_v26 = vpop.f32.mrf.mxu1 }
 0x3c9   : > { %v1269_v37 = vadd.f32 %v2404_v26, %v3051_v56  ;;  %2433 = vmatprep.mubr.bf16.mxu0 %v1312_v34  ;;  %v1300_v44 = vmax.f32 %v1258_v36, 0.0 }
 0x3ca   : > { %v1260_v39 = vpop.f32.mrf.mxu1  ;;  %2434 = vmatmul.mubr.bf16.gmra.mxu0 %v1313_v35 }
 0x3cb   : > { %v1261_v40 = vadd.f32 %v3051_v56, %v1260_v39  ;;  %v1303_v42 = vmax.f32 %v1269_v37, 0.0 }
 0x3cc   : > { %v2407_v43 = vpop.f32.mrf.mxu1 }
 0x3cd   : > { %v1301_v45 = vmax.f32 %v1261_v40, 0.0  ;;  %v1315_v49 = vpack.c.bf16 %v1303_v42, %v1302_v46  ;;  %v1282_v52 = vadd.f32 %v2407_v43, %v3051_v56 }
 0x3ce   : > { %v1273_v47 = vpop.f32.mrf.mxu1 }
 0x3cf   : > { %v1314_v48 = vpack.c.bf16 %v1301_v45, %v1300_v44  ;;  %v1274_v41 = vadd.f32 %v3051_v56, %v1273_v47  ;;  %v1306_v59 = vmax.f32 %v1282_v52, 0.0 }
 0x3d0   : > { %v2408_v50 = vpop.f32.mrf.mxu1 }
 0x3d1   : > { %v1285_v51 = vadd.f32 %v2408_v50, %v3051_v56  ;;  %2437 = vmatprep.mubr.bf16.mxu0 %v1314_v48  ;;  %v1304_v57 = vmax.f32 %v1274_v41, 0.0 }
 0x3d2   : > { %v1276_v53 = vpop.f32.mrf.mxu1  ;;  %2438 = vmatmul.mubr.bf16.gmra.mxu0 %v1315_v49 }
 0x3d3   : > { %v1277_v54 = vadd.f32 %v3051_v56, %v1276_v53  ;;  %v1307_v55 = vmax.f32 %v1285_v51, 0.0 }
 0x3d5   : > { %v1305_v58 = vmax.f32 %v1277_v54, 0.0  ;;  %v1317_v61 = vpack.c.bf16 %v1307_v55, %v1306_v59 }
 0x3d7   : > { %v1316_v60 = vpack.c.bf16 %v1305_v58, %v1304_v57 }
 0x3d9   : > { %2441 = vmatprep.mubr.bf16.mxu0 %v1316_v60 }
 0x3da   : > { %2442 = vmatmul.mubr.bf16.gmra.mxu0 %v1317_v61 }
 0x47a   : > { %v2427_v0 = vpop.f32.mrf.mxu0 }
 0x47b   : > { %v1434_v5 = vadd.f32 %v2427_v0, %v3073_v2 }
 0x47c   : > { %v1425_v1 = vpop.f32.mrf.mxu0 }
 0x47d   : > { %v1426_v56 = vadd.f32 %v3073_v2, %v1425_v1  ;;  %v1506_v13 = vmax.f32 %v1434_v5, 0.0 }
 0x47e   : > { %v2428_v3 = vpop.f32.mrf.mxu0 }
 0x47f   : > { %v1437_v4 = vadd.f32 %v2428_v3, %v3073_v2  ;;  %v1504_v10 = vmax.f32 %v1426_v56, 0.0 }
 0x480   : > { %v1428_v6 = vpop.f32.mrf.mxu0 }
 0x481   : > { %v1429_v7 = vadd.f32 %v3073_v2, %v1428_v6  ;;  %v1507_v8 = vmax.f32 %v1437_v4, 0.0 }
 0x482   : > { %v2431_v9 = vpop.f32.mrf.mxu0 }
 0x483   : > { %v1505_v12 = vmax.f32 %v1429_v7, 0.0  ;;  %v1525_v16 = vpack.c.bf16 %v1507_v8, %v1506_v13  ;;  %v1450_v20 = vadd.f32 %v2431_v9, %v3073_v2  ;;  %v2020_v8 = vld [vmem:[#allocation8 + $0x5] ss:$0 sm:$0xff] }
 0x484   : > { %v1441_v14 = vpop.f32.mrf.mxu0 }
 0x485   : > { %v1524_v15 = vpack.c.bf16 %v1505_v12, %v1504_v10  ;;  %v1442_v18 = vadd.f32 %v3073_v2, %v1441_v14  ;;  %v1510_v27 = vmax.f32 %v1450_v20, 0.0 }
 0x486   : > { %v2432_v17 = vpop.f32.mrf.mxu0 }
 0x487   : > { %v1453_v19 = vadd.f32 %v2432_v17, %v3073_v2  ;;  %2461 = vmatprep.mubr.bf16.mxu1 %v1524_v15  ;;  %v1508_v24 = vmax.f32 %v1442_v18, 0.0 }
 0x488   : > { %v1444_v11 = vpop.f32.mrf.mxu0  ;;  %2462 = vmatmul.mubr.bf16.vlgmr.msra.gmra.mxu1 %v1525_v16 }
 0x489   : > { %v1445_v21 = vadd.f32 %v3073_v2, %v1444_v11  ;;  %v1511_v22 = vmax.f32 %v1453_v19, 0.0 }
 0x48a   : > { %v2435_v23 = vpop.f32.mrf.mxu0 }
 0x48b   : > { %v1509_v25 = vmax.f32 %v1445_v21, 0.0  ;;  %v1527_v30 = vpack.c.bf16 %v1511_v22, %v1510_v27  ;;  %v1466_v34 = vadd.f32 %v2435_v23, %v3073_v2 }
 0x48c   : > { %v1457_v28 = vpop.f32.mrf.mxu0 }
 0x48d   : > { %v1526_v29 = vpack.c.bf16 %v1509_v25, %v1508_v24  ;;  %v1458_v32 = vadd.f32 %v3073_v2, %v1457_v28  ;;  %v1514_v40 = vmax.f32 %v1466_v34, 0.0 }
 0x48e   : > { %v2436_v31 = vpop.f32.mrf.mxu0 }
 0x48f   : > { %v1469_v33 = vadd.f32 %v2436_v31, %v3073_v2  ;;  %2465 = vmatprep.mubr.bf16.mxu1 %v1526_v29  ;;  %v1512_v38 = vmax.f32 %v1458_v32, 0.0 }
 0x490   : > { %v1460_v35 = vpop.f32.mrf.mxu0  ;;  %2466 = vmatmul.mubr.bf16.gmra.mxu1 %v1527_v30 }
 0x491   : > { %v1461_v26 = vadd.f32 %v3073_v2, %v1460_v35  ;;  %v1515_v36 = vmax.f32 %v1469_v33, 0.0 }
 0x492   : > { %v2439_v37 = vpop.f32.mrf.mxu0 }
 0x493   : > { %v1513_v39 = vmax.f32 %v1461_v26, 0.0  ;;  %v1529_v44 = vpack.c.bf16 %v1515_v36, %v1514_v40  ;;  %v1482_v48 = vadd.f32 %v2439_v37, %v3073_v2 }
 0x494   : > { %v1473_v42 = vpop.f32.mrf.mxu0 }
 0x495   : > { %v1528_v43 = vpack.c.bf16 %v1513_v39, %v1512_v38  ;;  %v1474_v46 = vadd.f32 %v3073_v2, %v1473_v42  ;;  %v1518_v54 = vmax.f32 %v1482_v48, 0.0 }
 0x496   : > { %v2440_v45 = vpop.f32.mrf.mxu0 }
 0x497   : > { %v1485_v47 = vadd.f32 %v2440_v45, %v3073_v2  ;;  %2469 = vmatprep.mubr.bf16.mxu1 %v1528_v43  ;;  %v1516_v52 = vmax.f32 %v1474_v46, 0.0 }
 0x498   : > { %v1476_v49 = vpop.f32.mrf.mxu0  ;;  %2470 = vmatmul.mubr.bf16.gmra.mxu1 %v1529_v44 }
 0x499   : > { %v1477_v50 = vadd.f32 %v3073_v2, %v1476_v49  ;;  %v1519_v41 = vmax.f32 %v1485_v47, 0.0 }
 0x49a   : > { %v2443_v51 = vpop.f32.mrf.mxu0 }
 0x49b   : > { %v1517_v53 = vmax.f32 %v1477_v50, 0.0  ;;  %v1531_v58 = vpack.c.bf16 %v1519_v41, %v1518_v54  ;;  %v1498_v62 = vadd.f32 %v2443_v51, %v3073_v2 }
 0x49c   : > { %v1489_v55 = vpop.f32.mrf.mxu0 }
 0x49d   : > { %v1530_v57 = vpack.c.bf16 %v1517_v53, %v1516_v52  ;;  %v1490_v60 = vadd.f32 %v3073_v2, %v1489_v55  ;;  %v1522_v4 = vmax.f32 %v1498_v62, 0.0 }
 0x49e   : > { %v2444_v59 = vpop.f32.mrf.mxu0 }
 0x49f   : > { %v1501_v61 = vadd.f32 %v2444_v59, %v3073_v2  ;;  %2473 = vmatprep.mubr.bf16.mxu1 %v1530_v57  ;;  %v1520_v3 = vmax.f32 %v1490_v60, 0.0 }
 0x4a0   : > { %v1492_v63 = vpop.f32.mrf.mxu0  ;;  %2474 = vmatmul.mubr.bf16.gmra.mxu1 %v1531_v58 }
 0x4a1   : > { %v1493_v0 = vadd.f32 %v3073_v2, %v1492_v63  ;;  %v1523_v1 = vmax.f32 %v1501_v61, 0.0 }
 0x4a3   : > { %v1521_v56 = vmax.f32 %v1493_v0, 0.0  ;;  %v1533_v6 = vpack.c.bf16 %v1523_v1, %v1522_v4 }
 0x4a5   : > { %v1532_v5 = vpack.c.bf16 %v1521_v56, %v1520_v3 }
 0x4a7   : > { %2477 = vmatprep.mubr.bf16.mxu1 %v1532_v5 }
 0x4a8   : > { %2478 = vmatmul.mubr.bf16.gmra.mxu1 %v1533_v6 }
 0x548   : > { %v2463_v7 = vpop.f32.mrf.mxu1 }
 0x549   : > { %v1650_v12 = vadd.f32 %v2463_v7, %v2020_v8 }
 0x54a   : > { %v1641_v9 = vpop.f32.mrf.mxu1 }
 0x54b   : > { %v1642_v15 = vadd.f32 %v2020_v8, %v1641_v9 }
 0x54c   : > { %v2464_v10 = vpop.f32.mrf.mxu1 }
 0x54d   : > { %v1653_v13 = vadd.f32 %v2464_v10, %v2020_v8 }
 0x54e   : > { %v1644_v14 = vpop.f32.mrf.mxu1 }
 0x54f   : > { %v2106_v16 = vpack.c.bf16 %v1653_v13, %v1650_v12  ;;  %v1645_v17 = vadd.f32 %v2020_v8, %v1644_v14 }
 0x550   : > { %v2467_v2 = vpop.f32.mrf.mxu1 }
 0x551   : > { %2148 = vst [vmem:[%s3096_s26 + $0x8] sm:$0xff] %v2106_v16   ;;  %v2101_v18 = vpack.c.bf16 %v1645_v17, %v1642_v15  ;;  %v1666_v11 = vadd.f32 %v2467_v2, %v2020_v8 }
 0x552   : > { %v1657_v19 = vpop.f32.mrf.mxu1 }
 0x553   : > { %2102 = vst [vmem:[%s3096_s26] sm:$0xff] %v2101_v18   ;;  %v1658_v23 = vadd.f32 %v2020_v8, %v1657_v19 }
 0x554   : > { %v2468_v20 = vpop.f32.mrf.mxu1 }
 0x555   : > { %v1669_v21 = vadd.f32 %v2468_v20, %v2020_v8 }
 0x556   : > { %v1660_v22 = vpop.f32.mrf.mxu1 }
 0x557   : > { %v2116_v24 = vpack.c.bf16 %v1669_v21, %v1666_v11  ;;  %v1661_v25 = vadd.f32 %v2020_v8, %v1660_v22 }
 0x558   : > { %v2471_v27 = vpop.f32.mrf.mxu1 }
 0x559   : > { %2150 = vst [vmem:[%s3096_s26 + $0x18] sm:$0xff] %v2116_v24   ;;  %v2111_v28 = vpack.c.bf16 %v1661_v25, %v1658_v23  ;;  %v1682_v31 = vadd.f32 %v2471_v27, %v2020_v8 }
 0x55a   : > { %v1673_v29 = vpop.f32.mrf.mxu1 }
 0x55b   : > { %2149 = vst [vmem:[%s3096_s26 + $0x10] sm:$0xff] %v2111_v28   ;;  %v1674_v34 = vadd.f32 %v2020_v8, %v1673_v29 }
 0x55c   : > { %v2472_v30 = vpop.f32.mrf.mxu1 }
 0x55d   : > { %v1685_v32 = vadd.f32 %v2472_v30, %v2020_v8 }
 0x55e   : > { %v1676_v33 = vpop.f32.mrf.mxu1 }
 0x55f   : > { %v2126_v35 = vpack.c.bf16 %v1685_v32, %v1682_v31  ;;  %v1677_v26 = vadd.f32 %v2020_v8, %v1676_v33 }
 0x560   : > { %v2475_v36 = vpop.f32.mrf.mxu1 }
 0x561   : > { %2152 = vst [vmem:[%s3096_s26 + $0x28] sm:$0xff] %v2126_v35   ;;  %v2121_v37 = vpack.c.bf16 %v1677_v26, %v1674_v34  ;;  %v1698_v40 = vadd.f32 %v2475_v36, %v2020_v8 }
 0x562   : > { %v1689_v38 = vpop.f32.mrf.mxu1 }
 0x563   : > { %2151 = vst [vmem:[%s3096_s26 + $0x20] sm:$0xff] %v2121_v37   ;;  %v1690_v44 = vadd.f32 %v2020_v8, %v1689_v38 }
 0x564   : > { %v2476_v39 = vpop.f32.mrf.mxu1 }
 0x565   : > { %v1701_v42 = vadd.f32 %v2476_v39, %v2020_v8 }
 0x566   : > { %v1692_v43 = vpop.f32.mrf.mxu1 }
 0x567   : > { %v2136_v45 = vpack.c.bf16 %v1701_v42, %v1698_v40  ;;  %v1693_v46 = vadd.f32 %v2020_v8, %v1692_v43 }
 0x568   : > { %v2479_v47 = vpop.f32.mrf.mxu1 }
 0x569   : > { %2154 = vst [vmem:[%s3096_s26 + $0x38] sm:$0xff] %v2136_v45   ;;  %v2131_v48 = vpack.c.bf16 %v1693_v46, %v1690_v44  ;;  %v1714_v41 = vadd.f32 %v2479_v47, %v2020_v8 }
 0x56a   : > { %v1705_v49 = vpop.f32.mrf.mxu1 }
 0x56b   : > { %2153 = vst [vmem:[%s3096_s26 + $0x30] sm:$0xff] %v2131_v48   ;;  %v1706_v53 = vadd.f32 %v2020_v8, %v1705_v49 }
 0x56c   : > { %v2480_v50 = vpop.f32.mrf.mxu1 }
 0x56d   : > { %v1717_v51 = vadd.f32 %v2480_v50, %v2020_v8 }
 0x56e   : > { %v1708_v52 = vpop.f32.mrf.mxu1 }
 0x56f   : > { %v2146_v54 = vpack.c.bf16 %v1717_v51, %v1714_v41  ;;  %v1709_v55 = vadd.f32 %v2020_v8, %v1708_v52  ;;  %1827 = sbr.rel (!%p3185_p10) target bundleno = 1423 (0x58f), region = 48 }
 0x571   : > { %2156 = vst [vmem:[%s3096_s26 + $0x48] sm:$0xff] %v2146_v54   ;;  %v2141_v57 = vpack.c.bf16 %v1709_v55, %v1706_v53 }
 0x573   : > { %2155 = vst [vmem:[%s3096_s26 + $0x40] sm:$0xff] %v2141_v57  }
 0x574   : > { %s3194_s8 = smov (!%p1830_p1, %s1829_s8), 20 }
 0x575   : > { %s3112_s11 = sshll.u32 %s3194_s8, 6 }
 0x576   : > { %s1834_s28 = ssub.s32 1280, %s3112_s11 }
 0x577   : > { %1835 = vsyncadd %s1821_s29, %s1834_s28  ;;  %p2050_p3 = scmp.ne.s32.totalorder %s3112_s11, 0  ;;  %s2097_s24 = smul.u32 1280, %s2813_s16 }
 0x578   : > { %s1840_s30 = sshll.u32 %s3096_s26, 4  ;;  %s2769_s9 = smov [#allocation9]   ;;  %s3125_s30 = int_to_ptr.vmem [resolvable:$true] %s1840_s30 }
 0x579   : > { %s3123_s7 = scalar_lea.hbm %s3173_s3, %s2097_s24  ;;  %s2689_s22 = scalar_lea.vmem %s3125_s30, %s3112_s11 }
 0x57a   : > { %p2690_p7 = scmp.ne.s32.totalorder %s3125_s30, %s2689_s22  ;;  %s2693_s10 = sshll.u32 %s2769_s9, 4  ;;  %s2694_s10 = int_to_ptr.vmem [resolvable:$false] %s2693_s10 }
 0x57b   : > { %s2695_s16 = scalar_lea.vmem %s2694_s10, 2560  ;;  %p2696_p4 = scmp.lt.s32.totalorder %s3125_s30, %s2694_s10 }
 0x57c   : > { %p2691_p9 = pnand %p2690_p7, %p2050_p3  ;;  %p2697_p6 = scmp.lt.s32.totalorder %s2695_s16, %s2689_s22 }
 0x57e   : > { %p2692_p12 = pneg %p2691_p9  ;;  %p2698_p11 = por %p2697_p6, %p2696_p4 }
 0x580   : > { %p2699_p0 = pnand %p2698_p11, %p2692_p12 }
 0x582   : > { %2702 = shalt.err (!%p2699_p0)
}
 0x583   : > { %s2703_s19 = scalar_lea.hbm %s3123_s7, %s3112_s11  ;;  %s2707_s23 = scalar_lea.hbm %s3173_s3, 2432 }
 0x584   : > { %p2704_p2 = scmp.ne.s32.totalorder %s3123_s7, %s2703_s19  ;;  %p2708_p10 = scmp.lt.s32.totalorder %s3123_s7, %s3173_s3 }
 0x585   : > { %p2709_p1 = scmp.lt.s32.totalorder %s2707_s23, %s2703_s19 }
 0x586   : > { %p2705_p5 = pnand %p2704_p2, %p2050_p3 }
 0x587   : > { %p2710_p7 = por %p2709_p1, %p2708_p10 }
 0x588   : > { %p2706_p13 = pneg %p2705_p5 }
 0x58a   : > { %p2711_p9 = pnand %p2710_p7, %p2706_p13 }
 0x58c   : > { %2714 = shalt.err (!%p2711_p9)
}
 0x58d   : > { %s2770_s8 = smov 64   ;;  %s2771_s28 = smov 4  }
 0x58e   : > { %1846 = dma.vmem_to_hbm [thread:$0]  (%p2050_p3), %s3125_s30, %s3112_s11, %s3123_s7, %s1821_s29, %s2770_s8, %s2770_s8, %s2771_s28  }
 0x58f PF: > { %s1855_s24 = sand.u32 1, %s2745_s12   ;;  %p3186_p12 = scmp.ne.s32.totalorder %s3179_s25, 0 }
 0x590   : > { %s1856_s5 = scalar_lea.sflag [#allocation5], %s1855_s24 }
 0x591   : > { %p2502_p4 = pnand %p1936_p8, %p3186_p12 }
 0x593   : > { %p2503_p6 = pneg %p2502_p4 }
 0x595   : > { %2740 = dma.done.wait (%p2503_p6), %s1856_s5, 1280  }
 0x596   : > { %2742 = vsyncadd (%p2503_p6), %s1856_s5, 4294966016  ;;  %p17_p11 = scmp.ge.s32.totalorder %s2817_s18, 4   ;;  %s3187_s12 = smov %s2749_s13 }
 0x597   : > { %s3188_s13 = smov %s2753_s14  ;;  %s3189_s14 = smov %s2829_s21 }
 0x598   : > { %s3190_s15 = smov %s2817_s18  ;;  %19 = sbr.rel (!%p17_p11) target bundleno = 6 (0x6), region = 95 }
 0x59d   :  { %1861 = vsyncpa [#allocation4], 1 }
 0x59e   :  { %1863 = vsyncpa [#allocation4 + $0x1], 1 }
 0x59f   :  { %1864 = vsyncpa [#allocation7], 1 }
 0x5a0   :  { %1865 = vsyncpa [#allocation5], 1 }
 0x5a1   :  { %1867 = vsyncpa [#allocation5 + $0x1], 1 }

</bundles_post_ra>
